<compile_context>
chip_gen: v6e
topology: v6e:2x2x1
jax: 0.10.0
libtpu: 0.0.40
codegen_flags: <defaults>
</compile_context>

<pallas_src>
import math
import functools

import jax
import jax.numpy as jnp
from jax.experimental import pallas as pl
from jax.experimental.pallas import tpu as pltpu


_VMEM_LIMIT = 48 * 1024 * 1024  # conservative: fits v7x (64 MiB phys), > default scoped on v5e/v6e
_NEG_BIG = -1e9


# ---------------------------------------------------------------------------
# Tiling helper
# ---------------------------------------------------------------------------

def _pick_tile(n, candidates):
    """Largest candidate that evenly divides n; otherwise the full dim (always valid)."""
    for c in candidates:
        if n >= c and n % c == 0:
            return c
    return n


# ---------------------------------------------------------------------------
# Kernel 1: tiled linear   y = act(x @ W + b)    (bf16 in, bf16/f32 out, f32 acc)
# ---------------------------------------------------------------------------

def _linear_kernel(x_ref, w_ref, b_ref, o_ref, acc_ref, *, activation):
    @pl.when(pl.program_id(2) == 0)
    def _():
        acc_ref[...] = jnp.zeros_like(acc_ref)

    acc_ref[...] += jnp.dot(x_ref[...], w_ref[...],
                            preferred_element_type=jnp.float32)

    @pl.when(pl.program_id(2) == pl.num_programs(2) - 1)
    def _():
        y = acc_ref[...] + b_ref[...]
        if activation == "relu":
            y = jnp.maximum(y, 0.0)
        o_ref[...] = y.astype(o_ref.dtype)


def linear(x2d, w_bf16, b, activation=None, out_dtype=jnp.bfloat16):
    """x2d: [M, K] bf16, w_bf16: [K, N] bf16, b: [N] f32 -> [M, N] out_dtype."""
    M, K = x2d.shape
    Kw, N = w_bf16.shape
    assert K == Kw
    tm = _pick_tile(M, (512, 256, 128))
    tn = _pick_tile(N, (1024, 512, 256, 128))
    tk = _pick_tile(K, (512, 256))
    kernel = functools.partial(_linear_kernel, activation=activation)
    return pl.pallas_call(
        kernel,
        out_shape=jax.ShapeDtypeStruct((M, N), out_dtype),
        grid=(M // tm, N // tn, K // tk),
        in_specs=[
            pl.BlockSpec((tm, tk), lambda i, j, k: (i, k)),
            pl.BlockSpec((tk, tn), lambda i, j, k: (k, j)),
            pl.BlockSpec((1, tn), lambda i, j, k: (0, j)),
        ],
        out_specs=pl.BlockSpec((tm, tn), lambda i, j, k: (i, j)),
        scratch_shapes=[pltpu.VMEM((tm, tn), jnp.float32)],
        compiler_params=pltpu.CompilerParams(
            dimension_semantics=("parallel", "parallel", "arbitrary"),
            vmem_limit_bytes=_VMEM_LIMIT),
    )(x2d, w_bf16, b.reshape(1, N))


# ---------------------------------------------------------------------------
# Kernel 2: fused flash-style multi-head attention sub-layer
#   grid = (B, Sq_tiles, Sk_tiles); online softmax per head; epilogue does a single
#   [tq,D] x [D,D] out-projection matmul + residual add + LayerNorm.
#   Masks are built in-kernel: key-padding bias is a [1,1,tk] slab; causal uses iota.
# ---------------------------------------------------------------------------

def _mha_flash_kernel(res_ref, q_ref, k_ref, v_ref, kb_ref,
                      wo_ref, bo_ref, g_ref, bt_ref, o_ref,
                      m_sc, l_sc, acc_sc, *, n_head, causal, scale):
    ki = pl.program_id(2)
    tq = q_ref.shape[1]
    tk = k_ref.shape[1]
    D = q_ref.shape[2]
    dh = D // n_head

    @pl.when(ki == 0)
    def _():
        m_sc[...] = jnp.full(m_sc.shape, -1e30, m_sc.dtype)
        l_sc[...] = jnp.zeros_like(l_sc)
        acc_sc[...] = jnp.zeros_like(acc_sc)

    q = q_ref[0]                      # [tq, D] bf16
    k = k_ref[0]                      # [tk, D] bf16
    v = v_ref[0]                      # [tk, D] bf16

    # additive bias: key padding (+ in-kernel causal term)
    bias = kb_ref[0].astype(jnp.float32)                 # [1, tk], broadcasts over rows
    if causal:
        qi = pl.program_id(1)
        row = qi * tq + jax.lax.broadcasted_iota(jnp.int32, (tq, tk), 0)
        col = ki * tk + jax.lax.broadcasted_iota(jnp.int32, (tq, tk), 1)
        bias = bias + jnp.where(row >= col, 0.0, _NEG_BIG).astype(jnp.float32)

    for h in range(n_head):           # static unroll over heads (small n_head)
        lo = h * dh
        qh = q[:, lo:lo + dh]
        kh = k[:, lo:lo + dh]
        vh = v[:, lo:lo + dh]
        # contract last dims -> no explicit K transpose
        s = jax.lax.dot_general(qh, kh, (((1,), (1,)), ((), ())),
                                preferred_element_type=jnp.float32)
        s = s * scale + bias

        m_prev = m_sc[h]                                        # [tq, 1]
        m_new = jnp.maximum(m_prev, jnp.max(s, axis=-1, keepdims=True))
        alpha = jnp.exp(m_prev - m_new)
        p = jnp.exp(s - m_new)
        l_sc[h] = alpha * l_sc[h] + jnp.sum(p, axis=-1, keepdims=True)
        acc_sc[:, lo:lo + dh] = (alpha * acc_sc[:, lo:lo + dh] +
                                 jnp.dot(p.astype(jnp.bfloat16), vh,
                                         preferred_element_type=jnp.float32))
        m_sc[h] = m_new

    @pl.when(ki == pl.num_programs(2) - 1)
    def _():
        # per-head softmax normalization written back into the concat scratch
        for h in range(n_head):
            lo = h * dh
            inv = pl.reciprocal(l_sc[h], approx=True)           # EUP, off the VALU
            acc_sc[:, lo:lo + dh] = acc_sc[:, lo:lo + dh] * inv
        # single full-D-contraction output projection + residual + LayerNorm
        proj = jnp.dot(acc_sc[...].astype(jnp.bfloat16), wo_ref[...],
                       preferred_element_type=jnp.float32)      # [tq, D]
        y = res_ref[0].astype(jnp.float32) + proj + bo_ref[...]
        mu = jnp.mean(y, axis=-1, keepdims=True)
        var = jnp.mean((y - mu) ** 2, axis=-1, keepdims=True)
        yn = (y - mu) * jax.lax.rsqrt(var + 1e-5)
        o_ref[0] = (yn * g_ref[...] + bt_ref[...]).astype(o_ref.dtype)


def attention_sublayer(x_res, q_src, q_blk, kv_src, k_blk, v_blk, key_bias,
                       wo_bf16, bo, gamma, beta, *, n_head, causal):
    """LN(x_res + MHA(q, k, v) @ Wo + bo)  ->  [B, Sq, D] bf16.

    q/k/v slabs are selected from (possibly fused) source arrays purely through
    BlockSpec block-index offsets (q_blk/k_blk/v_blk along the last axis).
    key_bias: [B, 1, Sk] additive f32 key-padding bias (0 / -1e9).
    """
    B, Sq, D = x_res.shape
    Sk = kv_src.shape[1]
    tq = _pick_tile(Sq, (256, 128))
    tk = _pick_tile(Sk, (256, 128))
    dh = D // n_head
    scale = 1.0 / math.sqrt(dh)
    kernel = functools.partial(_mha_flash_kernel, n_head=n_head,
                               causal=causal, scale=scale)
    return pl.pallas_call(
        kernel,
        out_shape=jax.ShapeDtypeStruct((B, Sq, D), jnp.bfloat16),
        grid=(B, Sq // tq, Sk // tk),
        in_specs=[
            pl.BlockSpec((1, tq, D), lambda b, qi, ki: (b, qi, 0)),        # residual
            pl.BlockSpec((1, tq, D), lambda b, qi, ki: (b, qi, q_blk)),    # Q slab
            pl.BlockSpec((1, tk, D), lambda b, qi, ki: (b, ki, k_blk)),    # K slab
            pl.BlockSpec((1, tk, D), lambda b, qi, ki: (b, ki, v_blk)),    # V slab
            pl.BlockSpec((1, 1, tk), lambda b, qi, ki: (b, 0, ki)),        # key pad bias
            pl.BlockSpec((D, D), lambda b, qi, ki: (0, 0)),                # Wo (bf16)
            pl.BlockSpec((1, D), lambda b, qi, ki: (0, 0)),                # bo
            pl.BlockSpec((1, D), lambda b, qi, ki: (0, 0)),                # gamma
            pl.BlockSpec((1, D), lambda b, qi, ki: (0, 0)),                # beta
        ],
        out_specs=pl.BlockSpec((1, tq, D), lambda b, qi, ki: (b, qi, 0)),
        scratch_shapes=[
            pltpu.VMEM((n_head, tq, 1), jnp.float32),   # running max per head
            pltpu.VMEM((n_head, tq, 1), jnp.float32),   # running sum per head
            pltpu.VMEM((tq, D), jnp.float32),           # concat-head accumulator
        ],
        compiler_params=pltpu.CompilerParams(
            dimension_semantics=("parallel", "parallel", "arbitrary"),
            vmem_limit_bytes=_VMEM_LIMIT),
    )(x_res, q_src, kv_src, kv_src, key_bias, wo_bf16,
      bo.reshape(1, D), gamma.reshape(1, D), beta.reshape(1, D))


# ---------------------------------------------------------------------------
# Kernel 3: K-tiled second FFN matmul fused with residual add + LayerNorm
#   out = LN(res + h @ W2 + b2)
# ---------------------------------------------------------------------------

def _linear_resid_ln_kernel(res_ref, h_ref, w_ref, b_ref, g_ref, bt_ref,
                            o_ref, acc_ref):
    @pl.when(pl.program_id(1) == 0)
    def _():
        acc_ref[...] = jnp.zeros_like(acc_ref)

    acc_ref[...] += jnp.dot(h_ref[...], w_ref[...],
                            preferred_element_type=jnp.float32)

    @pl.when(pl.program_id(1) == pl.num_programs(1) - 1)
    def _():
        y = res_ref[...].astype(jnp.float32) + acc_ref[...] + b_ref[...]
        mu = jnp.mean(y, axis=-1, keepdims=True)
        var = jnp.mean((y - mu) ** 2, axis=-1, keepdims=True)
        yn = (y - mu) * jax.lax.rsqrt(var + 1e-5)
        o_ref[...] = (yn * g_ref[...] + bt_ref[...]).astype(o_ref.dtype)


def linear_resid_ln(res2d, h2d, w_bf16, b, gamma, beta):
    """res: [M, D] bf16, h: [M, K] bf16, W: [K, D] bf16 -> LN(res + h @ W + b) bf16."""
    M, D = res2d.shape
    _, K = h2d.shape
    tm = _pick_tile(M, (512, 256, 128))
    tk = _pick_tile(K, (512, 256))
    return pl.pallas_call(
        _linear_resid_ln_kernel,
        out_shape=jax.ShapeDtypeStruct((M, D), jnp.bfloat16),
        grid=(M // tm, K // tk),
        in_specs=[
            pl.BlockSpec((tm, D), lambda i, k: (i, 0)),
            pl.BlockSpec((tm, tk), lambda i, k: (i, k)),
            pl.BlockSpec((tk, D), lambda i, k: (k, 0)),
            pl.BlockSpec((1, D), lambda i, k: (0, 0)),
            pl.BlockSpec((1, D), lambda i, k: (0, 0)),
            pl.BlockSpec((1, D), lambda i, k: (0, 0)),
        ],
        out_specs=pl.BlockSpec((tm, D), lambda i, k: (i, 0)),
        scratch_shapes=[pltpu.VMEM((tm, D), jnp.float32)],
        compiler_params=pltpu.CompilerParams(
            dimension_semantics=("parallel", "arbitrary"),
            vmem_limit_bytes=_VMEM_LIMIT),
    )(res2d, h2d, w_bf16, b.reshape(1, D), gamma.reshape(1, D), beta.reshape(1, D))


# ---------------------------------------------------------------------------
# Model glue (plain JAX): embeddings, key-padding bias, layer stacking
# ---------------------------------------------------------------------------

def sinusoidal_positional_encoding(max_len, d_model):
    pos = jnp.arange(max_len, dtype=jnp.float32)[:, None]
    i = jnp.arange(0, d_model, 2, dtype=jnp.float32)
    angle = pos / jnp.power(10000.0, i / d_model)
    pe = jnp.zeros((max_len, d_model), dtype=jnp.float32)
    pe = pe.at[:, 0::2].set(jnp.sin(angle))
    pe = pe.at[:, 1::2].set(jnp.cos(angle))
    return pe


def embed(tokens, emb_table, pe, d_model):
    # TODO(synk): embedding gather stays in XLA (no clean static-tile Pallas form).
    B, S = tokens.shape
    x = jnp.take(emb_table, tokens, axis=0) * jnp.float32(math.sqrt(d_model))
    return (x + pe[:S][None, :, :]).astype(jnp.bfloat16)


def encoder_layer(x, src_bias, p, n_head):
    B, S, D = x.shape
    qkv = linear(x.reshape(B * S, D), p["att"]["w_qkv"], p["att"]["b_qkv"]).reshape(B, S, 3 * D)
    x = attention_sublayer(x, qkv, 0, qkv, 1, 2, src_bias,
                           p["att"]["wo"], p["att"]["bo"],
                           p["ln1_g"], p["ln1_b"], n_head=n_head, causal=False)
    h = linear(x.reshape(B * S, D), p["ffn"]["w1"], p["ffn"]["b1"], activation="relu")
    x = linear_resid_ln(x.reshape(B * S, D), h, p["ffn"]["w2"], p["ffn"]["b2"],
                        p["ln2_g"], p["ln2_b"]).reshape(B, S, D)
    return x


def decoder_layer(y, enc_out, trg_bias, src_bias, p, n_head):
    B, St, D = y.shape
    Ss = enc_out.shape[1]
    # masked (causal) self-attention — fused QKV split via BlockSpec offsets
    qkv = linear(y.reshape(B * St, D), p["self"]["w_qkv"], p["self"]["b_qkv"]).reshape(B, St, 3 * D)
    y = attention_sublayer(y, qkv, 0, qkv, 1, 2, trg_bias,
                           p["self"]["wo"], p["self"]["bo"],
                           p["ln1_g"], p["ln1_b"], n_head=n_head, causal=True)
    # cross attention (Q from decoder, fused K|V from encoder output)
    qc = linear(y.reshape(B * St, D), p["cross"]["wq"], p["cross"]["bq"]).reshape(B, St, D)
    kv = linear(enc_out.reshape(B * Ss, D), p["cross"]["w_kv"], p["cross"]["b_kv"]).reshape(B, Ss, 2 * D)
    y = attention_sublayer(y, qc, 0, kv, 0, 1, src_bias,
                           p["cross"]["wo"], p["cross"]["bo"],
                           p["ln2_g"], p["ln2_b"], n_head=n_head, causal=False)
    # position-wise FFN
    h = linear(y.reshape(B * St, D), p["ffn"]["w1"], p["ffn"]["b1"], activation="relu")
    y = linear_resid_ln(y.reshape(B * St, D), h, p["ffn"]["w2"], p["ffn"]["b2"],
                        p["ln3_g"], p["ln3_b"]).reshape(B, St, D)
    return y


def transformer_forward(params, src, trg, *, n_head, d_model, pad_idx=0):
    B, Ss = src.shape
    _, St = trg.shape

    # Tiny per-key additive padding bias (0 / -1e9); masks themselves are built
    # in-kernel (padding broadcast + iota-based causal), never materialized at S^2.
    src_bias = jnp.where(src != pad_idx, 0.0, _NEG_BIG).astype(jnp.float32).reshape(B, 1, Ss)
    trg_bias = jnp.where(trg != pad_idx, 0.0, _NEG_BIG).astype(jnp.float32).reshape(B, 1, St)

    pe = params["pe"]

    # encoder
    x = embed(src, params["src_emb"], pe, d_model)
    for lp in params["enc_layers"]:
        x = encoder_layer(x, src_bias, lp, n_head)
    enc_out = x

    # decoder
    y = embed(trg, params["trg_emb"], pe, d_model)
    for lp in params["dec_layers"]:
        y = decoder_layer(y, enc_out, trg_bias, src_bias, lp, n_head)

    # final projection to target-vocab logits (f32 out)
    logits = linear(y.reshape(B * St, d_model), params["out_w"], params["out_b"],
                    out_dtype=jnp.float32)
    V = params["out_w"].shape[1]
    return logits.reshape(B, St, V)


# ---------------------------------------------------------------------------
# Deterministic parameter initialization (matmul weights stored in bf16)
# ---------------------------------------------------------------------------

def _dense_w(key, din, dout, scale=0.02):
    return (scale * jax.random.normal(key, (din, dout), jnp.float32)).astype(jnp.bfloat16)


def init_params(key, *, src_vocab, trg_vocab, d_model, d_ff,
                n_enc_layers, n_dec_layers, max_len):
    keys = iter(jax.random.split(key, 128))

    def self_attn():
        return {
            "w_qkv": _dense_w(next(keys), d_model, 3 * d_model),
            "b_qkv": jnp.zeros((3 * d_model,), jnp.float32),
            "wo": _dense_w(next(keys), d_model, d_model),
            "bo": jnp.zeros((d_model,), jnp.float32),
        }

    def cross_attn():
        return {
            "wq": _dense_w(next(keys), d_model, d_model),
            "bq": jnp.zeros((d_model,), jnp.float32),
            "w_kv": _dense_w(next(keys), d_model, 2 * d_model),
            "b_kv": jnp.zeros((2 * d_model,), jnp.float32),
            "wo": _dense_w(next(keys), d_model, d_model),
            "bo": jnp.zeros((d_model,), jnp.float32),
        }

    def ffn():
        return {
            "w1": _dense_w(next(keys), d_model, d_ff),
            "b1": jnp.zeros((d_ff,), jnp.float32),
            "w2": _dense_w(next(keys), d_ff, d_model),
            "b2": jnp.zeros((d_model,), jnp.float32),
        }

    def ln():
        return jnp.ones((d_model,), jnp.float32), jnp.zeros((d_model,), jnp.float32)

    enc_layers = []
    for _ in range(n_enc_layers):
        g1, b1 = ln()
        g2, b2 = ln()
        enc_layers.append({"att": self_attn(), "ffn": ffn(),
                           "ln1_g": g1, "ln1_b": b1, "ln2_g": g2, "ln2_b": b2})

    dec_layers = []
    for _ in range(n_dec_layers):
        g1, b1 = ln()
        g2, b2 = ln()
        g3, b3 = ln()
        dec_layers.append({"self": self_attn(), "cross": cross_attn(), "ffn": ffn(),
                           "ln1_g": g1, "ln1_b": b1, "ln2_g": g2, "ln2_b": b2,
                           "ln3_g": g3, "ln3_b": b3})

    return {
        "src_emb": 0.02 * jax.random.normal(next(keys), (src_vocab, d_model), jnp.float32),
        "trg_emb": 0.02 * jax.random.normal(next(keys), (trg_vocab, d_model), jnp.float32),
        "pe": sinusoidal_positional_encoding(max_len, d_model),
        "enc_layers": enc_layers,
        "dec_layers": dec_layers,
        "out_w": _dense_w(next(keys), d_model, trg_vocab),
        "out_b": jnp.zeros((trg_vocab,), jnp.float32),
    }


# ---------------------------------------------------------------------------
# Main
# ---------------------------------------------------------------------------

if __name__ == "__main__":
    B = 2
    S_SRC = 8
    S_TRG = 8
    SRC_VOCAB = 256
    TRG_VOCAB = 256
    D_MODEL = 128          # lane-aligned so Q/K/V BlockSpec slabs are 128-divisible
    N_HEAD = 4
    D_FF = 256
    N_ENC = 2
    N_DEC = 2
    MAX_LEN = 64
    PAD_IDX = 0

    key = jax.random.PRNGKey(0)
    k_params, k_src, k_trg = jax.random.split(key, 3)

    params = init_params(
        k_params, src_vocab=SRC_VOCAB, trg_vocab=TRG_VOCAB,
        d_model=D_MODEL, d_ff=D_FF,
        n_enc_layers=N_ENC, n_dec_layers=N_DEC, max_len=MAX_LEN)

    # token ids in [1, vocab) plus trailing pad tokens (index 0)
    src = jax.random.randint(k_src, (B, S_SRC), 1, SRC_VOCAB, dtype=jnp.int32)
    trg = jax.random.randint(k_trg, (B, S_TRG), 1, TRG_VOCAB, dtype=jnp.int32)
    src = src.at[:, -2:].set(PAD_IDX)
    trg = trg.at[:, -1:].set(PAD_IDX)

    fwd = functools.partial(transformer_forward,
                            n_head=N_HEAD, d_model=D_MODEL, pad_idx=PAD_IDX)
    logits = jax.jit(fwd)(params, src, trg)
    logits = jax.block_until_ready(logits)

    assert logits.shape == (B, S_TRG, TRG_VOCAB)
    assert bool(jnp.all(jnp.isfinite(logits)))
    print("KERNEL_OK")
</pallas_src>

<mosaic_0001>
module attributes {stable_mosaic.version = 11 : i64} {
  func.func @_mha_flash_kernel(%arg0: i32, %arg1: i32, %arg2: i32, %arg3: memref<1x8x128xbf16, #tpu.memory_space<vmem>>, %arg4: memref<1x8x128xbf16, #tpu.memory_space<vmem>>, %arg5: memref<1x8x128xbf16, #tpu.memory_space<vmem>>, %arg6: memref<1x8x128xbf16, #tpu.memory_space<vmem>>, %arg7: memref<1x1x8xf32, #tpu.memory_space<vmem>>, %arg8: memref<128x128xbf16, #tpu.memory_space<vmem>>, %arg9: memref<1x128xf32, #tpu.memory_space<vmem>>, %arg10: memref<1x128xf32, #tpu.memory_space<vmem>>, %arg11: memref<1x128xf32, #tpu.memory_space<vmem>>, %arg12: memref<1x8x128xbf16, #tpu.memory_space<vmem>>, %arg13: memref<4x8x1xf32, #tpu.memory_space<vmem>>, %arg14: memref<4x8x1xf32, #tpu.memory_space<vmem>>, %arg15: memref<8x128xf32, #tpu.memory_space<vmem>>) attributes {dimension_semantics = [#tpu.dimension_semantics<parallel>, #tpu.dimension_semantics<parallel>, #tpu.dimension_semantics<arbitrary>], iteration_bounds = array<i64: 2, 1, 1>, scalar_prefetch = 0 : i64, scratch_operands = 3 : i64, tpu.core_type = #tpu.core_type<tc>, window_params = [{transform_indices = @transform_0, window_bounds = array<i64: 1, 8, 128>}, {transform_indices = @transform_1, window_bounds = array<i64: 1, 8, 128>}, {transform_indices = @transform_2, window_bounds = array<i64: 1, 8, 128>}, {transform_indices = @transform_3, window_bounds = array<i64: 1, 8, 128>}, {transform_indices = @transform_4, window_bounds = array<i64: 1, 1, 8>}, {pipeline_mode = #tpu.pipeline_mode<synchronous>, transform_indices = @transform_5, window_bounds = array<i64: 128, 128>}, {pipeline_mode = #tpu.pipeline_mode<synchronous>, transform_indices = @transform_6, window_bounds = array<i64: 1, 128>}, {pipeline_mode = #tpu.pipeline_mode<synchronous>, transform_indices = @transform_7, window_bounds = array<i64: 1, 128>}, {pipeline_mode = #tpu.pipeline_mode<synchronous>, transform_indices = @transform_8, window_bounds = array<i64: 1, 128>}, {transform_indices = @transform_9, window_bounds = array<i64: 1, 8, 128>}]} {
    %c0_i32 = arith.constant 0 : i32
    %0 = arith.cmpi eq, %arg2, %c0_i32 : i32
    %1 = arith.extui %0 : i1 to i32
    %c0_i32_0 = arith.constant 0 : i32
    %2 = arith.cmpi ne, %1, %c0_i32_0 : i32
    scf.if %2 {
      %cst_91 = arith.constant -1.000000e+30 : f32
      %162 = vector.broadcast %cst_91 : f32 to vector<4x8x1xf32>
      %c0_92 = arith.constant 0 : index
      %c0_93 = arith.constant 0 : index
      %c0_94 = arith.constant 0 : index
      %163 = vector.load %arg13[%c0_92, %c0_93, %c0_94] : memref<4x8x1xf32, #tpu.memory_space<vmem>>, vector<4x8x1xf32>
      tpu.vector_store %arg13[%c0_92, %c0_93, %c0_94], %162 {strides = array<i32>} : memref<4x8x1xf32, #tpu.memory_space<vmem>>, vector<4x8x1xf32>,
      %cst_95 = arith.constant 0.000000e+00 : f32
      %164 = vector.broadcast %cst_95 : f32 to vector<4x8x1xf32>
      %c0_96 = arith.constant 0 : index
      %c0_97 = arith.constant 0 : index
      %c0_98 = arith.constant 0 : index
      %165 = vector.load %arg14[%c0_96, %c0_97, %c0_98] : memref<4x8x1xf32, #tpu.memory_space<vmem>>, vector<4x8x1xf32>
      tpu.vector_store %arg14[%c0_96, %c0_97, %c0_98], %164 {strides = array<i32>} : memref<4x8x1xf32, #tpu.memory_space<vmem>>, vector<4x8x1xf32>,
      %cst_99 = arith.constant 0.000000e+00 : f32
      %166 = vector.broadcast %cst_99 : f32 to vector<8x128xf32>
      %c0_100 = arith.constant 0 : index
      %c0_101 = arith.constant 0 : index
      %167 = vector.load %arg15[%c0_100, %c0_101] : memref<8x128xf32, #tpu.memory_space<vmem>>, vector<8x128xf32>
      tpu.vector_store %arg15[%c0_100, %c0_101], %166 {strides = array<i32>} : memref<8x128xf32, #tpu.memory_space<vmem>>, vector<8x128xf32>,
    } else {
    }
    %c0 = arith.constant 0 : index
    %c0_1 = arith.constant 0 : index
    %c0_2 = arith.constant 0 : index
    %3 = vector.load %arg4[%c0, %c0_1, %c0_2] : memref<1x8x128xbf16, #tpu.memory_space<vmem>>, vector<1x8x128xbf16>
    %4 = vector.shape_cast %3 : vector<1x8x128xbf16> to vector<8x128xbf16>
    %c0_3 = arith.constant 0 : index
    %c0_4 = arith.constant 0 : index
    %c0_5 = arith.constant 0 : index
    %5 = vector.load %arg5[%c0_3, %c0_4, %c0_5] : memref<1x8x128xbf16, #tpu.memory_space<vmem>>, vector<1x8x128xbf16>
    %6 = vector.shape_cast %5 : vector<1x8x128xbf16> to vector<8x128xbf16>
    %c0_6 = arith.constant 0 : index
    %c0_7 = arith.constant 0 : index
    %c0_8 = arith.constant 0 : index
    %7 = vector.load %arg6[%c0_6, %c0_7, %c0_8] : memref<1x8x128xbf16, #tpu.memory_space<vmem>>, vector<1x8x128xbf16>
    %8 = vector.shape_cast %7 : vector<1x8x128xbf16> to vector<8x128xbf16>
    %c0_9 = arith.constant 0 : index
    %c0_10 = arith.constant 0 : index
    %c0_11 = arith.constant 0 : index
    %9 = vector.load %arg7[%c0_9, %c0_10, %c0_11] : memref<1x1x8xf32, #tpu.memory_space<vmem>>, vector<1x1x8xf32>
    %10 = vector.shape_cast %9 : vector<1x1x8xf32> to vector<1x8xf32>
    %11 = vector.extract_strided_slice %4 {offsets = [0, 0], sizes = [8, 32], strides = [1, 1]} : vector<8x128xbf16> to vector<8x32xbf16>
    %12 = vector.extract_strided_slice %6 {offsets = [0, 0], sizes = [8, 32], strides = [1, 1]} : vector<8x128xbf16> to vector<8x32xbf16>
    %13 = vector.extract_strided_slice %8 {offsets = [0, 0], sizes = [8, 32], strides = [1, 1]} : vector<8x128xbf16> to vector<8x32xbf16>
    %cst = arith.constant dense<0.000000e+00> : vector<8x8xf32>
    %14 = tpu.matmul %11, %12, %cst {dimension_numbers = #tpu.dot_dimension_numbers<[1], [1], [0], [0], [0, 0, 1, 0], [], []>} : vector<8x32xbf16>, vector<8x32xbf16>, vector<8x8xf32> -> vector<8x8xf32>
    %cst_12 = arith.constant 0.176776692 : f32
    %15 = vector.broadcast %cst_12 : f32 to vector<8x8xf32>
    %16 = arith.mulf %14, %15 : vector<8x8xf32>
    %17 = vector.broadcast %10 : vector<1x8xf32> to vector<8x8xf32>
    %18 = arith.addf %16, %17 : vector<8x8xf32>
    %c0_13 = arith.constant 0 : index
    %c0_14 = arith.constant 0 : index
    %c0_15 = arith.constant 0 : index
    %19 = vector.load %arg13[%c0_13, %c0_14, %c0_15] : memref<4x8x1xf32, #tpu.memory_space<vmem>>, vector<1x8x1xf32>
    %20 = vector.shape_cast %19 : vector<1x8x1xf32> to vector<8x1xf32>
    %cst_16 = arith.constant dense<0xFF800000> : vector<8xf32>
    %21 = vector.multi_reduction <maximumf>, %18, %cst_16 [1] : vector<8x8xf32> to vector<8xf32>
    %22 = vector.shape_cast %21 : vector<8xf32> to vector<8x1xf32>
    %23 = arith.maximumf %20, %22 : vector<8x1xf32>
    %24 = arith.subf %20, %23 : vector<8x1xf32>
    %25 = math.exp %24 : vector<8x1xf32>
    %26 = vector.broadcast %23 : vector<8x1xf32> to vector<8x8xf32>
    %27 = arith.subf %18, %26 : vector<8x8xf32>
    %28 = math.exp %27 : vector<8x8xf32>
    %c0_17 = arith.constant 0 : index
    %c0_18 = arith.constant 0 : index
    %c0_19 = arith.constant 0 : index
    %29 = vector.load %arg14[%c0_17, %c0_18, %c0_19] : memref<4x8x1xf32, #tpu.memory_space<vmem>>, vector<1x8x1xf32>
    %30 = vector.shape_cast %29 : vector<1x8x1xf32> to vector<8x1xf32>
    %31 = arith.mulf %25, %30 : vector<8x1xf32>
    %cst_20 = arith.constant dense<0.000000e+00> : vector<8xf32>
    %32 = vector.multi_reduction <add>, %28, %cst_20 [1] : vector<8x8xf32> to vector<8xf32>
    %33 = vector.shape_cast %32 : vector<8xf32> to vector<8x1xf32>
    %34 = arith.addf %31, %33 : vector<8x1xf32>
    %c0_21 = arith.constant 0 : index
    %c0_22 = arith.constant 0 : index
    %c0_23 = arith.constant 0 : index
    %35 = vector.load %arg14[%c0_21, %c0_22, %c0_23] : memref<4x8x1xf32, #tpu.memory_space<vmem>>, vector<1x8x1xf32>
    %36 = vector.shape_cast %35 : vector<1x8x1xf32> to vector<8x1xf32>
    %37 = vector.shape_cast %34 : vector<8x1xf32> to vector<1x8x1xf32>
    tpu.vector_store %arg14[%c0_21, %c0_22, %c0_23], %37 {strides = array<i32>} : memref<4x8x1xf32, #tpu.memory_space<vmem>>, vector<1x8x1xf32>,
    %c0_24 = arith.constant 0 : index
    %c0_25 = arith.constant 0 : index
    %38 = vector.load %arg15[%c0_24, %c0_25] : memref<8x128xf32, #tpu.memory_space<vmem>>, vector<8x32xf32>
    %39 = vector.broadcast %25 : vector<8x1xf32> to vector<8x32xf32>
    %40 = arith.mulf %39, %38 : vector<8x32xf32>
    %41 = arith.truncf %28 : vector<8x8xf32> to vector<8x8xbf16>
    %cst_26 = arith.constant dense<0.000000e+00> : vector<8x32xf32>
    %42 = tpu.matmul %41, %13, %cst_26 {dimension_numbers = #tpu.dot_dimension_numbers<[1], [0], [0], [1], [0, 0, 1, 1], [], []>} : vector<8x8xbf16>, vector<8x32xbf16>, vector<8x32xf32> -> vector<8x32xf32>
    %43 = arith.addf %40, %42 : vector<8x32xf32>
    %c0_27 = arith.constant 0 : index
    %c0_28 = arith.constant 0 : index
    %44 = vector.load %arg15[%c0_27, %c0_28] : memref<8x128xf32, #tpu.memory_space<vmem>>, vector<8x32xf32>
    tpu.vector_store %arg15[%c0_27, %c0_28], %43 {strides = array<i32>} : memref<8x128xf32, #tpu.memory_space<vmem>>, vector<8x32xf32>,
    %c0_29 = arith.constant 0 : index
    %c0_30 = arith.constant 0 : index
    %c0_31 = arith.constant 0 : index
    %45 = vector.load %arg13[%c0_29, %c0_30, %c0_31] : memref<4x8x1xf32, #tpu.memory_space<vmem>>, vector<1x8x1xf32>
    %46 = vector.shape_cast %45 : vector<1x8x1xf32> to vector<8x1xf32>
    %47 = vector.shape_cast %23 : vector<8x1xf32> to vector<1x8x1xf32>
    tpu.vector_store %arg13[%c0_29, %c0_30, %c0_31], %47 {strides = array<i32>} : memref<4x8x1xf32, #tpu.memory_space<vmem>>, vector<1x8x1xf32>,
    %48 = vector.extract_strided_slice %4 {offsets = [0, 32], sizes = [8, 32], strides = [1, 1]} : vector<8x128xbf16> to vector<8x32xbf16>
    %49 = vector.extract_strided_slice %6 {offsets = [0, 32], sizes = [8, 32], strides = [1, 1]} : vector<8x128xbf16> to vector<8x32xbf16>
    %50 = vector.extract_strided_slice %8 {offsets = [0, 32], sizes = [8, 32], strides = [1, 1]} : vector<8x128xbf16> to vector<8x32xbf16>
    %cst_32 = arith.constant dense<0.000000e+00> : vector<8x8xf32>
    %51 = tpu.matmul %48, %49, %cst_32 {dimension_numbers = #tpu.dot_dimension_numbers<[1], [1], [0], [0], [0, 0, 1, 0], [], []>} : vector<8x32xbf16>, vector<8x32xbf16>, vector<8x8xf32> -> vector<8x8xf32>
    %cst_33 = arith.constant 0.176776692 : f32
    %52 = vector.broadcast %cst_33 : f32 to vector<8x8xf32>
    %53 = arith.mulf %51, %52 : vector<8x8xf32>
    %54 = vector.broadcast %10 : vector<1x8xf32> to vector<8x8xf32>
    %55 = arith.addf %53, %54 : vector<8x8xf32>
    %c1 = arith.constant 1 : index
    %c0_34 = arith.constant 0 : index
    %c0_35 = arith.constant 0 : index
    %56 = vector.load %arg13[%c1, %c0_34, %c0_35] : memref<4x8x1xf32, #tpu.memory_space<vmem>>, vector<1x8x1xf32>
    %57 = vector.shape_cast %56 : vector<1x8x1xf32> to vector<8x1xf32>
    %cst_36 = arith.constant dense<0xFF800000> : vector<8xf32>
    %58 = vector.multi_reduction <maximumf>, %55, %cst_36 [1] : vector<8x8xf32> to vector<8xf32>
    %59 = vector.shape_cast %58 : vector<8xf32> to vector<8x1xf32>
    %60 = arith.maximumf %57, %59 : vector<8x1xf32>
    %61 = arith.subf %57, %60 : vector<8x1xf32>
    %62 = math.exp %61 : vector<8x1xf32>
    %63 = vector.broadcast %60 : vector<8x1xf32> to vector<8x8xf32>
    %64 = arith.subf %55, %63 : vector<8x8xf32>
    %65 = math.exp %64 : vector<8x8xf32>
    %c1_37 = arith.constant 1 : index
    %c0_38 = arith.constant 0 : index
    %c0_39 = arith.constant 0 : index
    %66 = vector.load %arg14[%c1_37, %c0_38, %c0_39] : memref<4x8x1xf32, #tpu.memory_space<vmem>>, vector<1x8x1xf32>
    %67 = vector.shape_cast %66 : vector<1x8x1xf32> to vector<8x1xf32>
    %68 = arith.mulf %62, %67 : vector<8x1xf32>
    %cst_40 = arith.constant dense<0.000000e+00> : vector<8xf32>
    %69 = vector.multi_reduction <add>, %65, %cst_40 [1] : vector<8x8xf32> to vector<8xf32>
    %70 = vector.shape_cast %69 : vector<8xf32> to vector<8x1xf32>
    %71 = arith.addf %68, %70 : vector<8x1xf32>
    %c1_41 = arith.constant 1 : index
    %c0_42 = arith.constant 0 : index
    %c0_43 = arith.constant 0 : index
    %72 = vector.load %arg14[%c1_41, %c0_42, %c0_43] : memref<4x8x1xf32, #tpu.memory_space<vmem>>, vector<1x8x1xf32>
    %73 = vector.shape_cast %72 : vector<1x8x1xf32> to vector<8x1xf32>
    %74 = vector.shape_cast %71 : vector<8x1xf32> to vector<1x8x1xf32>
    tpu.vector_store %arg14[%c1_41, %c0_42, %c0_43], %74 {strides = array<i32>} : memref<4x8x1xf32, #tpu.memory_space<vmem>>, vector<1x8x1xf32>,
    %c0_44 = arith.constant 0 : index
    %c32 = arith.constant 32 : index
    %75 = vector.load %arg15[%c0_44, %c32] : memref<8x128xf32, #tpu.memory_space<vmem>>, vector<8x32xf32>
    %76 = vector.broadcast %62 : vector<8x1xf32> to vector<8x32xf32>
    %77 = arith.mulf %76, %75 : vector<8x32xf32>
    %78 = arith.truncf %65 : vector<8x8xf32> to vector<8x8xbf16>
    %cst_45 = arith.constant dense<0.000000e+00> : vector<8x32xf32>
    %79 = tpu.matmul %78, %50, %cst_45 {dimension_numbers = #tpu.dot_dimension_numbers<[1], [0], [0], [1], [0, 0, 1, 1], [], []>} : vector<8x8xbf16>, vector<8x32xbf16>, vector<8x32xf32> -> vector<8x32xf32>
    %80 = arith.addf %77, %79 : vector<8x32xf32>
    %c0_46 = arith.constant 0 : index
    %c32_47 = arith.constant 32 : index
    %81 = vector.load %arg15[%c0_46, %c32_47] : memref<8x128xf32, #tpu.memory_space<vmem>>, vector<8x32xf32>
    tpu.vector_store %arg15[%c0_46, %c32_47], %80 {strides = array<i32>} : memref<8x128xf32, #tpu.memory_space<vmem>>, vector<8x32xf32>,
    %c1_48 = arith.constant 1 : index
    %c0_49 = arith.constant 0 : index
    %c0_50 = arith.constant 0 : index
    %82 = vector.load %arg13[%c1_48, %c0_49, %c0_50] : memref<4x8x1xf32, #tpu.memory_space<vmem>>, vector<1x8x1xf32>
    %83 = vector.shape_cast %82 : vector<1x8x1xf32> to vector<8x1xf32>
    %84 = vector.shape_cast %60 : vector<8x1xf32> to vector<1x8x1xf32>
    tpu.vector_store %arg13[%c1_48, %c0_49, %c0_50], %84 {strides = array<i32>} : memref<4x8x1xf32, #tpu.memory_space<vmem>>, vector<1x8x1xf32>,
    %85 = vector.extract_strided_slice %4 {offsets = [0, 64], sizes = [8, 32], strides = [1, 1]} : vector<8x128xbf16> to vector<8x32xbf16>
    %86 = vector.extract_strided_slice %6 {offsets = [0, 64], sizes = [8, 32], strides = [1, 1]} : vector<8x128xbf16> to vector<8x32xbf16>
    %87 = vector.extract_strided_slice %8 {offsets = [0, 64], sizes = [8, 32], strides = [1, 1]} : vector<8x128xbf16> to vector<8x32xbf16>
    %cst_51 = arith.constant dense<0.000000e+00> : vector<8x8xf32>
    %88 = tpu.matmul %85, %86, %cst_51 {dimension_numbers = #tpu.dot_dimension_numbers<[1], [1], [0], [0], [0, 0, 1, 0], [], []>} : vector<8x32xbf16>, vector<8x32xbf16>, vector<8x8xf32> -> vector<8x8xf32>
    %cst_52 = arith.constant 0.176776692 : f32
    %89 = vector.broadcast %cst_52 : f32 to vector<8x8xf32>
    %90 = arith.mulf %88, %89 : vector<8x8xf32>
    %91 = vector.broadcast %10 : vector<1x8xf32> to vector<8x8xf32>
    %92 = arith.addf %90, %91 : vector<8x8xf32>
    %c2 = arith.constant 2 : index
    %c0_53 = arith.constant 0 : index
    %c0_54 = arith.constant 0 : index
    %93 = vector.load %arg13[%c2, %c0_53, %c0_54] : memref<4x8x1xf32, #tpu.memory_space<vmem>>, vector<1x8x1xf32>
    %94 = vector.shape_cast %93 : vector<1x8x1xf32> to vector<8x1xf32>
    %cst_55 = arith.constant dense<0xFF800000> : vector<8xf32>
    %95 = vector.multi_reduction <maximumf>, %92, %cst_55 [1] : vector<8x8xf32> to vector<8xf32>
    %96 = vector.shape_cast %95 : vector<8xf32> to vector<8x1xf32>
    %97 = arith.maximumf %94, %96 : vector<8x1xf32>
    %98 = arith.subf %94, %97 : vector<8x1xf32>
    %99 = math.exp %98 : vector<8x1xf32>
    %100 = vector.broadcast %97 : vector<8x1xf32> to vector<8x8xf32>
    %101 = arith.subf %92, %100 : vector<8x8xf32>
    %102 = math.exp %101 : vector<8x8xf32>
    %c2_56 = arith.constant 2 : index
    %c0_57 = arith.constant 0 : index
    %c0_58 = arith.constant 0 : index
    %103 = vector.load %arg14[%c2_56, %c0_57, %c0_58] : memref<4x8x1xf32, #tpu.memory_space<vmem>>, vector<1x8x1xf32>
    %104 = vector.shape_cast %103 : vector<1x8x1xf32> to vector<8x1xf32>
    %105 = arith.mulf %99, %104 : vector<8x1xf32>
    %cst_59 = arith.constant dense<0.000000e+00> : vector<8xf32>
    %106 = vector.multi_reduction <add>, %102, %cst_59 [1] : vector<8x8xf32> to vector<8xf32>
    %107 = vector.shape_cast %106 : vector<8xf32> to vector<8x1xf32>
    %108 = arith.addf %105, %107 : vector<8x1xf32>
    %c2_60 = arith.constant 2 : index
    %c0_61 = arith.constant 0 : index
    %c0_62 = arith.constant 0 : index
    %109 = vector.load %arg14[%c2_60, %c0_61, %c0_62] : memref<4x8x1xf32, #tpu.memory_space<vmem>>, vector<1x8x1xf32>
    %110 = vector.shape_cast %109 : vector<1x8x1xf32> to vector<8x1xf32>
    %111 = vector.shape_cast %108 : vector<8x1xf32> to vector<1x8x1xf32>
    tpu.vector_store %arg14[%c2_60, %c0_61, %c0_62], %111 {strides = array<i32>} : memref<4x8x1xf32, #tpu.memory_space<vmem>>, vector<1x8x1xf32>,
    %c0_63 = arith.constant 0 : index
    %c64 = arith.constant 64 : index
    %112 = vector.load %arg15[%c0_63, %c64] : memref<8x128xf32, #tpu.memory_space<vmem>>, vector<8x32xf32>
    %113 = vector.broadcast %99 : vector<8x1xf32> to vector<8x32xf32>
    %114 = arith.mulf %113, %112 : vector<8x32xf32>
    %115 = arith.truncf %102 : vector<8x8xf32> to vector<8x8xbf16>
    %cst_64 = arith.constant dense<0.000000e+00> : vector<8x32xf32>
    %116 = tpu.matmul %115, %87, %cst_64 {dimension_numbers = #tpu.dot_dimension_numbers<[1], [0], [0], [1], [0, 0, 1, 1], [], []>} : vector<8x8xbf16>, vector<8x32xbf16>, vector<8x32xf32> -> vector<8x32xf32>
    %117 = arith.addf %114, %116 : vector<8x32xf32>
    %c0_65 = arith.constant 0 : index
    %c64_66 = arith.constant 64 : index
    %118 = vector.load %arg15[%c0_65, %c64_66] : memref<8x128xf32, #tpu.memory_space<vmem>>, vector<8x32xf32>
    tpu.vector_store %arg15[%c0_65, %c64_66], %117 {strides = array<i32>} : memref<8x128xf32, #tpu.memory_space<vmem>>, vector<8x32xf32>,
    %c2_67 = arith.constant 2 : index
    %c0_68 = arith.constant 0 : index
    %c0_69 = arith.constant 0 : index
    %119 = vector.load %arg13[%c2_67, %c0_68, %c0_69] : memref<4x8x1xf32, #tpu.memory_space<vmem>>, vector<1x8x1xf32>
    %120 = vector.shape_cast %119 : vector<1x8x1xf32> to vector<8x1xf32>
    %121 = vector.shape_cast %97 : vector<8x1xf32> to vector<1x8x1xf32>
    tpu.vector_store %arg13[%c2_67, %c0_68, %c0_69], %121 {strides = array<i32>} : memref<4x8x1xf32, #tpu.memory_space<vmem>>, vector<1x8x1xf32>,
    %122 = vector.extract_strided_slice %4 {offsets = [0, 96], sizes = [8, 32], strides = [1, 1]} : vector<8x128xbf16> to vector<8x32xbf16>
    %123 = vector.extract_strided_slice %6 {offsets = [0, 96], sizes = [8, 32], strides = [1, 1]} : vector<8x128xbf16> to vector<8x32xbf16>
    %124 = vector.extract_strided_slice %8 {offsets = [0, 96], sizes = [8, 32], strides = [1, 1]} : vector<8x128xbf16> to vector<8x32xbf16>
    %cst_70 = arith.constant dense<0.000000e+00> : vector<8x8xf32>
    %125 = tpu.matmul %122, %123, %cst_70 {dimension_numbers = #tpu.dot_dimension_numbers<[1], [1], [0], [0], [0, 0, 1, 0], [], []>} : vector<8x32xbf16>, vector<8x32xbf16>, vector<8x8xf32> -> vector<8x8xf32>
    %cst_71 = arith.constant 0.176776692 : f32
    %126 = vector.broadcast %cst_71 : f32 to vector<8x8xf32>
    %127 = arith.mulf %125, %126 : vector<8x8xf32>
    %128 = vector.broadcast %10 : vector<1x8xf32> to vector<8x8xf32>
    %129 = arith.addf %127, %128 : vector<8x8xf32>
    %c3 = arith.constant 3 : index
    %c0_72 = arith.constant 0 : index
    %c0_73 = arith.constant 0 : index
    %130 = vector.load %arg13[%c3, %c0_72, %c0_73] : memref<4x8x1xf32, #tpu.memory_space<vmem>>, vector<1x8x1xf32>
    %131 = vector.shape_cast %130 : vector<1x8x1xf32> to vector<8x1xf32>
    %cst_74 = arith.constant dense<0xFF800000> : vector<8xf32>
    %132 = vector.multi_reduction <maximumf>, %129, %cst_74 [1] : vector<8x8xf32> to vector<8xf32>
    %133 = vector.shape_cast %132 : vector<8xf32> to vector<8x1xf32>
    %134 = arith.maximumf %131, %133 : vector<8x1xf32>
    %135 = arith.subf %131, %134 : vector<8x1xf32>
    %136 = math.exp %135 : vector<8x1xf32>
    %137 = vector.broadcast %134 : vector<8x1xf32> to vector<8x8xf32>
    %138 = arith.subf %129, %137 : vector<8x8xf32>
    %139 = math.exp %138 : vector<8x8xf32>
    %c3_75 = arith.constant 3 : index
    %c0_76 = arith.constant 0 : index
    %c0_77 = arith.constant 0 : index
    %140 = vector.load %arg14[%c3_75, %c0_76, %c0_77] : memref<4x8x1xf32, #tpu.memory_space<vmem>>, vector<1x8x1xf32>
    %141 = vector.shape_cast %140 : vector<1x8x1xf32> to vector<8x1xf32>
    %142 = arith.mulf %136, %141 : vector<8x1xf32>
    %cst_78 = arith.constant dense<0.000000e+00> : vector<8xf32>
    %143 = vector.multi_reduction <add>, %139, %cst_78 [1] : vector<8x8xf32> to vector<8xf32>
    %144 = vector.shape_cast %143 : vector<8xf32> to vector<8x1xf32>
    %145 = arith.addf %142, %144 : vector<8x1xf32>
    %c3_79 = arith.constant 3 : index
    %c0_80 = arith.constant 0 : index
    %c0_81 = arith.constant 0 : index
    %146 = vector.load %arg14[%c3_79, %c0_80, %c0_81] : memref<4x8x1xf32, #tpu.memory_space<vmem>>, vector<1x8x1xf32>
    %147 = vector.shape_cast %146 : vector<1x8x1xf32> to vector<8x1xf32>
    %148 = vector.shape_cast %145 : vector<8x1xf32> to vector<1x8x1xf32>
    tpu.vector_store %arg14[%c3_79, %c0_80, %c0_81], %148 {strides = array<i32>} : memref<4x8x1xf32, #tpu.memory_space<vmem>>, vector<1x8x1xf32>,
    %c0_82 = arith.constant 0 : index
    %c96 = arith.constant 96 : index
    %149 = vector.load %arg15[%c0_82, %c96] : memref<8x128xf32, #tpu.memory_space<vmem>>, vector<8x32xf32>
    %150 = vector.broadcast %136 : vector<8x1xf32> to vector<8x32xf32>
    %151 = arith.mulf %150, %149 : vector<8x32xf32>
    %152 = arith.truncf %139 : vector<8x8xf32> to vector<8x8xbf16>
    %cst_83 = arith.constant dense<0.000000e+00> : vector<8x32xf32>
    %153 = tpu.matmul %152, %124, %cst_83 {dimension_numbers = #tpu.dot_dimension_numbers<[1], [0], [0], [1], [0, 0, 1, 1], [], []>} : vector<8x8xbf16>, vector<8x32xbf16>, vector<8x32xf32> -> vector<8x32xf32>
    %154 = arith.addf %151, %153 : vector<8x32xf32>
    %c0_84 = arith.constant 0 : index
    %c96_85 = arith.constant 96 : index
    %155 = vector.load %arg15[%c0_84, %c96_85] : memref<8x128xf32, #tpu.memory_space<vmem>>, vector<8x32xf32>
    tpu.vector_store %arg15[%c0_84, %c96_85], %154 {strides = array<i32>} : memref<8x128xf32, #tpu.memory_space<vmem>>, vector<8x32xf32>,
    %c3_86 = arith.constant 3 : index
    %c0_87 = arith.constant 0 : index
    %c0_88 = arith.constant 0 : index
    %156 = vector.load %arg13[%c3_86, %c0_87, %c0_88] : memref<4x8x1xf32, #tpu.memory_space<vmem>>, vector<1x8x1xf32>
    %157 = vector.shape_cast %156 : vector<1x8x1xf32> to vector<8x1xf32>
    %158 = vector.shape_cast %134 : vector<8x1xf32> to vector<1x8x1xf32>
    tpu.vector_store %arg13[%c3_86, %c0_87, %c0_88], %158 {strides = array<i32>} : memref<4x8x1xf32, #tpu.memory_space<vmem>>, vector<1x8x1xf32>,
    %c0_i32_89 = arith.constant 0 : i32
    %159 = arith.cmpi eq, %arg2, %c0_i32_89 : i32
    %160 = arith.extui %159 : i1 to i32
    %c0_i32_90 = arith.constant 0 : i32
    %161 = arith.cmpi ne, %160, %c0_i32_90 : i32
    scf.if %161 {
      %c0_91 = arith.constant 0 : index
      %c0_92 = arith.constant 0 : index
      %c0_93 = arith.constant 0 : index
      %162 = vector.load %arg14[%c0_91, %c0_92, %c0_93] : memref<4x8x1xf32, #tpu.memory_space<vmem>>, vector<1x8x1xf32>
      %163 = vector.shape_cast %162 : vector<1x8x1xf32> to vector<8x1xf32>
      %164 = tpu.reciprocal %163 {approx = true} : vector<8x1xf32> -> vector<8x1xf32>
      %c0_94 = arith.constant 0 : index
      %c0_95 = arith.constant 0 : index
      %165 = vector.load %arg15[%c0_94, %c0_95] : memref<8x128xf32, #tpu.memory_space<vmem>>, vector<8x32xf32>
      %166 = vector.broadcast %164 : vector<8x1xf32> to vector<8x32xf32>
      %167 = arith.mulf %165, %166 : vector<8x32xf32>
      %c0_96 = arith.constant 0 : index
      %c0_97 = arith.constant 0 : index
      %168 = vector.load %arg15[%c0_96, %c0_97] : memref<8x128xf32, #tpu.memory_space<vmem>>, vector<8x32xf32>
      tpu.vector_store %arg15[%c0_96, %c0_97], %167 {strides = array<i32>} : memref<8x128xf32, #tpu.memory_space<vmem>>, vector<8x32xf32>,
      %c1_98 = arith.constant 1 : index
      %c0_99 = arith.constant 0 : index
      %c0_100 = arith.constant 0 : index
      %169 = vector.load %arg14[%c1_98, %c0_99, %c0_100] : memref<4x8x1xf32, #tpu.memory_space<vmem>>, vector<1x8x1xf32>
      %170 = vector.shape_cast %169 : vector<1x8x1xf32> to vector<8x1xf32>
      %171 = tpu.reciprocal %170 {approx = true} : vector<8x1xf32> -> vector<8x1xf32>
      %c0_101 = arith.constant 0 : index
      %c32_102 = arith.constant 32 : index
      %172 = vector.load %arg15[%c0_101, %c32_102] : memref<8x128xf32, #tpu.memory_space<vmem>>, vector<8x32xf32>
      %173 = vector.broadcast %171 : vector<8x1xf32> to vector<8x32xf32>
      %174 = arith.mulf %172, %173 : vector<8x32xf32>
      %c0_103 = arith.constant 0 : index
      %c32_104 = arith.constant 32 : index
      %175 = vector.load %arg15[%c0_103, %c32_104] : memref<8x128xf32, #tpu.memory_space<vmem>>, vector<8x32xf32>
      tpu.vector_store %arg15[%c0_103, %c32_104], %174 {strides = array<i32>} : memref<8x128xf32, #tpu.memory_space<vmem>>, vector<8x32xf32>,
      %c2_105 = arith.constant 2 : index
      %c0_106 = arith.constant 0 : index
      %c0_107 = arith.constant 0 : index
      %176 = vector.load %arg14[%c2_105, %c0_106, %c0_107] : memref<4x8x1xf32, #tpu.memory_space<vmem>>, vector<1x8x1xf32>
      %177 = vector.shape_cast %176 : vector<1x8x1xf32> to vector<8x1xf32>
      %178 = tpu.reciprocal %177 {approx = true} : vector<8x1xf32> -> vector<8x1xf32>
      %c0_108 = arith.constant 0 : index
      %c64_109 = arith.constant 64 : index
      %179 = vector.load %arg15[%c0_108, %c64_109] : memref<8x128xf32, #tpu.memory_space<vmem>>, vector<8x32xf32>
      %180 = vector.broadcast %178 : vector<8x1xf32> to vector<8x32xf32>
      %181 = arith.mulf %179, %180 : vector<8x32xf32>
      %c0_110 = arith.constant 0 : index
      %c64_111 = arith.constant 64 : index
      %182 = vector.load %arg15[%c0_110, %c64_111] : memref<8x128xf32, #tpu.memory_space<vmem>>, vector<8x32xf32>
      tpu.vector_store %arg15[%c0_110, %c64_111], %181 {strides = array<i32>} : memref<8x128xf32, #tpu.memory_space<vmem>>, vector<8x32xf32>,
      %c3_112 = arith.constant 3 : index
      %c0_113 = arith.constant 0 : index
      %c0_114 = arith.constant 0 : index
      %183 = vector.load %arg14[%c3_112, %c0_113, %c0_114] : memref<4x8x1xf32, #tpu.memory_space<vmem>>, vector<1x8x1xf32>
      %184 = vector.shape_cast %183 : vector<1x8x1xf32> to vector<8x1xf32>
      %185 = tpu.reciprocal %184 {approx = true} : vector<8x1xf32> -> vector<8x1xf32>
      %c0_115 = arith.constant 0 : index
      %c96_116 = arith.constant 96 : index
      %186 = vector.load %arg15[%c0_115, %c96_116] : memref<8x128xf32, #tpu.memory_space<vmem>>, vector<8x32xf32>
      %187 = vector.broadcast %185 : vector<8x1xf32> to vector<8x32xf32>
      %188 = arith.mulf %186, %187 : vector<8x32xf32>
      %c0_117 = arith.constant 0 : index
      %c96_118 = arith.constant 96 : index
      %189 = vector.load %arg15[%c0_117, %c96_118] : memref<8x128xf32, #tpu.memory_space<vmem>>, vector<8x32xf32>
      tpu.vector_store %arg15[%c0_117, %c96_118], %188 {strides = array<i32>} : memref<8x128xf32, #tpu.memory_space<vmem>>, vector<8x32xf32>,
      %c0_119 = arith.constant 0 : index
      %c0_120 = arith.constant 0 : index
      %190 = vector.load %arg15[%c0_119, %c0_120] : memref<8x128xf32, #tpu.memory_space<vmem>>, vector<8x128xf32>
      %191 = arith.truncf %190 : vector<8x128xf32> to vector<8x128xbf16>
      %c0_121 = arith.constant 0 : index
      %c0_122 = arith.constant 0 : index
      %192 = vector.load %arg8[%c0_121, %c0_122] : memref<128x128xbf16, #tpu.memory_space<vmem>>, vector<128x128xbf16>
      %cst_123 = arith.constant dense<0.000000e+00> : vector<8x128xf32>
      %193 = tpu.matmul %191, %192, %cst_123 {dimension_numbers = #tpu.dot_dimension_numbers<[1], [0], [0], [1], [0, 0, 1, 1], [], []>} : vector<8x128xbf16>, vector<128x128xbf16>, vector<8x128xf32> -> vector<8x128xf32>
      %c0_124 = arith.constant 0 : index
      %c0_125 = arith.constant 0 : index
      %c0_126 = arith.constant 0 : index
      %194 = vector.load %arg3[%c0_124, %c0_125, %c0_126] : memref<1x8x128xbf16, #tpu.memory_space<vmem>>, vector<1x8x128xbf16>
      %195 = vector.shape_cast %194 : vector<1x8x128xbf16> to vector<8x128xbf16>
      %196 = arith.extf %195 : vector<8x128xbf16> to vector<8x128xf32>
      %197 = arith.addf %196, %193 : vector<8x128xf32>
      %c0_127 = arith.constant 0 : index
      %c0_128 = arith.constant 0 : index
      %198 = vector.load %arg9[%c0_127, %c0_128] : memref<1x128xf32, #tpu.memory_space<vmem>>, vector<1x128xf32>
      %199 = vector.broadcast %198 : vector<1x128xf32> to vector<8x128xf32>
      %200 = arith.addf %197, %199 : vector<8x128xf32>
      %cst_129 = arith.constant dense<0.000000e+00> : vector<8xf32>
      %201 = vector.multi_reduction <add>, %200, %cst_129 [1] : vector<8x128xf32> to vector<8xf32>
      %202 = vector.shape_cast %201 : vector<8xf32> to vector<8x1xf32>
      %cst_130 = arith.constant 1.280000e+02 : f32
      %203 = vector.broadcast %cst_130 : f32 to vector<8x1xf32>
      %204 = arith.divf %202, %203 : vector<8x1xf32>
      %205 = vector.broadcast %204 : vector<8x1xf32> to vector<8x128xf32>
      %206 = arith.subf %200, %205 : vector<8x128xf32>
      %207 = arith.mulf %206, %206 : vector<8x128xf32>
      %cst_131 = arith.constant dense<0.000000e+00> : vector<8xf32>
      %208 = vector.multi_reduction <add>, %207, %cst_131 [1] : vector<8x128xf32> to vector<8xf32>
      %209 = vector.shape_cast %208 : vector<8xf32> to vector<8x1xf32>
      %cst_132 = arith.constant 1.280000e+02 : f32
      %210 = vector.broadcast %cst_132 : f32 to vector<8x1xf32>
      %211 = arith.divf %209, %210 : vector<8x1xf32>
      %212 = vector.broadcast %204 : vector<8x1xf32> to vector<8x128xf32>
      %213 = arith.subf %200, %212 : vector<8x128xf32>
      %cst_133 = arith.constant 9.99999974E-6 : f32
      %214 = vector.broadcast %cst_133 : f32 to vector<8x1xf32>
      %215 = arith.addf %211, %214 : vector<8x1xf32>
      %216 = math.rsqrt %215 : vector<8x1xf32>
      %217 = vector.broadcast %216 : vector<8x1xf32> to vector<8x128xf32>
      %218 = arith.mulf %213, %217 : vector<8x128xf32>
      %c0_134 = arith.constant 0 : index
      %c0_135 = arith.constant 0 : index
      %219 = vector.load %arg10[%c0_134, %c0_135] : memref<1x128xf32, #tpu.memory_space<vmem>>, vector<1x128xf32>
      %220 = vector.broadcast %219 : vector<1x128xf32> to vector<8x128xf32>
      %221 = arith.mulf %218, %220 : vector<8x128xf32>
      %c0_136 = arith.constant 0 : index
      %c0_137 = arith.constant 0 : index
      %222 = vector.load %arg11[%c0_136, %c0_137] : memref<1x128xf32, #tpu.memory_space<vmem>>, vector<1x128xf32>
      %223 = vector.broadcast %222 : vector<1x128xf32> to vector<8x128xf32>
      %224 = arith.addf %221, %223 : vector<8x128xf32>
      %225 = arith.truncf %224 : vector<8x128xf32> to vector<8x128xbf16>
      %c0_138 = arith.constant 0 : index
      %c0_139 = arith.constant 0 : index
      %c0_140 = arith.constant 0 : index
      %226 = vector.load %arg12[%c0_138, %c0_139, %c0_140] : memref<1x8x128xbf16, #tpu.memory_space<vmem>>, vector<1x8x128xbf16>
      %227 = vector.shape_cast %226 : vector<1x8x128xbf16> to vector<8x128xbf16>
      %228 = vector.shape_cast %225 : vector<8x128xbf16> to vector<1x8x128xbf16>
      tpu.vector_store %arg12[%c0_138, %c0_139, %c0_140], %228 {strides = array<i32>} : memref<1x8x128xbf16, #tpu.memory_space<vmem>>, vector<1x8x128xbf16>,
    } else {
    }
    return
  }
  func.func @transform_0(%arg0: i32, %arg1: i32, %arg2: i32) -> (i32, i32, i32) {
    %c0_i32 = arith.constant 0 : i32
    %c0_i32_0 = arith.constant 0 : i32
    return %arg0, %arg1, %c0_i32 : i32, i32, i32
  }
  func.func @transform_1(%arg0: i32, %arg1: i32, %arg2: i32) -> (i32, i32, i32) {
    %c0_i32 = arith.constant 0 : i32
    %c0_i32_0 = arith.constant 0 : i32
    return %arg0, %arg1, %c0_i32 : i32, i32, i32
  }
  func.func @transform_2(%arg0: i32, %arg1: i32, %arg2: i32) -> (i32, i32, i32) {
    %c1_i32 = arith.constant 1 : i32
    %c0_i32 = arith.constant 0 : i32
    return %arg0, %arg2, %c1_i32 : i32, i32, i32
  }
  func.func @transform_3(%arg0: i32, %arg1: i32, %arg2: i32) -> (i32, i32, i32) {
    %c2_i32 = arith.constant 2 : i32
    %c0_i32 = arith.constant 0 : i32
    return %arg0, %arg2, %c2_i32 : i32, i32, i32
  }
  func.func @transform_4(%arg0: i32, %arg1: i32, %arg2: i32) -> (i32, i32, i32) {
    %c0_i32 = arith.constant 0 : i32
    %c0_i32_0 = arith.constant 0 : i32
    return %arg0, %c0_i32, %arg2 : i32, i32, i32
  }
  func.func @transform_5(%arg0: i32, %arg1: i32, %arg2: i32) -> (i32, i32) {
    %c0_i32 = arith.constant 0 : i32
    %c0_i32_0 = arith.constant 0 : i32
    %c0_i32_1 = arith.constant 0 : i32
    return %c0_i32, %c0_i32_0 : i32, i32
  }
  func.func @transform_6(%arg0: i32, %arg1: i32, %arg2: i32) -> (i32, i32) {
    %c0_i32 = arith.constant 0 : i32
    %c0_i32_0 = arith.constant 0 : i32
    %c0_i32_1 = arith.constant 0 : i32
    return %c0_i32, %c0_i32_0 : i32, i32
  }
  func.func @transform_7(%arg0: i32, %arg1: i32, %arg2: i32) -> (i32, i32) {
    %c0_i32 = arith.constant 0 : i32
    %c0_i32_0 = arith.constant 0 : i32
    %c0_i32_1 = arith.constant 0 : i32
    return %c0_i32, %c0_i32_0 : i32, i32
  }
  func.func @transform_8(%arg0: i32, %arg1: i32, %arg2: i32) -> (i32, i32) {
    %c0_i32 = arith.constant 0 : i32
    %c0_i32_0 = arith.constant 0 : i32
    %c0_i32_1 = arith.constant 0 : i32
    return %c0_i32, %c0_i32_0 : i32, i32
  }
  func.func @transform_9(%arg0: i32, %arg1: i32, %arg2: i32) -> (i32, i32, i32) {
    %c0_i32 = arith.constant 0 : i32
    %c0_i32_0 = arith.constant 0 : i32
    return %arg0, %arg1, %c0_i32 : i32, i32, i32
  }
}

module attributes {stable_mosaic.version = 11 : i64} {
  func.func @_linear_kernel(%arg0: i32, %arg1: i32, %arg2: i32, %arg3: memref<16x128xbf16, #tpu.memory_space<vmem>>, %arg4: memref<128x128xbf16, #tpu.memory_space<vmem>>, %arg5: memref<1x128xf32, #tpu.memory_space<vmem>>, %arg6: memref<16x128xbf16, #tpu.memory_space<vmem>>, %arg7: memref<16x128xf32, #tpu.memory_space<vmem>>) attributes {dimension_semantics = [#tpu.dimension_semantics<parallel>, #tpu.dimension_semantics<parallel>, #tpu.dimension_semantics<arbitrary>], iteration_bounds = array<i64: 1, 3, 1>, scalar_prefetch = 0 : i64, scratch_operands = 1 : i64, tpu.core_type = #tpu.core_type<tc>, window_params = [{transform_indices = @transform_0, window_bounds = array<i64: 16, 128>}, {transform_indices = @transform_1, window_bounds = array<i64: 128, 128>}, {transform_indices = @transform_2, window_bounds = array<i64: 1, 128>}, {transform_indices = @transform_3, window_bounds = array<i64: 16, 128>}]} {
    %c0_i32 = arith.constant 0 : i32
    %0 = arith.cmpi eq, %arg2, %c0_i32 : i32
    %1 = arith.extui %0 : i1 to i32
    %c0_i32_0 = arith.constant 0 : i32
    %2 = arith.cmpi ne, %1, %c0_i32_0 : i32
    scf.if %2 {
      %cst_10 = arith.constant 0.000000e+00 : f32
      %12 = vector.broadcast %cst_10 : f32 to vector<16x128xf32>
      %c0_11 = arith.constant 0 : index
      %c0_12 = arith.constant 0 : index
      %13 = vector.load %arg7[%c0_11, %c0_12] : memref<16x128xf32, #tpu.memory_space<vmem>>, vector<16x128xf32>
      tpu.vector_store %arg7[%c0_11, %c0_12], %12 {strides = array<i32>} : memref<16x128xf32, #tpu.memory_space<vmem>>, vector<16x128xf32>,
    } else {
    }
    %c0 = arith.constant 0 : index
    %c0_1 = arith.constant 0 : index
    %3 = vector.load %arg7[%c0, %c0_1] : memref<16x128xf32, #tpu.memory_space<vmem>>, vector<16x128xf32>
    %c0_2 = arith.constant 0 : index
    %c0_3 = arith.constant 0 : index
    %4 = vector.load %arg3[%c0_2, %c0_3] : memref<16x128xbf16, #tpu.memory_space<vmem>>, vector<16x128xbf16>
    %c0_4 = arith.constant 0 : index
    %c0_5 = arith.constant 0 : index
    %5 = vector.load %arg4[%c0_4, %c0_5] : memref<128x128xbf16, #tpu.memory_space<vmem>>, vector<128x128xbf16>
    %cst = arith.constant dense<0.000000e+00> : vector<16x128xf32>
    %6 = tpu.matmul %4, %5, %cst {dimension_numbers = #tpu.dot_dimension_numbers<[1], [0], [0], [1], [0, 0, 1, 1], [], []>} : vector<16x128xbf16>, vector<128x128xbf16>, vector<16x128xf32> -> vector<16x128xf32>
    %7 = arith.addf %3, %6 : vector<16x128xf32>
    %c0_6 = arith.constant 0 : index
    %c0_7 = arith.constant 0 : index
    %8 = vector.load %arg7[%c0_6, %c0_7] : memref<16x128xf32, #tpu.memory_space<vmem>>, vector<16x128xf32>
    tpu.vector_store %arg7[%c0_6, %c0_7], %7 {strides = array<i32>} : memref<16x128xf32, #tpu.memory_space<vmem>>, vector<16x128xf32>,
    %c0_i32_8 = arith.constant 0 : i32
    %9 = arith.cmpi eq, %arg2, %c0_i32_8 : i32
    %10 = arith.extui %9 : i1 to i32
    %c0_i32_9 = arith.constant 0 : i32
    %11 = arith.cmpi ne, %10, %c0_i32_9 : i32
    scf.if %11 {
      %c0_10 = arith.constant 0 : index
      %c0_11 = arith.constant 0 : index
      %12 = vector.load %arg7[%c0_10, %c0_11] : memref<16x128xf32, #tpu.memory_space<vmem>>, vector<16x128xf32>
      %c0_12 = arith.constant 0 : index
      %c0_13 = arith.constant 0 : index
      %13 = vector.load %arg5[%c0_12, %c0_13] : memref<1x128xf32, #tpu.memory_space<vmem>>, vector<1x128xf32>
      %14 = vector.broadcast %13 : vector<1x128xf32> to vector<16x128xf32>
      %15 = arith.addf %12, %14 : vector<16x128xf32>
      %16 = arith.truncf %15 : vector<16x128xf32> to vector<16x128xbf16>
      %c0_14 = arith.constant 0 : index
      %c0_15 = arith.constant 0 : index
      %17 = vector.load %arg6[%c0_14, %c0_15] : memref<16x128xbf16, #tpu.memory_space<vmem>>, vector<16x128xbf16>
      tpu.vector_store %arg6[%c0_14, %c0_15], %16 {strides = array<i32>} : memref<16x128xbf16, #tpu.memory_space<vmem>>, vector<16x128xbf16>,
    } else {
    }
    return
  }
  func.func @transform_0(%arg0: i32, %arg1: i32, %arg2: i32) -> (i32, i32) {
    %c0_i32 = arith.constant 0 : i32
    return %arg0, %arg2 : i32, i32
  }
  func.func @transform_1(%arg0: i32, %arg1: i32, %arg2: i32) -> (i32, i32) {
    %c0_i32 = arith.constant 0 : i32
    return %arg2, %arg1 : i32, i32
  }
  func.func @transform_2(%arg0: i32, %arg1: i32, %arg2: i32) -> (i32, i32) {
    %c0_i32 = arith.constant 0 : i32
    %c0_i32_0 = arith.constant 0 : i32
    return %c0_i32, %arg1 : i32, i32
  }
  func.func @transform_3(%arg0: i32, %arg1: i32, %arg2: i32) -> (i32, i32) {
    %c0_i32 = arith.constant 0 : i32
    return %arg0, %arg1 : i32, i32
  }
}

module attributes {stable_mosaic.version = 11 : i64} {
  func.func @_linear_kernel(%arg0: i32, %arg1: i32, %arg2: i32, %arg3: memref<16x128xbf16, #tpu.memory_space<vmem>>, %arg4: memref<128x128xbf16, #tpu.memory_space<vmem>>, %arg5: memref<1x128xf32, #tpu.memory_space<vmem>>, %arg6: memref<16x128xbf16, #tpu.memory_space<vmem>>, %arg7: memref<16x128xf32, #tpu.memory_space<vmem>>) attributes {dimension_semantics = [#tpu.dimension_semantics<parallel>, #tpu.dimension_semantics<parallel>, #tpu.dimension_semantics<arbitrary>], iteration_bounds = array<i64: 1, 1, 1>, scalar_prefetch = 0 : i64, scratch_operands = 1 : i64, tpu.core_type = #tpu.core_type<tc>, window_params = [{transform_indices = @transform_0, window_bounds = array<i64: 16, 128>}, {transform_indices = @transform_1, window_bounds = array<i64: 128, 128>}, {transform_indices = @transform_2, window_bounds = array<i64: 1, 128>}, {transform_indices = @transform_3, window_bounds = array<i64: 16, 128>}]} {
    %c0_i32 = arith.constant 0 : i32
    %0 = arith.cmpi eq, %arg2, %c0_i32 : i32
    %1 = arith.extui %0 : i1 to i32
    %c0_i32_0 = arith.constant 0 : i32
    %2 = arith.cmpi ne, %1, %c0_i32_0 : i32
    scf.if %2 {
      %cst_10 = arith.constant 0.000000e+00 : f32
      %12 = vector.broadcast %cst_10 : f32 to vector<16x128xf32>
      %c0_11 = arith.constant 0 : index
      %c0_12 = arith.constant 0 : index
      %13 = vector.load %arg7[%c0_11, %c0_12] : memref<16x128xf32, #tpu.memory_space<vmem>>, vector<16x128xf32>
      tpu.vector_store %arg7[%c0_11, %c0_12], %12 {strides = array<i32>} : memref<16x128xf32, #tpu.memory_space<vmem>>, vector<16x128xf32>,
    } else {
    }
    %c0 = arith.constant 0 : index
    %c0_1 = arith.constant 0 : index
    %3 = vector.load %arg7[%c0, %c0_1] : memref<16x128xf32, #tpu.memory_space<vmem>>, vector<16x128xf32>
    %c0_2 = arith.constant 0 : index
    %c0_3 = arith.constant 0 : index
    %4 = vector.load %arg3[%c0_2, %c0_3] : memref<16x128xbf16, #tpu.memory_space<vmem>>, vector<16x128xbf16>
    %c0_4 = arith.constant 0 : index
    %c0_5 = arith.constant 0 : index
    %5 = vector.load %arg4[%c0_4, %c0_5] : memref<128x128xbf16, #tpu.memory_space<vmem>>, vector<128x128xbf16>
    %cst = arith.constant dense<0.000000e+00> : vector<16x128xf32>
    %6 = tpu.matmul %4, %5, %cst {dimension_numbers = #tpu.dot_dimension_numbers<[1], [0], [0], [1], [0, 0, 1, 1], [], []>} : vector<16x128xbf16>, vector<128x128xbf16>, vector<16x128xf32> -> vector<16x128xf32>
    %7 = arith.addf %3, %6 : vector<16x128xf32>
    %c0_6 = arith.constant 0 : index
    %c0_7 = arith.constant 0 : index
    %8 = vector.load %arg7[%c0_6, %c0_7] : memref<16x128xf32, #tpu.memory_space<vmem>>, vector<16x128xf32>
    tpu.vector_store %arg7[%c0_6, %c0_7], %7 {strides = array<i32>} : memref<16x128xf32, #tpu.memory_space<vmem>>, vector<16x128xf32>,
    %c0_i32_8 = arith.constant 0 : i32
    %9 = arith.cmpi eq, %arg2, %c0_i32_8 : i32
    %10 = arith.extui %9 : i1 to i32
    %c0_i32_9 = arith.constant 0 : i32
    %11 = arith.cmpi ne, %10, %c0_i32_9 : i32
    scf.if %11 {
      %c0_10 = arith.constant 0 : index
      %c0_11 = arith.constant 0 : index
      %12 = vector.load %arg7[%c0_10, %c0_11] : memref<16x128xf32, #tpu.memory_space<vmem>>, vector<16x128xf32>
      %c0_12 = arith.constant 0 : index
      %c0_13 = arith.constant 0 : index
      %13 = vector.load %arg5[%c0_12, %c0_13] : memref<1x128xf32, #tpu.memory_space<vmem>>, vector<1x128xf32>
      %14 = vector.broadcast %13 : vector<1x128xf32> to vector<16x128xf32>
      %15 = arith.addf %12, %14 : vector<16x128xf32>
      %16 = arith.truncf %15 : vector<16x128xf32> to vector<16x128xbf16>
      %c0_14 = arith.constant 0 : index
      %c0_15 = arith.constant 0 : index
      %17 = vector.load %arg6[%c0_14, %c0_15] : memref<16x128xbf16, #tpu.memory_space<vmem>>, vector<16x128xbf16>
      tpu.vector_store %arg6[%c0_14, %c0_15], %16 {strides = array<i32>} : memref<16x128xbf16, #tpu.memory_space<vmem>>, vector<16x128xbf16>,
    } else {
    }
    return
  }
  func.func @transform_0(%arg0: i32, %arg1: i32, %arg2: i32) -> (i32, i32) {
    %c0_i32 = arith.constant 0 : i32
    return %arg0, %arg2 : i32, i32
  }
  func.func @transform_1(%arg0: i32, %arg1: i32, %arg2: i32) -> (i32, i32) {
    %c0_i32 = arith.constant 0 : i32
    return %arg2, %arg1 : i32, i32
  }
  func.func @transform_2(%arg0: i32, %arg1: i32, %arg2: i32) -> (i32, i32) {
    %c0_i32 = arith.constant 0 : i32
    %c0_i32_0 = arith.constant 0 : i32
    return %c0_i32, %arg1 : i32, i32
  }
  func.func @transform_3(%arg0: i32, %arg1: i32, %arg2: i32) -> (i32, i32) {
    %c0_i32 = arith.constant 0 : i32
    return %arg0, %arg1 : i32, i32
  }
}

module attributes {stable_mosaic.version = 11 : i64} {
  func.func @_mha_flash_kernel(%arg0: i32, %arg1: i32, %arg2: i32, %arg3: memref<1x8x128xbf16, #tpu.memory_space<vmem>>, %arg4: memref<1x8x128xbf16, #tpu.memory_space<vmem>>, %arg5: memref<1x8x128xbf16, #tpu.memory_space<vmem>>, %arg6: memref<1x8x128xbf16, #tpu.memory_space<vmem>>, %arg7: memref<1x1x8xf32, #tpu.memory_space<vmem>>, %arg8: memref<128x128xbf16, #tpu.memory_space<vmem>>, %arg9: memref<1x128xf32, #tpu.memory_space<vmem>>, %arg10: memref<1x128xf32, #tpu.memory_space<vmem>>, %arg11: memref<1x128xf32, #tpu.memory_space<vmem>>, %arg12: memref<1x8x128xbf16, #tpu.memory_space<vmem>>, %arg13: memref<4x8x1xf32, #tpu.memory_space<vmem>>, %arg14: memref<4x8x1xf32, #tpu.memory_space<vmem>>, %arg15: memref<8x128xf32, #tpu.memory_space<vmem>>) attributes {dimension_semantics = [#tpu.dimension_semantics<parallel>, #tpu.dimension_semantics<parallel>, #tpu.dimension_semantics<arbitrary>], iteration_bounds = array<i64: 2, 1, 1>, scalar_prefetch = 0 : i64, scratch_operands = 3 : i64, tpu.core_type = #tpu.core_type<tc>, window_params = [{transform_indices = @transform_0, window_bounds = array<i64: 1, 8, 128>}, {transform_indices = @transform_1, window_bounds = array<i64: 1, 8, 128>}, {transform_indices = @transform_2, window_bounds = array<i64: 1, 8, 128>}, {transform_indices = @transform_3, window_bounds = array<i64: 1, 8, 128>}, {transform_indices = @transform_4, window_bounds = array<i64: 1, 1, 8>}, {pipeline_mode = #tpu.pipeline_mode<synchronous>, transform_indices = @transform_5, window_bounds = array<i64: 128, 128>}, {pipeline_mode = #tpu.pipeline_mode<synchronous>, transform_indices = @transform_6, window_bounds = array<i64: 1, 128>}, {pipeline_mode = #tpu.pipeline_mode<synchronous>, transform_indices = @transform_7, window_bounds = array<i64: 1, 128>}, {pipeline_mode = #tpu.pipeline_mode<synchronous>, transform_indices = @transform_8, window_bounds = array<i64: 1, 128>}, {transform_indices = @transform_9, window_bounds = array<i64: 1, 8, 128>}]} {
    %c0_i32 = arith.constant 0 : i32
    %0 = arith.cmpi eq, %arg2, %c0_i32 : i32
    %1 = arith.extui %0 : i1 to i32
    %c0_i32_0 = arith.constant 0 : i32
    %2 = arith.cmpi ne, %1, %c0_i32_0 : i32
    scf.if %2 {
      %cst_94 = arith.constant -1.000000e+30 : f32
      %172 = vector.broadcast %cst_94 : f32 to vector<4x8x1xf32>
      %c0_95 = arith.constant 0 : index
      %c0_96 = arith.constant 0 : index
      %c0_97 = arith.constant 0 : index
      %173 = vector.load %arg13[%c0_95, %c0_96, %c0_97] : memref<4x8x1xf32, #tpu.memory_space<vmem>>, vector<4x8x1xf32>
      tpu.vector_store %arg13[%c0_95, %c0_96, %c0_97], %172 {strides = array<i32>} : memref<4x8x1xf32, #tpu.memory_space<vmem>>, vector<4x8x1xf32>,
      %cst_98 = arith.constant 0.000000e+00 : f32
      %174 = vector.broadcast %cst_98 : f32 to vector<4x8x1xf32>
      %c0_99 = arith.constant 0 : index
      %c0_100 = arith.constant 0 : index
      %c0_101 = arith.constant 0 : index
      %175 = vector.load %arg14[%c0_99, %c0_100, %c0_101] : memref<4x8x1xf32, #tpu.memory_space<vmem>>, vector<4x8x1xf32>
      tpu.vector_store %arg14[%c0_99, %c0_100, %c0_101], %174 {strides = array<i32>} : memref<4x8x1xf32, #tpu.memory_space<vmem>>, vector<4x8x1xf32>,
      %cst_102 = arith.constant 0.000000e+00 : f32
      %176 = vector.broadcast %cst_102 : f32 to vector<8x128xf32>
      %c0_103 = arith.constant 0 : index
      %c0_104 = arith.constant 0 : index
      %177 = vector.load %arg15[%c0_103, %c0_104] : memref<8x128xf32, #tpu.memory_space<vmem>>, vector<8x128xf32>
      tpu.vector_store %arg15[%c0_103, %c0_104], %176 {strides = array<i32>} : memref<8x128xf32, #tpu.memory_space<vmem>>, vector<8x128xf32>,
    } else {
    }
    %c0 = arith.constant 0 : index
    %c0_1 = arith.constant 0 : index
    %c0_2 = arith.constant 0 : index
    %3 = vector.load %arg4[%c0, %c0_1, %c0_2] : memref<1x8x128xbf16, #tpu.memory_space<vmem>>, vector<1x8x128xbf16>
    %4 = vector.shape_cast %3 : vector<1x8x128xbf16> to vector<8x128xbf16>
    %c0_3 = arith.constant 0 : index
    %c0_4 = arith.constant 0 : index
    %c0_5 = arith.constant 0 : index
    %5 = vector.load %arg5[%c0_3, %c0_4, %c0_5] : memref<1x8x128xbf16, #tpu.memory_space<vmem>>, vector<1x8x128xbf16>
    %6 = vector.shape_cast %5 : vector<1x8x128xbf16> to vector<8x128xbf16>
    %c0_6 = arith.constant 0 : index
    %c0_7 = arith.constant 0 : index
    %c0_8 = arith.constant 0 : index
    %7 = vector.load %arg6[%c0_6, %c0_7, %c0_8] : memref<1x8x128xbf16, #tpu.memory_space<vmem>>, vector<1x8x128xbf16>
    %8 = vector.shape_cast %7 : vector<1x8x128xbf16> to vector<8x128xbf16>
    %c0_9 = arith.constant 0 : index
    %c0_10 = arith.constant 0 : index
    %c0_11 = arith.constant 0 : index
    %9 = vector.load %arg7[%c0_9, %c0_10, %c0_11] : memref<1x1x8xf32, #tpu.memory_space<vmem>>, vector<1x1x8xf32>
    %10 = vector.shape_cast %9 : vector<1x1x8xf32> to vector<1x8xf32>
    %c8_i32 = arith.constant 8 : i32
    %11 = arith.muli %arg1, %c8_i32 : i32
    %12 = tpu.iota {dimensions = array<i32: 0>} : vector<8x8xi32>
    %13 = vector.broadcast %11 : i32 to vector<8x8xi32>
    %14 = arith.addi %13, %12 : vector<8x8xi32>
    %c8_i32_12 = arith.constant 8 : i32
    %15 = arith.muli %arg2, %c8_i32_12 : i32
    %16 = tpu.iota {dimensions = array<i32: 1>} : vector<8x8xi32>
    %17 = vector.broadcast %15 : i32 to vector<8x8xi32>
    %18 = arith.addi %17, %16 : vector<8x8xi32>
    %19 = arith.cmpi sge, %14, %18 : vector<8x8xi32>
    %cst = arith.constant 0.000000e+00 : f32
    %cst_13 = arith.constant -1.000000e+09 : f32
    %20 = vector.broadcast %cst : f32 to vector<8x8xf32>
    %21 = vector.broadcast %cst_13 : f32 to vector<8x8xf32>
    %22 = arith.select %19, %20, %21 : vector<8x8xi1>, vector<8x8xf32>
    %23 = vector.broadcast %10 : vector<1x8xf32> to vector<8x8xf32>
    %24 = arith.addf %23, %22 : vector<8x8xf32>
    %25 = vector.extract_strided_slice %4 {offsets = [0, 0], sizes = [8, 32], strides = [1, 1]} : vector<8x128xbf16> to vector<8x32xbf16>
    %26 = vector.extract_strided_slice %6 {offsets = [0, 0], sizes = [8, 32], strides = [1, 1]} : vector<8x128xbf16> to vector<8x32xbf16>
    %27 = vector.extract_strided_slice %8 {offsets = [0, 0], sizes = [8, 32], strides = [1, 1]} : vector<8x128xbf16> to vector<8x32xbf16>
    %cst_14 = arith.constant dense<0.000000e+00> : vector<8x8xf32>
    %28 = tpu.matmul %25, %26, %cst_14 {dimension_numbers = #tpu.dot_dimension_numbers<[1], [1], [0], [0], [0, 0, 1, 0], [], []>} : vector<8x32xbf16>, vector<8x32xbf16>, vector<8x8xf32> -> vector<8x8xf32>
    %cst_15 = arith.constant 0.176776692 : f32
    %29 = vector.broadcast %cst_15 : f32 to vector<8x8xf32>
    %30 = arith.mulf %28, %29 : vector<8x8xf32>
    %31 = arith.addf %30, %24 : vector<8x8xf32>
    %c0_16 = arith.constant 0 : index
    %c0_17 = arith.constant 0 : index
    %c0_18 = arith.constant 0 : index
    %32 = vector.load %arg13[%c0_16, %c0_17, %c0_18] : memref<4x8x1xf32, #tpu.memory_space<vmem>>, vector<1x8x1xf32>
    %33 = vector.shape_cast %32 : vector<1x8x1xf32> to vector<8x1xf32>
    %cst_19 = arith.constant dense<0xFF800000> : vector<8xf32>
    %34 = vector.multi_reduction <maximumf>, %31, %cst_19 [1] : vector<8x8xf32> to vector<8xf32>
    %35 = vector.shape_cast %34 : vector<8xf32> to vector<8x1xf32>
    %36 = arith.maximumf %33, %35 : vector<8x1xf32>
    %37 = arith.subf %33, %36 : vector<8x1xf32>
    %38 = math.exp %37 : vector<8x1xf32>
    %39 = vector.broadcast %36 : vector<8x1xf32> to vector<8x8xf32>
    %40 = arith.subf %31, %39 : vector<8x8xf32>
    %41 = math.exp %40 : vector<8x8xf32>
    %c0_20 = arith.constant 0 : index
    %c0_21 = arith.constant 0 : index
    %c0_22 = arith.constant 0 : index
    %42 = vector.load %arg14[%c0_20, %c0_21, %c0_22] : memref<4x8x1xf32, #tpu.memory_space<vmem>>, vector<1x8x1xf32>
    %43 = vector.shape_cast %42 : vector<1x8x1xf32> to vector<8x1xf32>
    %44 = arith.mulf %38, %43 : vector<8x1xf32>
    %cst_23 = arith.constant dense<0.000000e+00> : vector<8xf32>
    %45 = vector.multi_reduction <add>, %41, %cst_23 [1] : vector<8x8xf32> to vector<8xf32>
    %46 = vector.shape_cast %45 : vector<8xf32> to vector<8x1xf32>
    %47 = arith.addf %44, %46 : vector<8x1xf32>
    %c0_24 = arith.constant 0 : index
    %c0_25 = arith.constant 0 : index
    %c0_26 = arith.constant 0 : index
    %48 = vector.load %arg14[%c0_24, %c0_25, %c0_26] : memref<4x8x1xf32, #tpu.memory_space<vmem>>, vector<1x8x1xf32>
    %49 = vector.shape_cast %48 : vector<1x8x1xf32> to vector<8x1xf32>
    %50 = vector.shape_cast %47 : vector<8x1xf32> to vector<1x8x1xf32>
    tpu.vector_store %arg14[%c0_24, %c0_25, %c0_26], %50 {strides = array<i32>} : memref<4x8x1xf32, #tpu.memory_space<vmem>>, vector<1x8x1xf32>,
    %c0_27 = arith.constant 0 : index
    %c0_28 = arith.constant 0 : index
    %51 = vector.load %arg15[%c0_27, %c0_28] : memref<8x128xf32, #tpu.memory_space<vmem>>, vector<8x32xf32>
    %52 = vector.broadcast %38 : vector<8x1xf32> to vector<8x32xf32>
    %53 = arith.mulf %52, %51 : vector<8x32xf32>
    %54 = arith.truncf %41 : vector<8x8xf32> to vector<8x8xbf16>
    %cst_29 = arith.constant dense<0.000000e+00> : vector<8x32xf32>
    %55 = tpu.matmul %54, %27, %cst_29 {dimension_numbers = #tpu.dot_dimension_numbers<[1], [0], [0], [1], [0, 0, 1, 1], [], []>} : vector<8x8xbf16>, vector<8x32xbf16>, vector<8x32xf32> -> vector<8x32xf32>
    %56 = arith.addf %53, %55 : vector<8x32xf32>
    %c0_30 = arith.constant 0 : index
    %c0_31 = arith.constant 0 : index
    %57 = vector.load %arg15[%c0_30, %c0_31] : memref<8x128xf32, #tpu.memory_space<vmem>>, vector<8x32xf32>
    tpu.vector_store %arg15[%c0_30, %c0_31], %56 {strides = array<i32>} : memref<8x128xf32, #tpu.memory_space<vmem>>, vector<8x32xf32>,
    %c0_32 = arith.constant 0 : index
    %c0_33 = arith.constant 0 : index
    %c0_34 = arith.constant 0 : index
    %58 = vector.load %arg13[%c0_32, %c0_33, %c0_34] : memref<4x8x1xf32, #tpu.memory_space<vmem>>, vector<1x8x1xf32>
    %59 = vector.shape_cast %58 : vector<1x8x1xf32> to vector<8x1xf32>
    %60 = vector.shape_cast %36 : vector<8x1xf32> to vector<1x8x1xf32>
    tpu.vector_store %arg13[%c0_32, %c0_33, %c0_34], %60 {strides = array<i32>} : memref<4x8x1xf32, #tpu.memory_space<vmem>>, vector<1x8x1xf32>,
    %61 = vector.extract_strided_slice %4 {offsets = [0, 32], sizes = [8, 32], strides = [1, 1]} : vector<8x128xbf16> to vector<8x32xbf16>
    %62 = vector.extract_strided_slice %6 {offsets = [0, 32], sizes = [8, 32], strides = [1, 1]} : vector<8x128xbf16> to vector<8x32xbf16>
    %63 = vector.extract_strided_slice %8 {offsets = [0, 32], sizes = [8, 32], strides = [1, 1]} : vector<8x128xbf16> to vector<8x32xbf16>
    %cst_35 = arith.constant dense<0.000000e+00> : vector<8x8xf32>
    %64 = tpu.matmul %61, %62, %cst_35 {dimension_numbers = #tpu.dot_dimension_numbers<[1], [1], [0], [0], [0, 0, 1, 0], [], []>} : vector<8x32xbf16>, vector<8x32xbf16>, vector<8x8xf32> -> vector<8x8xf32>
    %cst_36 = arith.constant 0.176776692 : f32
    %65 = vector.broadcast %cst_36 : f32 to vector<8x8xf32>
    %66 = arith.mulf %64, %65 : vector<8x8xf32>
    %67 = arith.addf %66, %24 : vector<8x8xf32>
    %c1 = arith.constant 1 : index
    %c0_37 = arith.constant 0 : index
    %c0_38 = arith.constant 0 : index
    %68 = vector.load %arg13[%c1, %c0_37, %c0_38] : memref<4x8x1xf32, #tpu.memory_space<vmem>>, vector<1x8x1xf32>
    %69 = vector.shape_cast %68 : vector<1x8x1xf32> to vector<8x1xf32>
    %cst_39 = arith.constant dense<0xFF800000> : vector<8xf32>
    %70 = vector.multi_reduction <maximumf>, %67, %cst_39 [1] : vector<8x8xf32> to vector<8xf32>
    %71 = vector.shape_cast %70 : vector<8xf32> to vector<8x1xf32>
    %72 = arith.maximumf %69, %71 : vector<8x1xf32>
    %73 = arith.subf %69, %72 : vector<8x1xf32>
    %74 = math.exp %73 : vector<8x1xf32>
    %75 = vector.broadcast %72 : vector<8x1xf32> to vector<8x8xf32>
    %76 = arith.subf %67, %75 : vector<8x8xf32>
    %77 = math.exp %76 : vector<8x8xf32>
    %c1_40 = arith.constant 1 : index
    %c0_41 = arith.constant 0 : index
    %c0_42 = arith.constant 0 : index
    %78 = vector.load %arg14[%c1_40, %c0_41, %c0_42] : memref<4x8x1xf32, #tpu.memory_space<vmem>>, vector<1x8x1xf32>
    %79 = vector.shape_cast %78 : vector<1x8x1xf32> to vector<8x1xf32>
    %80 = arith.mulf %74, %79 : vector<8x1xf32>
    %cst_43 = arith.constant dense<0.000000e+00> : vector<8xf32>
    %81 = vector.multi_reduction <add>, %77, %cst_43 [1] : vector<8x8xf32> to vector<8xf32>
    %82 = vector.shape_cast %81 : vector<8xf32> to vector<8x1xf32>
    %83 = arith.addf %80, %82 : vector<8x1xf32>
    %c1_44 = arith.constant 1 : index
    %c0_45 = arith.constant 0 : index
    %c0_46 = arith.constant 0 : index
    %84 = vector.load %arg14[%c1_44, %c0_45, %c0_46] : memref<4x8x1xf32, #tpu.memory_space<vmem>>, vector<1x8x1xf32>
    %85 = vector.shape_cast %84 : vector<1x8x1xf32> to vector<8x1xf32>
    %86 = vector.shape_cast %83 : vector<8x1xf32> to vector<1x8x1xf32>
    tpu.vector_store %arg14[%c1_44, %c0_45, %c0_46], %86 {strides = array<i32>} : memref<4x8x1xf32, #tpu.memory_space<vmem>>, vector<1x8x1xf32>,
    %c0_47 = arith.constant 0 : index
    %c32 = arith.constant 32 : index
    %87 = vector.load %arg15[%c0_47, %c32] : memref<8x128xf32, #tpu.memory_space<vmem>>, vector<8x32xf32>
    %88 = vector.broadcast %74 : vector<8x1xf32> to vector<8x32xf32>
    %89 = arith.mulf %88, %87 : vector<8x32xf32>
    %90 = arith.truncf %77 : vector<8x8xf32> to vector<8x8xbf16>
    %cst_48 = arith.constant dense<0.000000e+00> : vector<8x32xf32>
    %91 = tpu.matmul %90, %63, %cst_48 {dimension_numbers = #tpu.dot_dimension_numbers<[1], [0], [0], [1], [0, 0, 1, 1], [], []>} : vector<8x8xbf16>, vector<8x32xbf16>, vector<8x32xf32> -> vector<8x32xf32>
    %92 = arith.addf %89, %91 : vector<8x32xf32>
    %c0_49 = arith.constant 0 : index
    %c32_50 = arith.constant 32 : index
    %93 = vector.load %arg15[%c0_49, %c32_50] : memref<8x128xf32, #tpu.memory_space<vmem>>, vector<8x32xf32>
    tpu.vector_store %arg15[%c0_49, %c32_50], %92 {strides = array<i32>} : memref<8x128xf32, #tpu.memory_space<vmem>>, vector<8x32xf32>,
    %c1_51 = arith.constant 1 : index
    %c0_52 = arith.constant 0 : index
    %c0_53 = arith.constant 0 : index
    %94 = vector.load %arg13[%c1_51, %c0_52, %c0_53] : memref<4x8x1xf32, #tpu.memory_space<vmem>>, vector<1x8x1xf32>
    %95 = vector.shape_cast %94 : vector<1x8x1xf32> to vector<8x1xf32>
    %96 = vector.shape_cast %72 : vector<8x1xf32> to vector<1x8x1xf32>
    tpu.vector_store %arg13[%c1_51, %c0_52, %c0_53], %96 {strides = array<i32>} : memref<4x8x1xf32, #tpu.memory_space<vmem>>, vector<1x8x1xf32>,
    %97 = vector.extract_strided_slice %4 {offsets = [0, 64], sizes = [8, 32], strides = [1, 1]} : vector<8x128xbf16> to vector<8x32xbf16>
    %98 = vector.extract_strided_slice %6 {offsets = [0, 64], sizes = [8, 32], strides = [1, 1]} : vector<8x128xbf16> to vector<8x32xbf16>
    %99 = vector.extract_strided_slice %8 {offsets = [0, 64], sizes = [8, 32], strides = [1, 1]} : vector<8x128xbf16> to vector<8x32xbf16>
    %cst_54 = arith.constant dense<0.000000e+00> : vector<8x8xf32>
    %100 = tpu.matmul %97, %98, %cst_54 {dimension_numbers = #tpu.dot_dimension_numbers<[1], [1], [0], [0], [0, 0, 1, 0], [], []>} : vector<8x32xbf16>, vector<8x32xbf16>, vector<8x8xf32> -> vector<8x8xf32>
    %cst_55 = arith.constant 0.176776692 : f32
    %101 = vector.broadcast %cst_55 : f32 to vector<8x8xf32>
    %102 = arith.mulf %100, %101 : vector<8x8xf32>
    %103 = arith.addf %102, %24 : vector<8x8xf32>
    %c2 = arith.constant 2 : index
    %c0_56 = arith.constant 0 : index
    %c0_57 = arith.constant 0 : index
    %104 = vector.load %arg13[%c2, %c0_56, %c0_57] : memref<4x8x1xf32, #tpu.memory_space<vmem>>, vector<1x8x1xf32>
    %105 = vector.shape_cast %104 : vector<1x8x1xf32> to vector<8x1xf32>
    %cst_58 = arith.constant dense<0xFF800000> : vector<8xf32>
    %106 = vector.multi_reduction <maximumf>, %103, %cst_58 [1] : vector<8x8xf32> to vector<8xf32>
    %107 = vector.shape_cast %106 : vector<8xf32> to vector<8x1xf32>
    %108 = arith.maximumf %105, %107 : vector<8x1xf32>
    %109 = arith.subf %105, %108 : vector<8x1xf32>
    %110 = math.exp %109 : vector<8x1xf32>
    %111 = vector.broadcast %108 : vector<8x1xf32> to vector<8x8xf32>
    %112 = arith.subf %103, %111 : vector<8x8xf32>
    %113 = math.exp %112 : vector<8x8xf32>
    %c2_59 = arith.constant 2 : index
    %c0_60 = arith.constant 0 : index
    %c0_61 = arith.constant 0 : index
    %114 = vector.load %arg14[%c2_59, %c0_60, %c0_61] : memref<4x8x1xf32, #tpu.memory_space<vmem>>, vector<1x8x1xf32>
    %115 = vector.shape_cast %114 : vector<1x8x1xf32> to vector<8x1xf32>
    %116 = arith.mulf %110, %115 : vector<8x1xf32>
    %cst_62 = arith.constant dense<0.000000e+00> : vector<8xf32>
    %117 = vector.multi_reduction <add>, %113, %cst_62 [1] : vector<8x8xf32> to vector<8xf32>
    %118 = vector.shape_cast %117 : vector<8xf32> to vector<8x1xf32>
    %119 = arith.addf %116, %118 : vector<8x1xf32>
    %c2_63 = arith.constant 2 : index
    %c0_64 = arith.constant 0 : index
    %c0_65 = arith.constant 0 : index
    %120 = vector.load %arg14[%c2_63, %c0_64, %c0_65] : memref<4x8x1xf32, #tpu.memory_space<vmem>>, vector<1x8x1xf32>
    %121 = vector.shape_cast %120 : vector<1x8x1xf32> to vector<8x1xf32>
    %122 = vector.shape_cast %119 : vector<8x1xf32> to vector<1x8x1xf32>
    tpu.vector_store %arg14[%c2_63, %c0_64, %c0_65], %122 {strides = array<i32>} : memref<4x8x1xf32, #tpu.memory_space<vmem>>, vector<1x8x1xf32>,
    %c0_66 = arith.constant 0 : index
    %c64 = arith.constant 64 : index
    %123 = vector.load %arg15[%c0_66, %c64] : memref<8x128xf32, #tpu.memory_space<vmem>>, vector<8x32xf32>
    %124 = vector.broadcast %110 : vector<8x1xf32> to vector<8x32xf32>
    %125 = arith.mulf %124, %123 : vector<8x32xf32>
    %126 = arith.truncf %113 : vector<8x8xf32> to vector<8x8xbf16>
    %cst_67 = arith.constant dense<0.000000e+00> : vector<8x32xf32>
    %127 = tpu.matmul %126, %99, %cst_67 {dimension_numbers = #tpu.dot_dimension_numbers<[1], [0], [0], [1], [0, 0, 1, 1], [], []>} : vector<8x8xbf16>, vector<8x32xbf16>, vector<8x32xf32> -> vector<8x32xf32>
    %128 = arith.addf %125, %127 : vector<8x32xf32>
    %c0_68 = arith.constant 0 : index
    %c64_69 = arith.constant 64 : index
    %129 = vector.load %arg15[%c0_68, %c64_69] : memref<8x128xf32, #tpu.memory_space<vmem>>, vector<8x32xf32>
    tpu.vector_store %arg15[%c0_68, %c64_69], %128 {strides = array<i32>} : memref<8x128xf32, #tpu.memory_space<vmem>>, vector<8x32xf32>,
    %c2_70 = arith.constant 2 : index
    %c0_71 = arith.constant 0 : index
    %c0_72 = arith.constant 0 : index
    %130 = vector.load %arg13[%c2_70, %c0_71, %c0_72] : memref<4x8x1xf32, #tpu.memory_space<vmem>>, vector<1x8x1xf32>
    %131 = vector.shape_cast %130 : vector<1x8x1xf32> to vector<8x1xf32>
    %132 = vector.shape_cast %108 : vector<8x1xf32> to vector<1x8x1xf32>
    tpu.vector_store %arg13[%c2_70, %c0_71, %c0_72], %132 {strides = array<i32>} : memref<4x8x1xf32, #tpu.memory_space<vmem>>, vector<1x8x1xf32>,
    %133 = vector.extract_strided_slice %4 {offsets = [0, 96], sizes = [8, 32], strides = [1, 1]} : vector<8x128xbf16> to vector<8x32xbf16>
    %134 = vector.extract_strided_slice %6 {offsets = [0, 96], sizes = [8, 32], strides = [1, 1]} : vector<8x128xbf16> to vector<8x32xbf16>
    %135 = vector.extract_strided_slice %8 {offsets = [0, 96], sizes = [8, 32], strides = [1, 1]} : vector<8x128xbf16> to vector<8x32xbf16>
    %cst_73 = arith.constant dense<0.000000e+00> : vector<8x8xf32>
    %136 = tpu.matmul %133, %134, %cst_73 {dimension_numbers = #tpu.dot_dimension_numbers<[1], [1], [0], [0], [0, 0, 1, 0], [], []>} : vector<8x32xbf16>, vector<8x32xbf16>, vector<8x8xf32> -> vector<8x8xf32>
    %cst_74 = arith.constant 0.176776692 : f32
    %137 = vector.broadcast %cst_74 : f32 to vector<8x8xf32>
    %138 = arith.mulf %136, %137 : vector<8x8xf32>
    %139 = arith.addf %138, %24 : vector<8x8xf32>
    %c3 = arith.constant 3 : index
    %c0_75 = arith.constant 0 : index
    %c0_76 = arith.constant 0 : index
    %140 = vector.load %arg13[%c3, %c0_75, %c0_76] : memref<4x8x1xf32, #tpu.memory_space<vmem>>, vector<1x8x1xf32>
    %141 = vector.shape_cast %140 : vector<1x8x1xf32> to vector<8x1xf32>
    %cst_77 = arith.constant dense<0xFF800000> : vector<8xf32>
    %142 = vector.multi_reduction <maximumf>, %139, %cst_77 [1] : vector<8x8xf32> to vector<8xf32>
    %143 = vector.shape_cast %142 : vector<8xf32> to vector<8x1xf32>
    %144 = arith.maximumf %141, %143 : vector<8x1xf32>
    %145 = arith.subf %141, %144 : vector<8x1xf32>
    %146 = math.exp %145 : vector<8x1xf32>
    %147 = vector.broadcast %144 : vector<8x1xf32> to vector<8x8xf32>
    %148 = arith.subf %139, %147 : vector<8x8xf32>
    %149 = math.exp %148 : vector<8x8xf32>
    %c3_78 = arith.constant 3 : index
    %c0_79 = arith.constant 0 : index
    %c0_80 = arith.constant 0 : index
    %150 = vector.load %arg14[%c3_78, %c0_79, %c0_80] : memref<4x8x1xf32, #tpu.memory_space<vmem>>, vector<1x8x1xf32>
    %151 = vector.shape_cast %150 : vector<1x8x1xf32> to vector<8x1xf32>
    %152 = arith.mulf %146, %151 : vector<8x1xf32>
    %cst_81 = arith.constant dense<0.000000e+00> : vector<8xf32>
    %153 = vector.multi_reduction <add>, %149, %cst_81 [1] : vector<8x8xf32> to vector<8xf32>
    %154 = vector.shape_cast %153 : vector<8xf32> to vector<8x1xf32>
    %155 = arith.addf %152, %154 : vector<8x1xf32>
    %c3_82 = arith.constant 3 : index
    %c0_83 = arith.constant 0 : index
    %c0_84 = arith.constant 0 : index
    %156 = vector.load %arg14[%c3_82, %c0_83, %c0_84] : memref<4x8x1xf32, #tpu.memory_space<vmem>>, vector<1x8x1xf32>
    %157 = vector.shape_cast %156 : vector<1x8x1xf32> to vector<8x1xf32>
    %158 = vector.shape_cast %155 : vector<8x1xf32> to vector<1x8x1xf32>
    tpu.vector_store %arg14[%c3_82, %c0_83, %c0_84], %158 {strides = array<i32>} : memref<4x8x1xf32, #tpu.memory_space<vmem>>, vector<1x8x1xf32>,
    %c0_85 = arith.constant 0 : index
    %c96 = arith.constant 96 : index
    %159 = vector.load %arg15[%c0_85, %c96] : memref<8x128xf32, #tpu.memory_space<vmem>>, vector<8x32xf32>
    %160 = vector.broadcast %146 : vector<8x1xf32> to vector<8x32xf32>
    %161 = arith.mulf %160, %159 : vector<8x32xf32>
    %162 = arith.truncf %149 : vector<8x8xf32> to vector<8x8xbf16>
    %cst_86 = arith.constant dense<0.000000e+00> : vector<8x32xf32>
    %163 = tpu.matmul %162, %135, %cst_86 {dimension_numbers = #tpu.dot_dimension_numbers<[1], [0], [0], [1], [0, 0, 1, 1], [], []>} : vector<8x8xbf16>, vector<8x32xbf16>, vector<8x32xf32> -> vector<8x32xf32>
    %164 = arith.addf %161, %163 : vector<8x32xf32>
    %c0_87 = arith.constant 0 : index
    %c96_88 = arith.constant 96 : index
    %165 = vector.load %arg15[%c0_87, %c96_88] : memref<8x128xf32, #tpu.memory_space<vmem>>, vector<8x32xf32>
    tpu.vector_store %arg15[%c0_87, %c96_88], %164 {strides = array<i32>} : memref<8x128xf32, #tpu.memory_space<vmem>>, vector<8x32xf32>,
    %c3_89 = arith.constant 3 : index
    %c0_90 = arith.constant 0 : index
    %c0_91 = arith.constant 0 : index
    %166 = vector.load %arg13[%c3_89, %c0_90, %c0_91] : memref<4x8x1xf32, #tpu.memory_space<vmem>>, vector<1x8x1xf32>
    %167 = vector.shape_cast %166 : vector<1x8x1xf32> to vector<8x1xf32>
    %168 = vector.shape_cast %144 : vector<8x1xf32> to vector<1x8x1xf32>
    tpu.vector_store %arg13[%c3_89, %c0_90, %c0_91], %168 {strides = array<i32>} : memref<4x8x1xf32, #tpu.memory_space<vmem>>, vector<1x8x1xf32>,
    %c0_i32_92 = arith.constant 0 : i32
    %169 = arith.cmpi eq, %arg2, %c0_i32_92 : i32
    %170 = arith.extui %169 : i1 to i32
    %c0_i32_93 = arith.constant 0 : i32
    %171 = arith.cmpi ne, %170, %c0_i32_93 : i32
    scf.if %171 {
      %c0_94 = arith.constant 0 : index
      %c0_95 = arith.constant 0 : index
      %c0_96 = arith.constant 0 : index
      %172 = vector.load %arg14[%c0_94, %c0_95, %c0_96] : memref<4x8x1xf32, #tpu.memory_space<vmem>>, vector<1x8x1xf32>
      %173 = vector.shape_cast %172 : vector<1x8x1xf32> to vector<8x1xf32>
      %174 = tpu.reciprocal %173 {approx = true} : vector<8x1xf32> -> vector<8x1xf32>
      %c0_97 = arith.constant 0 : index
      %c0_98 = arith.constant 0 : index
      %175 = vector.load %arg15[%c0_97, %c0_98] : memref<8x128xf32, #tpu.memory_space<vmem>>, vector<8x32xf32>
      %176 = vector.broadcast %174 : vector<8x1xf32> to vector<8x32xf32>
      %177 = arith.mulf %175, %176 : vector<8x32xf32>
      %c0_99 = arith.constant 0 : index
      %c0_100 = arith.constant 0 : index
      %178 = vector.load %arg15[%c0_99, %c0_100] : memref<8x128xf32, #tpu.memory_space<vmem>>, vector<8x32xf32>
      tpu.vector_store %arg15[%c0_99, %c0_100], %177 {strides = array<i32>} : memref<8x128xf32, #tpu.memory_space<vmem>>, vector<8x32xf32>,
      %c1_101 = arith.constant 1 : index
      %c0_102 = arith.constant 0 : index
      %c0_103 = arith.constant 0 : index
      %179 = vector.load %arg14[%c1_101, %c0_102, %c0_103] : memref<4x8x1xf32, #tpu.memory_space<vmem>>, vector<1x8x1xf32>
      %180 = vector.shape_cast %179 : vector<1x8x1xf32> to vector<8x1xf32>
      %181 = tpu.reciprocal %180 {approx = true} : vector<8x1xf32> -> vector<8x1xf32>
      %c0_104 = arith.constant 0 : index
      %c32_105 = arith.constant 32 : index
      %182 = vector.load %arg15[%c0_104, %c32_105] : memref<8x128xf32, #tpu.memory_space<vmem>>, vector<8x32xf32>
      %183 = vector.broadcast %181 : vector<8x1xf32> to vector<8x32xf32>
      %184 = arith.mulf %182, %183 : vector<8x32xf32>
      %c0_106 = arith.constant 0 : index
      %c32_107 = arith.constant 32 : index
      %185 = vector.load %arg15[%c0_106, %c32_107] : memref<8x128xf32, #tpu.memory_space<vmem>>, vector<8x32xf32>
      tpu.vector_store %arg15[%c0_106, %c32_107], %184 {strides = array<i32>} : memref<8x128xf32, #tpu.memory_space<vmem>>, vector<8x32xf32>,
      %c2_108 = arith.constant 2 : index
      %c0_109 = arith.constant 0 : index
      %c0_110 = arith.constant 0 : index
      %186 = vector.load %arg14[%c2_108, %c0_109, %c0_110] : memref<4x8x1xf32, #tpu.memory_space<vmem>>, vector<1x8x1xf32>
      %187 = vector.shape_cast %186 : vector<1x8x1xf32> to vector<8x1xf32>
      %188 = tpu.reciprocal %187 {approx = true} : vector<8x1xf32> -> vector<8x1xf32>
      %c0_111 = arith.constant 0 : index
      %c64_112 = arith.constant 64 : index
      %189 = vector.load %arg15[%c0_111, %c64_112] : memref<8x128xf32, #tpu.memory_space<vmem>>, vector<8x32xf32>
      %190 = vector.broadcast %188 : vector<8x1xf32> to vector<8x32xf32>
      %191 = arith.mulf %189, %190 : vector<8x32xf32>
      %c0_113 = arith.constant 0 : index
      %c64_114 = arith.constant 64 : index
      %192 = vector.load %arg15[%c0_113, %c64_114] : memref<8x128xf32, #tpu.memory_space<vmem>>, vector<8x32xf32>
      tpu.vector_store %arg15[%c0_113, %c64_114], %191 {strides = array<i32>} : memref<8x128xf32, #tpu.memory_space<vmem>>, vector<8x32xf32>,
      %c3_115 = arith.constant 3 : index
      %c0_116 = arith.constant 0 : index
      %c0_117 = arith.constant 0 : index
      %193 = vector.load %arg14[%c3_115, %c0_116, %c0_117] : memref<4x8x1xf32, #tpu.memory_space<vmem>>, vector<1x8x1xf32>
      %194 = vector.shape_cast %193 : vector<1x8x1xf32> to vector<8x1xf32>
      %195 = tpu.reciprocal %194 {approx = true} : vector<8x1xf32> -> vector<8x1xf32>
      %c0_118 = arith.constant 0 : index
      %c96_119 = arith.constant 96 : index
      %196 = vector.load %arg15[%c0_118, %c96_119] : memref<8x128xf32, #tpu.memory_space<vmem>>, vector<8x32xf32>
      %197 = vector.broadcast %195 : vector<8x1xf32> to vector<8x32xf32>
      %198 = arith.mulf %196, %197 : vector<8x32xf32>
      %c0_120 = arith.constant 0 : index
      %c96_121 = arith.constant 96 : index
      %199 = vector.load %arg15[%c0_120, %c96_121] : memref<8x128xf32, #tpu.memory_space<vmem>>, vector<8x32xf32>
      tpu.vector_store %arg15[%c0_120, %c96_121], %198 {strides = array<i32>} : memref<8x128xf32, #tpu.memory_space<vmem>>, vector<8x32xf32>,
      %c0_122 = arith.constant 0 : index
      %c0_123 = arith.constant 0 : index
      %200 = vector.load %arg15[%c0_122, %c0_123] : memref<8x128xf32, #tpu.memory_space<vmem>>, vector<8x128xf32>
      %201 = arith.truncf %200 : vector<8x128xf32> to vector<8x128xbf16>
      %c0_124 = arith.constant 0 : index
      %c0_125 = arith.constant 0 : index
      %202 = vector.load %arg8[%c0_124, %c0_125] : memref<128x128xbf16, #tpu.memory_space<vmem>>, vector<128x128xbf16>
      %cst_126 = arith.constant dense<0.000000e+00> : vector<8x128xf32>
      %203 = tpu.matmul %201, %202, %cst_126 {dimension_numbers = #tpu.dot_dimension_numbers<[1], [0], [0], [1], [0, 0, 1, 1], [], []>} : vector<8x128xbf16>, vector<128x128xbf16>, vector<8x128xf32> -> vector<8x128xf32>
      %c0_127 = arith.constant 0 : index
      %c0_128 = arith.constant 0 : index
      %c0_129 = arith.constant 0 : index
      %204 = vector.load %arg3[%c0_127, %c0_128, %c0_129] : memref<1x8x128xbf16, #tpu.memory_space<vmem>>, vector<1x8x128xbf16>
      %205 = vector.shape_cast %204 : vector<1x8x128xbf16> to vector<8x128xbf16>
      %206 = arith.extf %205 : vector<8x128xbf16> to vector<8x128xf32>
      %207 = arith.addf %206, %203 : vector<8x128xf32>
      %c0_130 = arith.constant 0 : index
      %c0_131 = arith.constant 0 : index
      %208 = vector.load %arg9[%c0_130, %c0_131] : memref<1x128xf32, #tpu.memory_space<vmem>>, vector<1x128xf32>
      %209 = vector.broadcast %208 : vector<1x128xf32> to vector<8x128xf32>
      %210 = arith.addf %207, %209 : vector<8x128xf32>
      %cst_132 = arith.constant dense<0.000000e+00> : vector<8xf32>
      %211 = vector.multi_reduction <add>, %210, %cst_132 [1] : vector<8x128xf32> to vector<8xf32>
      %212 = vector.shape_cast %211 : vector<8xf32> to vector<8x1xf32>
      %cst_133 = arith.constant 1.280000e+02 : f32
      %213 = vector.broadcast %cst_133 : f32 to vector<8x1xf32>
      %214 = arith.divf %212, %213 : vector<8x1xf32>
      %215 = vector.broadcast %214 : vector<8x1xf32> to vector<8x128xf32>
      %216 = arith.subf %210, %215 : vector<8x128xf32>
      %217 = arith.mulf %216, %216 : vector<8x128xf32>
      %cst_134 = arith.constant dense<0.000000e+00> : vector<8xf32>
      %218 = vector.multi_reduction <add>, %217, %cst_134 [1] : vector<8x128xf32> to vector<8xf32>
      %219 = vector.shape_cast %218 : vector<8xf32> to vector<8x1xf32>
      %cst_135 = arith.constant 1.280000e+02 : f32
      %220 = vector.broadcast %cst_135 : f32 to vector<8x1xf32>
      %221 = arith.divf %219, %220 : vector<8x1xf32>
      %222 = vector.broadcast %214 : vector<8x1xf32> to vector<8x128xf32>
      %223 = arith.subf %210, %222 : vector<8x128xf32>
      %cst_136 = arith.constant 9.99999974E-6 : f32
      %224 = vector.broadcast %cst_136 : f32 to vector<8x1xf32>
      %225 = arith.addf %221, %224 : vector<8x1xf32>
      %226 = math.rsqrt %225 : vector<8x1xf32>
      %227 = vector.broadcast %226 : vector<8x1xf32> to vector<8x128xf32>
      %228 = arith.mulf %223, %227 : vector<8x128xf32>
      %c0_137 = arith.constant 0 : index
      %c0_138 = arith.constant 0 : index
      %229 = vector.load %arg10[%c0_137, %c0_138] : memref<1x128xf32, #tpu.memory_space<vmem>>, vector<1x128xf32>
      %230 = vector.broadcast %229 : vector<1x128xf32> to vector<8x128xf32>
      %231 = arith.mulf %228, %230 : vector<8x128xf32>
      %c0_139 = arith.constant 0 : index
      %c0_140 = arith.constant 0 : index
      %232 = vector.load %arg11[%c0_139, %c0_140] : memref<1x128xf32, #tpu.memory_space<vmem>>, vector<1x128xf32>
      %233 = vector.broadcast %232 : vector<1x128xf32> to vector<8x128xf32>
      %234 = arith.addf %231, %233 : vector<8x128xf32>
      %235 = arith.truncf %234 : vector<8x128xf32> to vector<8x128xbf16>
      %c0_141 = arith.constant 0 : index
      %c0_142 = arith.constant 0 : index
      %c0_143 = arith.constant 0 : index
      %236 = vector.load %arg12[%c0_141, %c0_142, %c0_143] : memref<1x8x128xbf16, #tpu.memory_space<vmem>>, vector<1x8x128xbf16>
      %237 = vector.shape_cast %236 : vector<1x8x128xbf16> to vector<8x128xbf16>
      %238 = vector.shape_cast %235 : vector<8x128xbf16> to vector<1x8x128xbf16>
      tpu.vector_store %arg12[%c0_141, %c0_142, %c0_143], %238 {strides = array<i32>} : memref<1x8x128xbf16, #tpu.memory_space<vmem>>, vector<1x8x128xbf16>,
    } else {
    }
    return
  }
  func.func @transform_0(%arg0: i32, %arg1: i32, %arg2: i32) -> (i32, i32, i32) {
    %c0_i32 = arith.constant 0 : i32
    %c0_i32_0 = arith.constant 0 : i32
    return %arg0, %arg1, %c0_i32 : i32, i32, i32
  }
  func.func @transform_1(%arg0: i32, %arg1: i32, %arg2: i32) -> (i32, i32, i32) {
    %c0_i32 = arith.constant 0 : i32
    %c0_i32_0 = arith.constant 0 : i32
    return %arg0, %arg1, %c0_i32 : i32, i32, i32
  }
  func.func @transform_2(%arg0: i32, %arg1: i32, %arg2: i32) -> (i32, i32, i32) {
    %c1_i32 = arith.constant 1 : i32
    %c0_i32 = arith.constant 0 : i32
    return %arg0, %arg2, %c1_i32 : i32, i32, i32
  }
  func.func @transform_3(%arg0: i32, %arg1: i32, %arg2: i32) -> (i32, i32, i32) {
    %c2_i32 = arith.constant 2 : i32
    %c0_i32 = arith.constant 0 : i32
    return %arg0, %arg2, %c2_i32 : i32, i32, i32
  }
  func.func @transform_4(%arg0: i32, %arg1: i32, %arg2: i32) -> (i32, i32, i32) {
    %c0_i32 = arith.constant 0 : i32
    %c0_i32_0 = arith.constant 0 : i32
    return %arg0, %c0_i32, %arg2 : i32, i32, i32
  }
  func.func @transform_5(%arg0: i32, %arg1: i32, %arg2: i32) -> (i32, i32) {
    %c0_i32 = arith.constant 0 : i32
    %c0_i32_0 = arith.constant 0 : i32
    %c0_i32_1 = arith.constant 0 : i32
    return %c0_i32, %c0_i32_0 : i32, i32
  }
  func.func @transform_6(%arg0: i32, %arg1: i32, %arg2: i32) -> (i32, i32) {
    %c0_i32 = arith.constant 0 : i32
    %c0_i32_0 = arith.constant 0 : i32
    %c0_i32_1 = arith.constant 0 : i32
    return %c0_i32, %c0_i32_0 : i32, i32
  }
  func.func @transform_7(%arg0: i32, %arg1: i32, %arg2: i32) -> (i32, i32) {
    %c0_i32 = arith.constant 0 : i32
    %c0_i32_0 = arith.constant 0 : i32
    %c0_i32_1 = arith.constant 0 : i32
    return %c0_i32, %c0_i32_0 : i32, i32
  }
  func.func @transform_8(%arg0: i32, %arg1: i32, %arg2: i32) -> (i32, i32) {
    %c0_i32 = arith.constant 0 : i32
    %c0_i32_0 = arith.constant 0 : i32
    %c0_i32_1 = arith.constant 0 : i32
    return %c0_i32, %c0_i32_0 : i32, i32
  }
  func.func @transform_9(%arg0: i32, %arg1: i32, %arg2: i32) -> (i32, i32, i32) {
    %c0_i32 = arith.constant 0 : i32
    %c0_i32_0 = arith.constant 0 : i32
    return %arg0, %arg1, %c0_i32 : i32, i32, i32
  }
}

module attributes {stable_mosaic.version = 11 : i64} {
  func.func @_linear_resid_ln_kernel(%arg0: i32, %arg1: i32, %arg2: memref<16x128xbf16, #tpu.memory_space<vmem>>, %arg3: memref<16x256xbf16, #tpu.memory_space<vmem>>, %arg4: memref<256x128xbf16, #tpu.memory_space<vmem>>, %arg5: memref<1x128xf32, #tpu.memory_space<vmem>>, %arg6: memref<1x128xf32, #tpu.memory_space<vmem>>, %arg7: memref<1x128xf32, #tpu.memory_space<vmem>>, %arg8: memref<16x128xbf16, #tpu.memory_space<vmem>>, %arg9: memref<16x128xf32, #tpu.memory_space<vmem>>) attributes {dimension_semantics = [#tpu.dimension_semantics<parallel>, #tpu.dimension_semantics<arbitrary>], iteration_bounds = array<i64: 1, 1>, scalar_prefetch = 0 : i64, scratch_operands = 1 : i64, tpu.core_type = #tpu.core_type<tc>, window_params = [{transform_indices = @transform_0, window_bounds = array<i64: 16, 128>}, {transform_indices = @transform_1, window_bounds = array<i64: 16, 256>}, {transform_indices = @transform_2, window_bounds = array<i64: 256, 128>}, {pipeline_mode = #tpu.pipeline_mode<synchronous>, transform_indices = @transform_3, window_bounds = array<i64: 1, 128>}, {pipeline_mode = #tpu.pipeline_mode<synchronous>, transform_indices = @transform_4, window_bounds = array<i64: 1, 128>}, {pipeline_mode = #tpu.pipeline_mode<synchronous>, transform_indices = @transform_5, window_bounds = array<i64: 1, 128>}, {transform_indices = @transform_6, window_bounds = array<i64: 16, 128>}]} {
    %c0_i32 = arith.constant 0 : i32
    %0 = arith.cmpi eq, %arg1, %c0_i32 : i32
    %1 = arith.extui %0 : i1 to i32
    %c0_i32_0 = arith.constant 0 : i32
    %2 = arith.cmpi ne, %1, %c0_i32_0 : i32
    scf.if %2 {
      %cst_10 = arith.constant 0.000000e+00 : f32
      %12 = vector.broadcast %cst_10 : f32 to vector<16x128xf32>
      %c0_11 = arith.constant 0 : index
      %c0_12 = arith.constant 0 : index
      %13 = vector.load %arg9[%c0_11, %c0_12] : memref<16x128xf32, #tpu.memory_space<vmem>>, vector<16x128xf32>
      tpu.vector_store %arg9[%c0_11, %c0_12], %12 {strides = array<i32>} : memref<16x128xf32, #tpu.memory_space<vmem>>, vector<16x128xf32>,
    } else {
    }
    %c0 = arith.constant 0 : index
    %c0_1 = arith.constant 0 : index
    %3 = vector.load %arg9[%c0, %c0_1] : memref<16x128xf32, #tpu.memory_space<vmem>>, vector<16x128xf32>
    %c0_2 = arith.constant 0 : index
    %c0_3 = arith.constant 0 : index
    %4 = vector.load %arg3[%c0_2, %c0_3] : memref<16x256xbf16, #tpu.memory_space<vmem>>, vector<16x256xbf16>
    %c0_4 = arith.constant 0 : index
    %c0_5 = arith.constant 0 : index
    %5 = vector.load %arg4[%c0_4, %c0_5] : memref<256x128xbf16, #tpu.memory_space<vmem>>, vector<256x128xbf16>
    %cst = arith.constant dense<0.000000e+00> : vector<16x128xf32>
    %6 = tpu.matmul %4, %5, %cst {dimension_numbers = #tpu.dot_dimension_numbers<[1], [0], [0], [1], [0, 0, 1, 1], [], []>} : vector<16x256xbf16>, vector<256x128xbf16>, vector<16x128xf32> -> vector<16x128xf32>
    %7 = arith.addf %3, %6 : vector<16x128xf32>
    %c0_6 = arith.constant 0 : index
    %c0_7 = arith.constant 0 : index
    %8 = vector.load %arg9[%c0_6, %c0_7] : memref<16x128xf32, #tpu.memory_space<vmem>>, vector<16x128xf32>
    tpu.vector_store %arg9[%c0_6, %c0_7], %7 {strides = array<i32>} : memref<16x128xf32, #tpu.memory_space<vmem>>, vector<16x128xf32>,
    %c0_i32_8 = arith.constant 0 : i32
    %9 = arith.cmpi eq, %arg1, %c0_i32_8 : i32
    %10 = arith.extui %9 : i1 to i32
    %c0_i32_9 = arith.constant 0 : i32
    %11 = arith.cmpi ne, %10, %c0_i32_9 : i32
    scf.if %11 {
      %c0_10 = arith.constant 0 : index
      %c0_11 = arith.constant 0 : index
      %12 = vector.load %arg2[%c0_10, %c0_11] : memref<16x128xbf16, #tpu.memory_space<vmem>>, vector<16x128xbf16>
      %13 = arith.extf %12 : vector<16x128xbf16> to vector<16x128xf32>
      %c0_12 = arith.constant 0 : index
      %c0_13 = arith.constant 0 : index
      %14 = vector.load %arg9[%c0_12, %c0_13] : memref<16x128xf32, #tpu.memory_space<vmem>>, vector<16x128xf32>
      %15 = arith.addf %13, %14 : vector<16x128xf32>
      %c0_14 = arith.constant 0 : index
      %c0_15 = arith.constant 0 : index
      %16 = vector.load %arg5[%c0_14, %c0_15] : memref<1x128xf32, #tpu.memory_space<vmem>>, vector<1x128xf32>
      %17 = vector.broadcast %16 : vector<1x128xf32> to vector<16x128xf32>
      %18 = arith.addf %15, %17 : vector<16x128xf32>
      %cst_16 = arith.constant dense<0.000000e+00> : vector<16xf32>
      %19 = vector.multi_reduction <add>, %18, %cst_16 [1] : vector<16x128xf32> to vector<16xf32>
      %20 = vector.shape_cast %19 : vector<16xf32> to vector<16x1xf32>
      %cst_17 = arith.constant 1.280000e+02 : f32
      %21 = vector.broadcast %cst_17 : f32 to vector<16x1xf32>
      %22 = arith.divf %20, %21 : vector<16x1xf32>
      %23 = vector.broadcast %22 : vector<16x1xf32> to vector<16x128xf32>
      %24 = arith.subf %18, %23 : vector<16x128xf32>
      %25 = arith.mulf %24, %24 : vector<16x128xf32>
      %cst_18 = arith.constant dense<0.000000e+00> : vector<16xf32>
      %26 = vector.multi_reduction <add>, %25, %cst_18 [1] : vector<16x128xf32> to vector<16xf32>
      %27 = vector.shape_cast %26 : vector<16xf32> to vector<16x1xf32>
      %cst_19 = arith.constant 1.280000e+02 : f32
      %28 = vector.broadcast %cst_19 : f32 to vector<16x1xf32>
      %29 = arith.divf %27, %28 : vector<16x1xf32>
      %30 = vector.broadcast %22 : vector<16x1xf32> to vector<16x128xf32>
      %31 = arith.subf %18, %30 : vector<16x128xf32>
      %cst_20 = arith.constant 9.99999974E-6 : f32
      %32 = vector.broadcast %cst_20 : f32 to vector<16x1xf32>
      %33 = arith.addf %29, %32 : vector<16x1xf32>
      %34 = math.rsqrt %33 : vector<16x1xf32>
      %35 = vector.broadcast %34 : vector<16x1xf32> to vector<16x128xf32>
      %36 = arith.mulf %31, %35 : vector<16x128xf32>
      %c0_21 = arith.constant 0 : index
      %c0_22 = arith.constant 0 : index
      %37 = vector.load %arg6[%c0_21, %c0_22] : memref<1x128xf32, #tpu.memory_space<vmem>>, vector<1x128xf32>
      %38 = vector.broadcast %37 : vector<1x128xf32> to vector<16x128xf32>
      %39 = arith.mulf %36, %38 : vector<16x128xf32>
      %c0_23 = arith.constant 0 : index
      %c0_24 = arith.constant 0 : index
      %40 = vector.load %arg7[%c0_23, %c0_24] : memref<1x128xf32, #tpu.memory_space<vmem>>, vector<1x128xf32>
      %41 = vector.broadcast %40 : vector<1x128xf32> to vector<16x128xf32>
      %42 = arith.addf %39, %41 : vector<16x128xf32>
      %43 = arith.truncf %42 : vector<16x128xf32> to vector<16x128xbf16>
      %c0_25 = arith.constant 0 : index
      %c0_26 = arith.constant 0 : index
      %44 = vector.load %arg8[%c0_25, %c0_26] : memref<16x128xbf16, #tpu.memory_space<vmem>>, vector<16x128xbf16>
      tpu.vector_store %arg8[%c0_25, %c0_26], %43 {strides = array<i32>} : memref<16x128xbf16, #tpu.memory_space<vmem>>, vector<16x128xbf16>,
    } else {
    }
    return
  }
  func.func @transform_0(%arg0: i32, %arg1: i32) -> (i32, i32) {
    %c0_i32 = arith.constant 0 : i32
    %c0_i32_0 = arith.constant 0 : i32
    return %arg0, %c0_i32 : i32, i32
  }
  func.func @transform_1(%arg0: i32, %arg1: i32) -> (i32, i32) {
    %c0_i32 = arith.constant 0 : i32
    return %arg0, %arg1 : i32, i32
  }
  func.func @transform_2(%arg0: i32, %arg1: i32) -> (i32, i32) {
    %c0_i32 = arith.constant 0 : i32
    %c0_i32_0 = arith.constant 0 : i32
    return %arg1, %c0_i32 : i32, i32
  }
  func.func @transform_3(%arg0: i32, %arg1: i32) -> (i32, i32) {
    %c0_i32 = arith.constant 0 : i32
    %c0_i32_0 = arith.constant 0 : i32
    %c0_i32_1 = arith.constant 0 : i32
    return %c0_i32, %c0_i32_0 : i32, i32
  }
  func.func @transform_4(%arg0: i32, %arg1: i32) -> (i32, i32) {
    %c0_i32 = arith.constant 0 : i32
    %c0_i32_0 = arith.constant 0 : i32
    %c0_i32_1 = arith.constant 0 : i32
    return %c0_i32, %c0_i32_0 : i32, i32
  }
  func.func @transform_5(%arg0: i32, %arg1: i32) -> (i32, i32) {
    %c0_i32 = arith.constant 0 : i32
    %c0_i32_0 = arith.constant 0 : i32
    %c0_i32_1 = arith.constant 0 : i32
    return %c0_i32, %c0_i32_0 : i32, i32
  }
  func.func @transform_6(%arg0: i32, %arg1: i32) -> (i32, i32) {
    %c0_i32 = arith.constant 0 : i32
    %c0_i32_0 = arith.constant 0 : i32
    return %arg0, %c0_i32 : i32, i32
  }
}

module attributes {stable_mosaic.version = 11 : i64} {
  func.func @_linear_kernel(%arg0: i32, %arg1: i32, %arg2: i32, %arg3: memref<16x128xbf16, #tpu.memory_space<vmem>>, %arg4: memref<128x256xbf16, #tpu.memory_space<vmem>>, %arg5: memref<1x256xf32, #tpu.memory_space<vmem>>, %arg6: memref<16x256xbf16, #tpu.memory_space<vmem>>, %arg7: memref<16x256xf32, #tpu.memory_space<vmem>>) attributes {dimension_semantics = [#tpu.dimension_semantics<parallel>, #tpu.dimension_semantics<parallel>, #tpu.dimension_semantics<arbitrary>], iteration_bounds = array<i64: 1, 1, 1>, scalar_prefetch = 0 : i64, scratch_operands = 1 : i64, tpu.core_type = #tpu.core_type<tc>, window_params = [{transform_indices = @transform_0, window_bounds = array<i64: 16, 128>}, {transform_indices = @transform_1, window_bounds = array<i64: 128, 256>}, {transform_indices = @transform_2, window_bounds = array<i64: 1, 256>}, {transform_indices = @transform_3, window_bounds = array<i64: 16, 256>}]} {
    %c0_i32 = arith.constant 0 : i32
    %0 = arith.cmpi eq, %arg2, %c0_i32 : i32
    %1 = arith.extui %0 : i1 to i32
    %c0_i32_0 = arith.constant 0 : i32
    %2 = arith.cmpi ne, %1, %c0_i32_0 : i32
    scf.if %2 {
      %cst_10 = arith.constant 0.000000e+00 : f32
      %12 = vector.broadcast %cst_10 : f32 to vector<16x256xf32>
      %c0_11 = arith.constant 0 : index
      %c0_12 = arith.constant 0 : index
      %13 = vector.load %arg7[%c0_11, %c0_12] : memref<16x256xf32, #tpu.memory_space<vmem>>, vector<16x256xf32>
      tpu.vector_store %arg7[%c0_11, %c0_12], %12 {strides = array<i32>} : memref<16x256xf32, #tpu.memory_space<vmem>>, vector<16x256xf32>,
    } else {
    }
    %c0 = arith.constant 0 : index
    %c0_1 = arith.constant 0 : index
    %3 = vector.load %arg7[%c0, %c0_1] : memref<16x256xf32, #tpu.memory_space<vmem>>, vector<16x256xf32>
    %c0_2 = arith.constant 0 : index
    %c0_3 = arith.constant 0 : index
    %4 = vector.load %arg3[%c0_2, %c0_3] : memref<16x128xbf16, #tpu.memory_space<vmem>>, vector<16x128xbf16>
    %c0_4 = arith.constant 0 : index
    %c0_5 = arith.constant 0 : index
    %5 = vector.load %arg4[%c0_4, %c0_5] : memref<128x256xbf16, #tpu.memory_space<vmem>>, vector<128x256xbf16>
    %cst = arith.constant dense<0.000000e+00> : vector<16x256xf32>
    %6 = tpu.matmul %4, %5, %cst {dimension_numbers = #tpu.dot_dimension_numbers<[1], [0], [0], [1], [0, 0, 1, 1], [], []>} : vector<16x128xbf16>, vector<128x256xbf16>, vector<16x256xf32> -> vector<16x256xf32>
    %7 = arith.addf %3, %6 : vector<16x256xf32>
    %c0_6 = arith.constant 0 : index
    %c0_7 = arith.constant 0 : index
    %8 = vector.load %arg7[%c0_6, %c0_7] : memref<16x256xf32, #tpu.memory_space<vmem>>, vector<16x256xf32>
    tpu.vector_store %arg7[%c0_6, %c0_7], %7 {strides = array<i32>} : memref<16x256xf32, #tpu.memory_space<vmem>>, vector<16x256xf32>,
    %c0_i32_8 = arith.constant 0 : i32
    %9 = arith.cmpi eq, %arg2, %c0_i32_8 : i32
    %10 = arith.extui %9 : i1 to i32
    %c0_i32_9 = arith.constant 0 : i32
    %11 = arith.cmpi ne, %10, %c0_i32_9 : i32
    scf.if %11 {
      %c0_10 = arith.constant 0 : index
      %c0_11 = arith.constant 0 : index
      %12 = vector.load %arg7[%c0_10, %c0_11] : memref<16x256xf32, #tpu.memory_space<vmem>>, vector<16x256xf32>
      %c0_12 = arith.constant 0 : index
      %c0_13 = arith.constant 0 : index
      %13 = vector.load %arg5[%c0_12, %c0_13] : memref<1x256xf32, #tpu.memory_space<vmem>>, vector<1x256xf32>
      %14 = vector.broadcast %13 : vector<1x256xf32> to vector<16x256xf32>
      %15 = arith.addf %12, %14 : vector<16x256xf32>
      %cst_14 = arith.constant 0.000000e+00 : f32
      %16 = vector.broadcast %cst_14 : f32 to vector<16x256xf32>
      %17 = arith.maximumf %15, %16 : vector<16x256xf32>
      %18 = arith.truncf %17 : vector<16x256xf32> to vector<16x256xbf16>
      %c0_15 = arith.constant 0 : index
      %c0_16 = arith.constant 0 : index
      %19 = vector.load %arg6[%c0_15, %c0_16] : memref<16x256xbf16, #tpu.memory_space<vmem>>, vector<16x256xbf16>
      tpu.vector_store %arg6[%c0_15, %c0_16], %18 {strides = array<i32>} : memref<16x256xbf16, #tpu.memory_space<vmem>>, vector<16x256xbf16>,
    } else {
    }
    return
  }
  func.func @transform_0(%arg0: i32, %arg1: i32, %arg2: i32) -> (i32, i32) {
    %c0_i32 = arith.constant 0 : i32
    return %arg0, %arg2 : i32, i32
  }
  func.func @transform_1(%arg0: i32, %arg1: i32, %arg2: i32) -> (i32, i32) {
    %c0_i32 = arith.constant 0 : i32
    return %arg2, %arg1 : i32, i32
  }
  func.func @transform_2(%arg0: i32, %arg1: i32, %arg2: i32) -> (i32, i32) {
    %c0_i32 = arith.constant 0 : i32
    %c0_i32_0 = arith.constant 0 : i32
    return %c0_i32, %arg1 : i32, i32
  }
  func.func @transform_3(%arg0: i32, %arg1: i32, %arg2: i32) -> (i32, i32) {
    %c0_i32 = arith.constant 0 : i32
    return %arg0, %arg1 : i32, i32
  }
}

module attributes {stable_mosaic.version = 11 : i64} {
  func.func @_linear_kernel(%arg0: i32, %arg1: i32, %arg2: i32, %arg3: memref<16x128xbf16, #tpu.memory_space<vmem>>, %arg4: memref<128x256xbf16, #tpu.memory_space<vmem>>, %arg5: memref<1x256xf32, #tpu.memory_space<vmem>>, %arg6: memref<16x256xbf16, #tpu.memory_space<vmem>>, %arg7: memref<16x256xf32, #tpu.memory_space<vmem>>) attributes {dimension_semantics = [#tpu.dimension_semantics<parallel>, #tpu.dimension_semantics<parallel>, #tpu.dimension_semantics<arbitrary>], iteration_bounds = array<i64: 1, 1, 1>, scalar_prefetch = 0 : i64, scratch_operands = 1 : i64, tpu.core_type = #tpu.core_type<tc>, window_params = [{transform_indices = @transform_0, window_bounds = array<i64: 16, 128>}, {transform_indices = @transform_1, window_bounds = array<i64: 128, 256>}, {transform_indices = @transform_2, window_bounds = array<i64: 1, 256>}, {transform_indices = @transform_3, window_bounds = array<i64: 16, 256>}]} {
    %c0_i32 = arith.constant 0 : i32
    %0 = arith.cmpi eq, %arg2, %c0_i32 : i32
    %1 = arith.extui %0 : i1 to i32
    %c0_i32_0 = arith.constant 0 : i32
    %2 = arith.cmpi ne, %1, %c0_i32_0 : i32
    scf.if %2 {
      %cst_10 = arith.constant 0.000000e+00 : f32
      %12 = vector.broadcast %cst_10 : f32 to vector<16x256xf32>
      %c0_11 = arith.constant 0 : index
      %c0_12 = arith.constant 0 : index
      %13 = vector.load %arg7[%c0_11, %c0_12] : memref<16x256xf32, #tpu.memory_space<vmem>>, vector<16x256xf32>
      tpu.vector_store %arg7[%c0_11, %c0_12], %12 {strides = array<i32>} : memref<16x256xf32, #tpu.memory_space<vmem>>, vector<16x256xf32>,
    } else {
    }
    %c0 = arith.constant 0 : index
    %c0_1 = arith.constant 0 : index
    %3 = vector.load %arg7[%c0, %c0_1] : memref<16x256xf32, #tpu.memory_space<vmem>>, vector<16x256xf32>
    %c0_2 = arith.constant 0 : index
    %c0_3 = arith.constant 0 : index
    %4 = vector.load %arg3[%c0_2, %c0_3] : memref<16x128xbf16, #tpu.memory_space<vmem>>, vector<16x128xbf16>
    %c0_4 = arith.constant 0 : index
    %c0_5 = arith.constant 0 : index
    %5 = vector.load %arg4[%c0_4, %c0_5] : memref<128x256xbf16, #tpu.memory_space<vmem>>, vector<128x256xbf16>
    %cst = arith.constant dense<0.000000e+00> : vector<16x256xf32>
    %6 = tpu.matmul %4, %5, %cst {dimension_numbers = #tpu.dot_dimension_numbers<[1], [0], [0], [1], [0, 0, 1, 1], [], []>} : vector<16x128xbf16>, vector<128x256xbf16>, vector<16x256xf32> -> vector<16x256xf32>
    %7 = arith.addf %3, %6 : vector<16x256xf32>
    %c0_6 = arith.constant 0 : index
    %c0_7 = arith.constant 0 : index
    %8 = vector.load %arg7[%c0_6, %c0_7] : memref<16x256xf32, #tpu.memory_space<vmem>>, vector<16x256xf32>
    tpu.vector_store %arg7[%c0_6, %c0_7], %7 {strides = array<i32>} : memref<16x256xf32, #tpu.memory_space<vmem>>, vector<16x256xf32>,
    %c0_i32_8 = arith.constant 0 : i32
    %9 = arith.cmpi eq, %arg2, %c0_i32_8 : i32
    %10 = arith.extui %9 : i1 to i32
    %c0_i32_9 = arith.constant 0 : i32
    %11 = arith.cmpi ne, %10, %c0_i32_9 : i32
    scf.if %11 {
      %c0_10 = arith.constant 0 : index
      %c0_11 = arith.constant 0 : index
      %12 = vector.load %arg7[%c0_10, %c0_11] : memref<16x256xf32, #tpu.memory_space<vmem>>, vector<16x256xf32>
      %c0_12 = arith.constant 0 : index
      %c0_13 = arith.constant 0 : index
      %13 = vector.load %arg5[%c0_12, %c0_13] : memref<1x256xf32, #tpu.memory_space<vmem>>, vector<1x256xf32>
      %14 = vector.broadcast %13 : vector<1x256xf32> to vector<16x256xf32>
      %15 = arith.addf %12, %14 : vector<16x256xf32>
      %16 = arith.truncf %15 : vector<16x256xf32> to vector<16x256xbf16>
      %c0_14 = arith.constant 0 : index
      %c0_15 = arith.constant 0 : index
      %17 = vector.load %arg6[%c0_14, %c0_15] : memref<16x256xbf16, #tpu.memory_space<vmem>>, vector<16x256xbf16>
      tpu.vector_store %arg6[%c0_14, %c0_15], %16 {strides = array<i32>} : memref<16x256xbf16, #tpu.memory_space<vmem>>, vector<16x256xbf16>,
    } else {
    }
    return
  }
  func.func @transform_0(%arg0: i32, %arg1: i32, %arg2: i32) -> (i32, i32) {
    %c0_i32 = arith.constant 0 : i32
    return %arg0, %arg2 : i32, i32
  }
  func.func @transform_1(%arg0: i32, %arg1: i32, %arg2: i32) -> (i32, i32) {
    %c0_i32 = arith.constant 0 : i32
    return %arg2, %arg1 : i32, i32
  }
  func.func @transform_2(%arg0: i32, %arg1: i32, %arg2: i32) -> (i32, i32) {
    %c0_i32 = arith.constant 0 : i32
    %c0_i32_0 = arith.constant 0 : i32
    return %c0_i32, %arg1 : i32, i32
  }
  func.func @transform_3(%arg0: i32, %arg1: i32, %arg2: i32) -> (i32, i32) {
    %c0_i32 = arith.constant 0 : i32
    return %arg0, %arg1 : i32, i32
  }
}

module attributes {stable_mosaic.version = 11 : i64} {
  func.func @_linear_kernel(%arg0: i32, %arg1: i32, %arg2: i32, %arg3: memref<16x128xbf16, #tpu.memory_space<vmem>>, %arg4: memref<128x256xbf16, #tpu.memory_space<vmem>>, %arg5: memref<1x256xf32, #tpu.memory_space<vmem>>, %arg6: memref<16x256xf32, #tpu.memory_space<vmem>>, %arg7: memref<16x256xf32, #tpu.memory_space<vmem>>) attributes {dimension_semantics = [#tpu.dimension_semantics<parallel>, #tpu.dimension_semantics<parallel>, #tpu.dimension_semantics<arbitrary>], iteration_bounds = array<i64: 1, 1, 1>, scalar_prefetch = 0 : i64, scratch_operands = 1 : i64, tpu.core_type = #tpu.core_type<tc>, window_params = [{transform_indices = @transform_0, window_bounds = array<i64: 16, 128>}, {transform_indices = @transform_1, window_bounds = array<i64: 128, 256>}, {transform_indices = @transform_2, window_bounds = array<i64: 1, 256>}, {transform_indices = @transform_3, window_bounds = array<i64: 16, 256>}]} {
    %c0_i32 = arith.constant 0 : i32
    %0 = arith.cmpi eq, %arg2, %c0_i32 : i32
    %1 = arith.extui %0 : i1 to i32
    %c0_i32_0 = arith.constant 0 : i32
    %2 = arith.cmpi ne, %1, %c0_i32_0 : i32
    scf.if %2 {
      %cst_10 = arith.constant 0.000000e+00 : f32
      %12 = vector.broadcast %cst_10 : f32 to vector<16x256xf32>
      %c0_11 = arith.constant 0 : index
      %c0_12 = arith.constant 0 : index
      %13 = vector.load %arg7[%c0_11, %c0_12] : memref<16x256xf32, #tpu.memory_space<vmem>>, vector<16x256xf32>
      tpu.vector_store %arg7[%c0_11, %c0_12], %12 {strides = array<i32>} : memref<16x256xf32, #tpu.memory_space<vmem>>, vector<16x256xf32>,
    } else {
    }
    %c0 = arith.constant 0 : index
    %c0_1 = arith.constant 0 : index
    %3 = vector.load %arg7[%c0, %c0_1] : memref<16x256xf32, #tpu.memory_space<vmem>>, vector<16x256xf32>
    %c0_2 = arith.constant 0 : index
    %c0_3 = arith.constant 0 : index
    %4 = vector.load %arg3[%c0_2, %c0_3] : memref<16x128xbf16, #tpu.memory_space<vmem>>, vector<16x128xbf16>
    %c0_4 = arith.constant 0 : index
    %c0_5 = arith.constant 0 : index
    %5 = vector.load %arg4[%c0_4, %c0_5] : memref<128x256xbf16, #tpu.memory_space<vmem>>, vector<128x256xbf16>
    %cst = arith.constant dense<0.000000e+00> : vector<16x256xf32>
    %6 = tpu.matmul %4, %5, %cst {dimension_numbers = #tpu.dot_dimension_numbers<[1], [0], [0], [1], [0, 0, 1, 1], [], []>} : vector<16x128xbf16>, vector<128x256xbf16>, vector<16x256xf32> -> vector<16x256xf32>
    %7 = arith.addf %3, %6 : vector<16x256xf32>
    %c0_6 = arith.constant 0 : index
    %c0_7 = arith.constant 0 : index
    %8 = vector.load %arg7[%c0_6, %c0_7] : memref<16x256xf32, #tpu.memory_space<vmem>>, vector<16x256xf32>
    tpu.vector_store %arg7[%c0_6, %c0_7], %7 {strides = array<i32>} : memref<16x256xf32, #tpu.memory_space<vmem>>, vector<16x256xf32>,
    %c0_i32_8 = arith.constant 0 : i32
    %9 = arith.cmpi eq, %arg2, %c0_i32_8 : i32
    %10 = arith.extui %9 : i1 to i32
    %c0_i32_9 = arith.constant 0 : i32
    %11 = arith.cmpi ne, %10, %c0_i32_9 : i32
    scf.if %11 {
      %c0_10 = arith.constant 0 : index
      %c0_11 = arith.constant 0 : index
      %12 = vector.load %arg7[%c0_10, %c0_11] : memref<16x256xf32, #tpu.memory_space<vmem>>, vector<16x256xf32>
      %c0_12 = arith.constant 0 : index
      %c0_13 = arith.constant 0 : index
      %13 = vector.load %arg5[%c0_12, %c0_13] : memref<1x256xf32, #tpu.memory_space<vmem>>, vector<1x256xf32>
      %14 = vector.broadcast %13 : vector<1x256xf32> to vector<16x256xf32>
      %15 = arith.addf %12, %14 : vector<16x256xf32>
      %c0_14 = arith.constant 0 : index
      %c0_15 = arith.constant 0 : index
      %16 = vector.load %arg6[%c0_14, %c0_15] : memref<16x256xf32, #tpu.memory_space<vmem>>, vector<16x256xf32>
      tpu.vector_store %arg6[%c0_14, %c0_15], %15 {strides = array<i32>} : memref<16x256xf32, #tpu.memory_space<vmem>>, vector<16x256xf32>,
    } else {
    }
    return
  }
  func.func @transform_0(%arg0: i32, %arg1: i32, %arg2: i32) -> (i32, i32) {
    %c0_i32 = arith.constant 0 : i32
    return %arg0, %arg2 : i32, i32
  }
  func.func @transform_1(%arg0: i32, %arg1: i32, %arg2: i32) -> (i32, i32) {
    %c0_i32 = arith.constant 0 : i32
    return %arg2, %arg1 : i32, i32
  }
  func.func @transform_2(%arg0: i32, %arg1: i32, %arg2: i32) -> (i32, i32) {
    %c0_i32 = arith.constant 0 : i32
    %c0_i32_0 = arith.constant 0 : i32
    return %c0_i32, %arg1 : i32, i32
  }
  func.func @transform_3(%arg0: i32, %arg1: i32, %arg2: i32) -> (i32, i32) {
    %c0_i32 = arith.constant 0 : i32
    return %arg0, %arg1 : i32, i32
  }
}

module attributes {stable_mosaic.version = 11 : i64} {
  func.func @_mha_flash_kernel(%arg0: i32, %arg1: i32, %arg2: i32, %arg3: memref<1x8x128xbf16, #tpu.memory_space<vmem>>, %arg4: memref<1x8x128xbf16, #tpu.memory_space<vmem>>, %arg5: memref<1x8x128xbf16, #tpu.memory_space<vmem>>, %arg6: memref<1x8x128xbf16, #tpu.memory_space<vmem>>, %arg7: memref<1x1x8xf32, #tpu.memory_space<vmem>>, %arg8: memref<128x128xbf16, #tpu.memory_space<vmem>>, %arg9: memref<1x128xf32, #tpu.memory_space<vmem>>, %arg10: memref<1x128xf32, #tpu.memory_space<vmem>>, %arg11: memref<1x128xf32, #tpu.memory_space<vmem>>, %arg12: memref<1x8x128xbf16, #tpu.memory_space<vmem>>, %arg13: memref<4x8x1xf32, #tpu.memory_space<vmem>>, %arg14: memref<4x8x1xf32, #tpu.memory_space<vmem>>, %arg15: memref<8x128xf32, #tpu.memory_space<vmem>>) attributes {dimension_semantics = [#tpu.dimension_semantics<parallel>, #tpu.dimension_semantics<parallel>, #tpu.dimension_semantics<arbitrary>], iteration_bounds = array<i64: 2, 1, 1>, scalar_prefetch = 0 : i64, scratch_operands = 3 : i64, tpu.core_type = #tpu.core_type<tc>, window_params = [{transform_indices = @transform_0, window_bounds = array<i64: 1, 8, 128>}, {transform_indices = @transform_1, window_bounds = array<i64: 1, 8, 128>}, {transform_indices = @transform_2, window_bounds = array<i64: 1, 8, 128>}, {transform_indices = @transform_3, window_bounds = array<i64: 1, 8, 128>}, {transform_indices = @transform_4, window_bounds = array<i64: 1, 1, 8>}, {pipeline_mode = #tpu.pipeline_mode<synchronous>, transform_indices = @transform_5, window_bounds = array<i64: 128, 128>}, {pipeline_mode = #tpu.pipeline_mode<synchronous>, transform_indices = @transform_6, window_bounds = array<i64: 1, 128>}, {pipeline_mode = #tpu.pipeline_mode<synchronous>, transform_indices = @transform_7, window_bounds = array<i64: 1, 128>}, {pipeline_mode = #tpu.pipeline_mode<synchronous>, transform_indices = @transform_8, window_bounds = array<i64: 1, 128>}, {transform_indices = @transform_9, window_bounds = array<i64: 1, 8, 128>}]} {
    %c0_i32 = arith.constant 0 : i32
    %0 = arith.cmpi eq, %arg2, %c0_i32 : i32
    %1 = arith.extui %0 : i1 to i32
    %c0_i32_0 = arith.constant 0 : i32
    %2 = arith.cmpi ne, %1, %c0_i32_0 : i32
    scf.if %2 {
      %cst_91 = arith.constant -1.000000e+30 : f32
      %162 = vector.broadcast %cst_91 : f32 to vector<4x8x1xf32>
      %c0_92 = arith.constant 0 : index
      %c0_93 = arith.constant 0 : index
      %c0_94 = arith.constant 0 : index
      %163 = vector.load %arg13[%c0_92, %c0_93, %c0_94] : memref<4x8x1xf32, #tpu.memory_space<vmem>>, vector<4x8x1xf32>
      tpu.vector_store %arg13[%c0_92, %c0_93, %c0_94], %162 {strides = array<i32>} : memref<4x8x1xf32, #tpu.memory_space<vmem>>, vector<4x8x1xf32>,
      %cst_95 = arith.constant 0.000000e+00 : f32
      %164 = vector.broadcast %cst_95 : f32 to vector<4x8x1xf32>
      %c0_96 = arith.constant 0 : index
      %c0_97 = arith.constant 0 : index
      %c0_98 = arith.constant 0 : index
      %165 = vector.load %arg14[%c0_96, %c0_97, %c0_98] : memref<4x8x1xf32, #tpu.memory_space<vmem>>, vector<4x8x1xf32>
      tpu.vector_store %arg14[%c0_96, %c0_97, %c0_98], %164 {strides = array<i32>} : memref<4x8x1xf32, #tpu.memory_space<vmem>>, vector<4x8x1xf32>,
      %cst_99 = arith.constant 0.000000e+00 : f32
      %166 = vector.broadcast %cst_99 : f32 to vector<8x128xf32>
      %c0_100 = arith.constant 0 : index
      %c0_101 = arith.constant 0 : index
      %167 = vector.load %arg15[%c0_100, %c0_101] : memref<8x128xf32, #tpu.memory_space<vmem>>, vector<8x128xf32>
      tpu.vector_store %arg15[%c0_100, %c0_101], %166 {strides = array<i32>} : memref<8x128xf32, #tpu.memory_space<vmem>>, vector<8x128xf32>,
    } else {
    }
    %c0 = arith.constant 0 : index
    %c0_1 = arith.constant 0 : index
    %c0_2 = arith.constant 0 : index
    %3 = vector.load %arg4[%c0, %c0_1, %c0_2] : memref<1x8x128xbf16, #tpu.memory_space<vmem>>, vector<1x8x128xbf16>
    %4 = vector.shape_cast %3 : vector<1x8x128xbf16> to vector<8x128xbf16>
    %c0_3 = arith.constant 0 : index
    %c0_4 = arith.constant 0 : index
    %c0_5 = arith.constant 0 : index
    %5 = vector.load %arg5[%c0_3, %c0_4, %c0_5] : memref<1x8x128xbf16, #tpu.memory_space<vmem>>, vector<1x8x128xbf16>
    %6 = vector.shape_cast %5 : vector<1x8x128xbf16> to vector<8x128xbf16>
    %c0_6 = arith.constant 0 : index
    %c0_7 = arith.constant 0 : index
    %c0_8 = arith.constant 0 : index
    %7 = vector.load %arg6[%c0_6, %c0_7, %c0_8] : memref<1x8x128xbf16, #tpu.memory_space<vmem>>, vector<1x8x128xbf16>
    %8 = vector.shape_cast %7 : vector<1x8x128xbf16> to vector<8x128xbf16>
    %c0_9 = arith.constant 0 : index
    %c0_10 = arith.constant 0 : index
    %c0_11 = arith.constant 0 : index
    %9 = vector.load %arg7[%c0_9, %c0_10, %c0_11] : memref<1x1x8xf32, #tpu.memory_space<vmem>>, vector<1x1x8xf32>
    %10 = vector.shape_cast %9 : vector<1x1x8xf32> to vector<1x8xf32>
    %11 = vector.extract_strided_slice %4 {offsets = [0, 0], sizes = [8, 32], strides = [1, 1]} : vector<8x128xbf16> to vector<8x32xbf16>
    %12 = vector.extract_strided_slice %6 {offsets = [0, 0], sizes = [8, 32], strides = [1, 1]} : vector<8x128xbf16> to vector<8x32xbf16>
    %13 = vector.extract_strided_slice %8 {offsets = [0, 0], sizes = [8, 32], strides = [1, 1]} : vector<8x128xbf16> to vector<8x32xbf16>
    %cst = arith.constant dense<0.000000e+00> : vector<8x8xf32>
    %14 = tpu.matmul %11, %12, %cst {dimension_numbers = #tpu.dot_dimension_numbers<[1], [1], [0], [0], [0, 0, 1, 0], [], []>} : vector<8x32xbf16>, vector<8x32xbf16>, vector<8x8xf32> -> vector<8x8xf32>
    %cst_12 = arith.constant 0.176776692 : f32
    %15 = vector.broadcast %cst_12 : f32 to vector<8x8xf32>
    %16 = arith.mulf %14, %15 : vector<8x8xf32>
    %17 = vector.broadcast %10 : vector<1x8xf32> to vector<8x8xf32>
    %18 = arith.addf %16, %17 : vector<8x8xf32>
    %c0_13 = arith.constant 0 : index
    %c0_14 = arith.constant 0 : index
    %c0_15 = arith.constant 0 : index
    %19 = vector.load %arg13[%c0_13, %c0_14, %c0_15] : memref<4x8x1xf32, #tpu.memory_space<vmem>>, vector<1x8x1xf32>
    %20 = vector.shape_cast %19 : vector<1x8x1xf32> to vector<8x1xf32>
    %cst_16 = arith.constant dense<0xFF800000> : vector<8xf32>
    %21 = vector.multi_reduction <maximumf>, %18, %cst_16 [1] : vector<8x8xf32> to vector<8xf32>
    %22 = vector.shape_cast %21 : vector<8xf32> to vector<8x1xf32>
    %23 = arith.maximumf %20, %22 : vector<8x1xf32>
    %24 = arith.subf %20, %23 : vector<8x1xf32>
    %25 = math.exp %24 : vector<8x1xf32>
    %26 = vector.broadcast %23 : vector<8x1xf32> to vector<8x8xf32>
    %27 = arith.subf %18, %26 : vector<8x8xf32>
    %28 = math.exp %27 : vector<8x8xf32>
    %c0_17 = arith.constant 0 : index
    %c0_18 = arith.constant 0 : index
    %c0_19 = arith.constant 0 : index
    %29 = vector.load %arg14[%c0_17, %c0_18, %c0_19] : memref<4x8x1xf32, #tpu.memory_space<vmem>>, vector<1x8x1xf32>
    %30 = vector.shape_cast %29 : vector<1x8x1xf32> to vector<8x1xf32>
    %31 = arith.mulf %25, %30 : vector<8x1xf32>
    %cst_20 = arith.constant dense<0.000000e+00> : vector<8xf32>
    %32 = vector.multi_reduction <add>, %28, %cst_20 [1] : vector<8x8xf32> to vector<8xf32>
    %33 = vector.shape_cast %32 : vector<8xf32> to vector<8x1xf32>
    %34 = arith.addf %31, %33 : vector<8x1xf32>
    %c0_21 = arith.constant 0 : index
    %c0_22 = arith.constant 0 : index
    %c0_23 = arith.constant 0 : index
    %35 = vector.load %arg14[%c0_21, %c0_22, %c0_23] : memref<4x8x1xf32, #tpu.memory_space<vmem>>, vector<1x8x1xf32>
    %36 = vector.shape_cast %35 : vector<1x8x1xf32> to vector<8x1xf32>
    %37 = vector.shape_cast %34 : vector<8x1xf32> to vector<1x8x1xf32>
    tpu.vector_store %arg14[%c0_21, %c0_22, %c0_23], %37 {strides = array<i32>} : memref<4x8x1xf32, #tpu.memory_space<vmem>>, vector<1x8x1xf32>,
    %c0_24 = arith.constant 0 : index
    %c0_25 = arith.constant 0 : index
    %38 = vector.load %arg15[%c0_24, %c0_25] : memref<8x128xf32, #tpu.memory_space<vmem>>, vector<8x32xf32>
    %39 = vector.broadcast %25 : vector<8x1xf32> to vector<8x32xf32>
    %40 = arith.mulf %39, %38 : vector<8x32xf32>
    %41 = arith.truncf %28 : vector<8x8xf32> to vector<8x8xbf16>
    %cst_26 = arith.constant dense<0.000000e+00> : vector<8x32xf32>
    %42 = tpu.matmul %41, %13, %cst_26 {dimension_numbers = #tpu.dot_dimension_numbers<[1], [0], [0], [1], [0, 0, 1, 1], [], []>} : vector<8x8xbf16>, vector<8x32xbf16>, vector<8x32xf32> -> vector<8x32xf32>
    %43 = arith.addf %40, %42 : vector<8x32xf32>
    %c0_27 = arith.constant 0 : index
    %c0_28 = arith.constant 0 : index
    %44 = vector.load %arg15[%c0_27, %c0_28] : memref<8x128xf32, #tpu.memory_space<vmem>>, vector<8x32xf32>
    tpu.vector_store %arg15[%c0_27, %c0_28], %43 {strides = array<i32>} : memref<8x128xf32, #tpu.memory_space<vmem>>, vector<8x32xf32>,
    %c0_29 = arith.constant 0 : index
    %c0_30 = arith.constant 0 : index
    %c0_31 = arith.constant 0 : index
    %45 = vector.load %arg13[%c0_29, %c0_30, %c0_31] : memref<4x8x1xf32, #tpu.memory_space<vmem>>, vector<1x8x1xf32>
    %46 = vector.shape_cast %45 : vector<1x8x1xf32> to vector<8x1xf32>
    %47 = vector.shape_cast %23 : vector<8x1xf32> to vector<1x8x1xf32>
    tpu.vector_store %arg13[%c0_29, %c0_30, %c0_31], %47 {strides = array<i32>} : memref<4x8x1xf32, #tpu.memory_space<vmem>>, vector<1x8x1xf32>,
    %48 = vector.extract_strided_slice %4 {offsets = [0, 32], sizes = [8, 32], strides = [1, 1]} : vector<8x128xbf16> to vector<8x32xbf16>
    %49 = vector.extract_strided_slice %6 {offsets = [0, 32], sizes = [8, 32], strides = [1, 1]} : vector<8x128xbf16> to vector<8x32xbf16>
    %50 = vector.extract_strided_slice %8 {offsets = [0, 32], sizes = [8, 32], strides = [1, 1]} : vector<8x128xbf16> to vector<8x32xbf16>
    %cst_32 = arith.constant dense<0.000000e+00> : vector<8x8xf32>
    %51 = tpu.matmul %48, %49, %cst_32 {dimension_numbers = #tpu.dot_dimension_numbers<[1], [1], [0], [0], [0, 0, 1, 0], [], []>} : vector<8x32xbf16>, vector<8x32xbf16>, vector<8x8xf32> -> vector<8x8xf32>
    %cst_33 = arith.constant 0.176776692 : f32
    %52 = vector.broadcast %cst_33 : f32 to vector<8x8xf32>
    %53 = arith.mulf %51, %52 : vector<8x8xf32>
    %54 = vector.broadcast %10 : vector<1x8xf32> to vector<8x8xf32>
    %55 = arith.addf %53, %54 : vector<8x8xf32>
    %c1 = arith.constant 1 : index
    %c0_34 = arith.constant 0 : index
    %c0_35 = arith.constant 0 : index
    %56 = vector.load %arg13[%c1, %c0_34, %c0_35] : memref<4x8x1xf32, #tpu.memory_space<vmem>>, vector<1x8x1xf32>
    %57 = vector.shape_cast %56 : vector<1x8x1xf32> to vector<8x1xf32>
    %cst_36 = arith.constant dense<0xFF800000> : vector<8xf32>
    %58 = vector.multi_reduction <maximumf>, %55, %cst_36 [1] : vector<8x8xf32> to vector<8xf32>
    %59 = vector.shape_cast %58 : vector<8xf32> to vector<8x1xf32>
    %60 = arith.maximumf %57, %59 : vector<8x1xf32>
    %61 = arith.subf %57, %60 : vector<8x1xf32>
    %62 = math.exp %61 : vector<8x1xf32>
    %63 = vector.broadcast %60 : vector<8x1xf32> to vector<8x8xf32>
    %64 = arith.subf %55, %63 : vector<8x8xf32>
    %65 = math.exp %64 : vector<8x8xf32>
    %c1_37 = arith.constant 1 : index
    %c0_38 = arith.constant 0 : index
    %c0_39 = arith.constant 0 : index
    %66 = vector.load %arg14[%c1_37, %c0_38, %c0_39] : memref<4x8x1xf32, #tpu.memory_space<vmem>>, vector<1x8x1xf32>
    %67 = vector.shape_cast %66 : vector<1x8x1xf32> to vector<8x1xf32>
    %68 = arith.mulf %62, %67 : vector<8x1xf32>
    %cst_40 = arith.constant dense<0.000000e+00> : vector<8xf32>
    %69 = vector.multi_reduction <add>, %65, %cst_40 [1] : vector<8x8xf32> to vector<8xf32>
    %70 = vector.shape_cast %69 : vector<8xf32> to vector<8x1xf32>
    %71 = arith.addf %68, %70 : vector<8x1xf32>
    %c1_41 = arith.constant 1 : index
    %c0_42 = arith.constant 0 : index
    %c0_43 = arith.constant 0 : index
    %72 = vector.load %arg14[%c1_41, %c0_42, %c0_43] : memref<4x8x1xf32, #tpu.memory_space<vmem>>, vector<1x8x1xf32>
    %73 = vector.shape_cast %72 : vector<1x8x1xf32> to vector<8x1xf32>
    %74 = vector.shape_cast %71 : vector<8x1xf32> to vector<1x8x1xf32>
    tpu.vector_store %arg14[%c1_41, %c0_42, %c0_43], %74 {strides = array<i32>} : memref<4x8x1xf32, #tpu.memory_space<vmem>>, vector<1x8x1xf32>,
    %c0_44 = arith.constant 0 : index
    %c32 = arith.constant 32 : index
    %75 = vector.load %arg15[%c0_44, %c32] : memref<8x128xf32, #tpu.memory_space<vmem>>, vector<8x32xf32>
    %76 = vector.broadcast %62 : vector<8x1xf32> to vector<8x32xf32>
    %77 = arith.mulf %76, %75 : vector<8x32xf32>
    %78 = arith.truncf %65 : vector<8x8xf32> to vector<8x8xbf16>
    %cst_45 = arith.constant dense<0.000000e+00> : vector<8x32xf32>
    %79 = tpu.matmul %78, %50, %cst_45 {dimension_numbers = #tpu.dot_dimension_numbers<[1], [0], [0], [1], [0, 0, 1, 1], [], []>} : vector<8x8xbf16>, vector<8x32xbf16>, vector<8x32xf32> -> vector<8x32xf32>
    %80 = arith.addf %77, %79 : vector<8x32xf32>
    %c0_46 = arith.constant 0 : index
    %c32_47 = arith.constant 32 : index
    %81 = vector.load %arg15[%c0_46, %c32_47] : memref<8x128xf32, #tpu.memory_space<vmem>>, vector<8x32xf32>
    tpu.vector_store %arg15[%c0_46, %c32_47], %80 {strides = array<i32>} : memref<8x128xf32, #tpu.memory_space<vmem>>, vector<8x32xf32>,
    %c1_48 = arith.constant 1 : index
    %c0_49 = arith.constant 0 : index
    %c0_50 = arith.constant 0 : index
    %82 = vector.load %arg13[%c1_48, %c0_49, %c0_50] : memref<4x8x1xf32, #tpu.memory_space<vmem>>, vector<1x8x1xf32>
    %83 = vector.shape_cast %82 : vector<1x8x1xf32> to vector<8x1xf32>
    %84 = vector.shape_cast %60 : vector<8x1xf32> to vector<1x8x1xf32>
    tpu.vector_store %arg13[%c1_48, %c0_49, %c0_50], %84 {strides = array<i32>} : memref<4x8x1xf32, #tpu.memory_space<vmem>>, vector<1x8x1xf32>,
    %85 = vector.extract_strided_slice %4 {offsets = [0, 64], sizes = [8, 32], strides = [1, 1]} : vector<8x128xbf16> to vector<8x32xbf16>
    %86 = vector.extract_strided_slice %6 {offsets = [0, 64], sizes = [8, 32], strides = [1, 1]} : vector<8x128xbf16> to vector<8x32xbf16>
    %87 = vector.extract_strided_slice %8 {offsets = [0, 64], sizes = [8, 32], strides = [1, 1]} : vector<8x128xbf16> to vector<8x32xbf16>
    %cst_51 = arith.constant dense<0.000000e+00> : vector<8x8xf32>
    %88 = tpu.matmul %85, %86, %cst_51 {dimension_numbers = #tpu.dot_dimension_numbers<[1], [1], [0], [0], [0, 0, 1, 0], [], []>} : vector<8x32xbf16>, vector<8x32xbf16>, vector<8x8xf32> -> vector<8x8xf32>
    %cst_52 = arith.constant 0.176776692 : f32
    %89 = vector.broadcast %cst_52 : f32 to vector<8x8xf32>
    %90 = arith.mulf %88, %89 : vector<8x8xf32>
    %91 = vector.broadcast %10 : vector<1x8xf32> to vector<8x8xf32>
    %92 = arith.addf %90, %91 : vector<8x8xf32>
    %c2 = arith.constant 2 : index
    %c0_53 = arith.constant 0 : index
    %c0_54 = arith.constant 0 : index
    %93 = vector.load %arg13[%c2, %c0_53, %c0_54] : memref<4x8x1xf32, #tpu.memory_space<vmem>>, vector<1x8x1xf32>
    %94 = vector.shape_cast %93 : vector<1x8x1xf32> to vector<8x1xf32>
    %cst_55 = arith.constant dense<0xFF800000> : vector<8xf32>
    %95 = vector.multi_reduction <maximumf>, %92, %cst_55 [1] : vector<8x8xf32> to vector<8xf32>
    %96 = vector.shape_cast %95 : vector<8xf32> to vector<8x1xf32>
    %97 = arith.maximumf %94, %96 : vector<8x1xf32>
    %98 = arith.subf %94, %97 : vector<8x1xf32>
    %99 = math.exp %98 : vector<8x1xf32>
    %100 = vector.broadcast %97 : vector<8x1xf32> to vector<8x8xf32>
    %101 = arith.subf %92, %100 : vector<8x8xf32>
    %102 = math.exp %101 : vector<8x8xf32>
    %c2_56 = arith.constant 2 : index
    %c0_57 = arith.constant 0 : index
    %c0_58 = arith.constant 0 : index
    %103 = vector.load %arg14[%c2_56, %c0_57, %c0_58] : memref<4x8x1xf32, #tpu.memory_space<vmem>>, vector<1x8x1xf32>
    %104 = vector.shape_cast %103 : vector<1x8x1xf32> to vector<8x1xf32>
    %105 = arith.mulf %99, %104 : vector<8x1xf32>
    %cst_59 = arith.constant dense<0.000000e+00> : vector<8xf32>
    %106 = vector.multi_reduction <add>, %102, %cst_59 [1] : vector<8x8xf32> to vector<8xf32>
    %107 = vector.shape_cast %106 : vector<8xf32> to vector<8x1xf32>
    %108 = arith.addf %105, %107 : vector<8x1xf32>
    %c2_60 = arith.constant 2 : index
    %c0_61 = arith.constant 0 : index
    %c0_62 = arith.constant 0 : index
    %109 = vector.load %arg14[%c2_60, %c0_61, %c0_62] : memref<4x8x1xf32, #tpu.memory_space<vmem>>, vector<1x8x1xf32>
    %110 = vector.shape_cast %109 : vector<1x8x1xf32> to vector<8x1xf32>
    %111 = vector.shape_cast %108 : vector<8x1xf32> to vector<1x8x1xf32>
    tpu.vector_store %arg14[%c2_60, %c0_61, %c0_62], %111 {strides = array<i32>} : memref<4x8x1xf32, #tpu.memory_space<vmem>>, vector<1x8x1xf32>,
    %c0_63 = arith.constant 0 : index
    %c64 = arith.constant 64 : index
    %112 = vector.load %arg15[%c0_63, %c64] : memref<8x128xf32, #tpu.memory_space<vmem>>, vector<8x32xf32>
    %113 = vector.broadcast %99 : vector<8x1xf32> to vector<8x32xf32>
    %114 = arith.mulf %113, %112 : vector<8x32xf32>
    %115 = arith.truncf %102 : vector<8x8xf32> to vector<8x8xbf16>
    %cst_64 = arith.constant dense<0.000000e+00> : vector<8x32xf32>
    %116 = tpu.matmul %115, %87, %cst_64 {dimension_numbers = #tpu.dot_dimension_numbers<[1], [0], [0], [1], [0, 0, 1, 1], [], []>} : vector<8x8xbf16>, vector<8x32xbf16>, vector<8x32xf32> -> vector<8x32xf32>
    %117 = arith.addf %114, %116 : vector<8x32xf32>
    %c0_65 = arith.constant 0 : index
    %c64_66 = arith.constant 64 : index
    %118 = vector.load %arg15[%c0_65, %c64_66] : memref<8x128xf32, #tpu.memory_space<vmem>>, vector<8x32xf32>
    tpu.vector_store %arg15[%c0_65, %c64_66], %117 {strides = array<i32>} : memref<8x128xf32, #tpu.memory_space<vmem>>, vector<8x32xf32>,
    %c2_67 = arith.constant 2 : index
    %c0_68 = arith.constant 0 : index
    %c0_69 = arith.constant 0 : index
    %119 = vector.load %arg13[%c2_67, %c0_68, %c0_69] : memref<4x8x1xf32, #tpu.memory_space<vmem>>, vector<1x8x1xf32>
    %120 = vector.shape_cast %119 : vector<1x8x1xf32> to vector<8x1xf32>
    %121 = vector.shape_cast %97 : vector<8x1xf32> to vector<1x8x1xf32>
    tpu.vector_store %arg13[%c2_67, %c0_68, %c0_69], %121 {strides = array<i32>} : memref<4x8x1xf32, #tpu.memory_space<vmem>>, vector<1x8x1xf32>,
    %122 = vector.extract_strided_slice %4 {offsets = [0, 96], sizes = [8, 32], strides = [1, 1]} : vector<8x128xbf16> to vector<8x32xbf16>
    %123 = vector.extract_strided_slice %6 {offsets = [0, 96], sizes = [8, 32], strides = [1, 1]} : vector<8x128xbf16> to vector<8x32xbf16>
    %124 = vector.extract_strided_slice %8 {offsets = [0, 96], sizes = [8, 32], strides = [1, 1]} : vector<8x128xbf16> to vector<8x32xbf16>
    %cst_70 = arith.constant dense<0.000000e+00> : vector<8x8xf32>
    %125 = tpu.matmul %122, %123, %cst_70 {dimension_numbers = #tpu.dot_dimension_numbers<[1], [1], [0], [0], [0, 0, 1, 0], [], []>} : vector<8x32xbf16>, vector<8x32xbf16>, vector<8x8xf32> -> vector<8x8xf32>
    %cst_71 = arith.constant 0.176776692 : f32
    %126 = vector.broadcast %cst_71 : f32 to vector<8x8xf32>
    %127 = arith.mulf %125, %126 : vector<8x8xf32>
    %128 = vector.broadcast %10 : vector<1x8xf32> to vector<8x8xf32>
    %129 = arith.addf %127, %128 : vector<8x8xf32>
    %c3 = arith.constant 3 : index
    %c0_72 = arith.constant 0 : index
    %c0_73 = arith.constant 0 : index
    %130 = vector.load %arg13[%c3, %c0_72, %c0_73] : memref<4x8x1xf32, #tpu.memory_space<vmem>>, vector<1x8x1xf32>
    %131 = vector.shape_cast %130 : vector<1x8x1xf32> to vector<8x1xf32>
    %cst_74 = arith.constant dense<0xFF800000> : vector<8xf32>
    %132 = vector.multi_reduction <maximumf>, %129, %cst_74 [1] : vector<8x8xf32> to vector<8xf32>
    %133 = vector.shape_cast %132 : vector<8xf32> to vector<8x1xf32>
    %134 = arith.maximumf %131, %133 : vector<8x1xf32>
    %135 = arith.subf %131, %134 : vector<8x1xf32>
    %136 = math.exp %135 : vector<8x1xf32>
    %137 = vector.broadcast %134 : vector<8x1xf32> to vector<8x8xf32>
    %138 = arith.subf %129, %137 : vector<8x8xf32>
    %139 = math.exp %138 : vector<8x8xf32>
    %c3_75 = arith.constant 3 : index
    %c0_76 = arith.constant 0 : index
    %c0_77 = arith.constant 0 : index
    %140 = vector.load %arg14[%c3_75, %c0_76, %c0_77] : memref<4x8x1xf32, #tpu.memory_space<vmem>>, vector<1x8x1xf32>
    %141 = vector.shape_cast %140 : vector<1x8x1xf32> to vector<8x1xf32>
    %142 = arith.mulf %136, %141 : vector<8x1xf32>
    %cst_78 = arith.constant dense<0.000000e+00> : vector<8xf32>
    %143 = vector.multi_reduction <add>, %139, %cst_78 [1] : vector<8x8xf32> to vector<8xf32>
    %144 = vector.shape_cast %143 : vector<8xf32> to vector<8x1xf32>
    %145 = arith.addf %142, %144 : vector<8x1xf32>
    %c3_79 = arith.constant 3 : index
    %c0_80 = arith.constant 0 : index
    %c0_81 = arith.constant 0 : index
    %146 = vector.load %arg14[%c3_79, %c0_80, %c0_81] : memref<4x8x1xf32, #tpu.memory_space<vmem>>, vector<1x8x1xf32>
    %147 = vector.shape_cast %146 : vector<1x8x1xf32> to vector<8x1xf32>
    %148 = vector.shape_cast %145 : vector<8x1xf32> to vector<1x8x1xf32>
    tpu.vector_store %arg14[%c3_79, %c0_80, %c0_81], %148 {strides = array<i32>} : memref<4x8x1xf32, #tpu.memory_space<vmem>>, vector<1x8x1xf32>,
    %c0_82 = arith.constant 0 : index
    %c96 = arith.constant 96 : index
    %149 = vector.load %arg15[%c0_82, %c96] : memref<8x128xf32, #tpu.memory_space<vmem>>, vector<8x32xf32>
    %150 = vector.broadcast %136 : vector<8x1xf32> to vector<8x32xf32>
    %151 = arith.mulf %150, %149 : vector<8x32xf32>
    %152 = arith.truncf %139 : vector<8x8xf32> to vector<8x8xbf16>
    %cst_83 = arith.constant dense<0.000000e+00> : vector<8x32xf32>
    %153 = tpu.matmul %152, %124, %cst_83 {dimension_numbers = #tpu.dot_dimension_numbers<[1], [0], [0], [1], [0, 0, 1, 1], [], []>} : vector<8x8xbf16>, vector<8x32xbf16>, vector<8x32xf32> -> vector<8x32xf32>
    %154 = arith.addf %151, %153 : vector<8x32xf32>
    %c0_84 = arith.constant 0 : index
    %c96_85 = arith.constant 96 : index
    %155 = vector.load %arg15[%c0_84, %c96_85] : memref<8x128xf32, #tpu.memory_space<vmem>>, vector<8x32xf32>
    tpu.vector_store %arg15[%c0_84, %c96_85], %154 {strides = array<i32>} : memref<8x128xf32, #tpu.memory_space<vmem>>, vector<8x32xf32>,
    %c3_86 = arith.constant 3 : index
    %c0_87 = arith.constant 0 : index
    %c0_88 = arith.constant 0 : index
    %156 = vector.load %arg13[%c3_86, %c0_87, %c0_88] : memref<4x8x1xf32, #tpu.memory_space<vmem>>, vector<1x8x1xf32>
    %157 = vector.shape_cast %156 : vector<1x8x1xf32> to vector<8x1xf32>
    %158 = vector.shape_cast %134 : vector<8x1xf32> to vector<1x8x1xf32>
    tpu.vector_store %arg13[%c3_86, %c0_87, %c0_88], %158 {strides = array<i32>} : memref<4x8x1xf32, #tpu.memory_space<vmem>>, vector<1x8x1xf32>,
    %c0_i32_89 = arith.constant 0 : i32
    %159 = arith.cmpi eq, %arg2, %c0_i32_89 : i32
    %160 = arith.extui %159 : i1 to i32
    %c0_i32_90 = arith.constant 0 : i32
    %161 = arith.cmpi ne, %160, %c0_i32_90 : i32
    scf.if %161 {
      %c0_91 = arith.constant 0 : index
      %c0_92 = arith.constant 0 : index
      %c0_93 = arith.constant 0 : index
      %162 = vector.load %arg14[%c0_91, %c0_92, %c0_93] : memref<4x8x1xf32, #tpu.memory_space<vmem>>, vector<1x8x1xf32>
      %163 = vector.shape_cast %162 : vector<1x8x1xf32> to vector<8x1xf32>
      %164 = tpu.reciprocal %163 {approx = true} : vector<8x1xf32> -> vector<8x1xf32>
      %c0_94 = arith.constant 0 : index
      %c0_95 = arith.constant 0 : index
      %165 = vector.load %arg15[%c0_94, %c0_95] : memref<8x128xf32, #tpu.memory_space<vmem>>, vector<8x32xf32>
      %166 = vector.broadcast %164 : vector<8x1xf32> to vector<8x32xf32>
      %167 = arith.mulf %165, %166 : vector<8x32xf32>
      %c0_96 = arith.constant 0 : index
      %c0_97 = arith.constant 0 : index
      %168 = vector.load %arg15[%c0_96, %c0_97] : memref<8x128xf32, #tpu.memory_space<vmem>>, vector<8x32xf32>
      tpu.vector_store %arg15[%c0_96, %c0_97], %167 {strides = array<i32>} : memref<8x128xf32, #tpu.memory_space<vmem>>, vector<8x32xf32>,
      %c1_98 = arith.constant 1 : index
      %c0_99 = arith.constant 0 : index
      %c0_100 = arith.constant 0 : index
      %169 = vector.load %arg14[%c1_98, %c0_99, %c0_100] : memref<4x8x1xf32, #tpu.memory_space<vmem>>, vector<1x8x1xf32>
      %170 = vector.shape_cast %169 : vector<1x8x1xf32> to vector<8x1xf32>
      %171 = tpu.reciprocal %170 {approx = true} : vector<8x1xf32> -> vector<8x1xf32>
      %c0_101 = arith.constant 0 : index
      %c32_102 = arith.constant 32 : index
      %172 = vector.load %arg15[%c0_101, %c32_102] : memref<8x128xf32, #tpu.memory_space<vmem>>, vector<8x32xf32>
      %173 = vector.broadcast %171 : vector<8x1xf32> to vector<8x32xf32>
      %174 = arith.mulf %172, %173 : vector<8x32xf32>
      %c0_103 = arith.constant 0 : index
      %c32_104 = arith.constant 32 : index
      %175 = vector.load %arg15[%c0_103, %c32_104] : memref<8x128xf32, #tpu.memory_space<vmem>>, vector<8x32xf32>
      tpu.vector_store %arg15[%c0_103, %c32_104], %174 {strides = array<i32>} : memref<8x128xf32, #tpu.memory_space<vmem>>, vector<8x32xf32>,
      %c2_105 = arith.constant 2 : index
      %c0_106 = arith.constant 0 : index
      %c0_107 = arith.constant 0 : index
      %176 = vector.load %arg14[%c2_105, %c0_106, %c0_107] : memref<4x8x1xf32, #tpu.memory_space<vmem>>, vector<1x8x1xf32>
      %177 = vector.shape_cast %176 : vector<1x8x1xf32> to vector<8x1xf32>
      %178 = tpu.reciprocal %177 {approx = true} : vector<8x1xf32> -> vector<8x1xf32>
      %c0_108 = arith.constant 0 : index
      %c64_109 = arith.constant 64 : index
      %179 = vector.load %arg15[%c0_108, %c64_109] : memref<8x128xf32, #tpu.memory_space<vmem>>, vector<8x32xf32>
      %180 = vector.broadcast %178 : vector<8x1xf32> to vector<8x32xf32>
      %181 = arith.mulf %179, %180 : vector<8x32xf32>
      %c0_110 = arith.constant 0 : index
      %c64_111 = arith.constant 64 : index
      %182 = vector.load %arg15[%c0_110, %c64_111] : memref<8x128xf32, #tpu.memory_space<vmem>>, vector<8x32xf32>
      tpu.vector_store %arg15[%c0_110, %c64_111], %181 {strides = array<i32>} : memref<8x128xf32, #tpu.memory_space<vmem>>, vector<8x32xf32>,
      %c3_112 = arith.constant 3 : index
      %c0_113 = arith.constant 0 : index
      %c0_114 = arith.constant 0 : index
      %183 = vector.load %arg14[%c3_112, %c0_113, %c0_114] : memref<4x8x1xf32, #tpu.memory_space<vmem>>, vector<1x8x1xf32>
      %184 = vector.shape_cast %183 : vector<1x8x1xf32> to vector<8x1xf32>
      %185 = tpu.reciprocal %184 {approx = true} : vector<8x1xf32> -> vector<8x1xf32>
      %c0_115 = arith.constant 0 : index
      %c96_116 = arith.constant 96 : index
      %186 = vector.load %arg15[%c0_115, %c96_116] : memref<8x128xf32, #tpu.memory_space<vmem>>, vector<8x32xf32>
      %187 = vector.broadcast %185 : vector<8x1xf32> to vector<8x32xf32>
      %188 = arith.mulf %186, %187 : vector<8x32xf32>
      %c0_117 = arith.constant 0 : index
      %c96_118 = arith.constant 96 : index
      %189 = vector.load %arg15[%c0_117, %c96_118] : memref<8x128xf32, #tpu.memory_space<vmem>>, vector<8x32xf32>
      tpu.vector_store %arg15[%c0_117, %c96_118], %188 {strides = array<i32>} : memref<8x128xf32, #tpu.memory_space<vmem>>, vector<8x32xf32>,
      %c0_119 = arith.constant 0 : index
      %c0_120 = arith.constant 0 : index
      %190 = vector.load %arg15[%c0_119, %c0_120] : memref<8x128xf32, #tpu.memory_space<vmem>>, vector<8x128xf32>
      %191 = arith.truncf %190 : vector<8x128xf32> to vector<8x128xbf16>
      %c0_121 = arith.constant 0 : index
      %c0_122 = arith.constant 0 : index
      %192 = vector.load %arg8[%c0_121, %c0_122] : memref<128x128xbf16, #tpu.memory_space<vmem>>, vector<128x128xbf16>
      %cst_123 = arith.constant dense<0.000000e+00> : vector<8x128xf32>
      %193 = tpu.matmul %191, %192, %cst_123 {dimension_numbers = #tpu.dot_dimension_numbers<[1], [0], [0], [1], [0, 0, 1, 1], [], []>} : vector<8x128xbf16>, vector<128x128xbf16>, vector<8x128xf32> -> vector<8x128xf32>
      %c0_124 = arith.constant 0 : index
      %c0_125 = arith.constant 0 : index
      %c0_126 = arith.constant 0 : index
      %194 = vector.load %arg3[%c0_124, %c0_125, %c0_126] : memref<1x8x128xbf16, #tpu.memory_space<vmem>>, vector<1x8x128xbf16>
      %195 = vector.shape_cast %194 : vector<1x8x128xbf16> to vector<8x128xbf16>
      %196 = arith.extf %195 : vector<8x128xbf16> to vector<8x128xf32>
      %197 = arith.addf %196, %193 : vector<8x128xf32>
      %c0_127 = arith.constant 0 : index
      %c0_128 = arith.constant 0 : index
      %198 = vector.load %arg9[%c0_127, %c0_128] : memref<1x128xf32, #tpu.memory_space<vmem>>, vector<1x128xf32>
      %199 = vector.broadcast %198 : vector<1x128xf32> to vector<8x128xf32>
      %200 = arith.addf %197, %199 : vector<8x128xf32>
      %cst_129 = arith.constant dense<0.000000e+00> : vector<8xf32>
      %201 = vector.multi_reduction <add>, %200, %cst_129 [1] : vector<8x128xf32> to vector<8xf32>
      %202 = vector.shape_cast %201 : vector<8xf32> to vector<8x1xf32>
      %cst_130 = arith.constant 1.280000e+02 : f32
      %203 = vector.broadcast %cst_130 : f32 to vector<8x1xf32>
      %204 = arith.divf %202, %203 : vector<8x1xf32>
      %205 = vector.broadcast %204 : vector<8x1xf32> to vector<8x128xf32>
      %206 = arith.subf %200, %205 : vector<8x128xf32>
      %207 = arith.mulf %206, %206 : vector<8x128xf32>
      %cst_131 = arith.constant dense<0.000000e+00> : vector<8xf32>
      %208 = vector.multi_reduction <add>, %207, %cst_131 [1] : vector<8x128xf32> to vector<8xf32>
      %209 = vector.shape_cast %208 : vector<8xf32> to vector<8x1xf32>
      %cst_132 = arith.constant 1.280000e+02 : f32
      %210 = vector.broadcast %cst_132 : f32 to vector<8x1xf32>
      %211 = arith.divf %209, %210 : vector<8x1xf32>
      %212 = vector.broadcast %204 : vector<8x1xf32> to vector<8x128xf32>
      %213 = arith.subf %200, %212 : vector<8x128xf32>
      %cst_133 = arith.constant 9.99999974E-6 : f32
      %214 = vector.broadcast %cst_133 : f32 to vector<8x1xf32>
      %215 = arith.addf %211, %214 : vector<8x1xf32>
      %216 = math.rsqrt %215 : vector<8x1xf32>
      %217 = vector.broadcast %216 : vector<8x1xf32> to vector<8x128xf32>
      %218 = arith.mulf %213, %217 : vector<8x128xf32>
      %c0_134 = arith.constant 0 : index
      %c0_135 = arith.constant 0 : index
      %219 = vector.load %arg10[%c0_134, %c0_135] : memref<1x128xf32, #tpu.memory_space<vmem>>, vector<1x128xf32>
      %220 = vector.broadcast %219 : vector<1x128xf32> to vector<8x128xf32>
      %221 = arith.mulf %218, %220 : vector<8x128xf32>
      %c0_136 = arith.constant 0 : index
      %c0_137 = arith.constant 0 : index
      %222 = vector.load %arg11[%c0_136, %c0_137] : memref<1x128xf32, #tpu.memory_space<vmem>>, vector<1x128xf32>
      %223 = vector.broadcast %222 : vector<1x128xf32> to vector<8x128xf32>
      %224 = arith.addf %221, %223 : vector<8x128xf32>
      %225 = arith.truncf %224 : vector<8x128xf32> to vector<8x128xbf16>
      %c0_138 = arith.constant 0 : index
      %c0_139 = arith.constant 0 : index
      %c0_140 = arith.constant 0 : index
      %226 = vector.load %arg12[%c0_138, %c0_139, %c0_140] : memref<1x8x128xbf16, #tpu.memory_space<vmem>>, vector<1x8x128xbf16>
      %227 = vector.shape_cast %226 : vector<1x8x128xbf16> to vector<8x128xbf16>
      %228 = vector.shape_cast %225 : vector<8x128xbf16> to vector<1x8x128xbf16>
      tpu.vector_store %arg12[%c0_138, %c0_139, %c0_140], %228 {strides = array<i32>} : memref<1x8x128xbf16, #tpu.memory_space<vmem>>, vector<1x8x128xbf16>,
    } else {
    }
    return
  }
  func.func @transform_0(%arg0: i32, %arg1: i32, %arg2: i32) -> (i32, i32, i32) {
    %c0_i32 = arith.constant 0 : i32
    %c0_i32_0 = arith.constant 0 : i32
    return %arg0, %arg1, %c0_i32 : i32, i32, i32
  }
  func.func @transform_1(%arg0: i32, %arg1: i32, %arg2: i32) -> (i32, i32, i32) {
    %c0_i32 = arith.constant 0 : i32
    %c0_i32_0 = arith.constant 0 : i32
    return %arg0, %arg1, %c0_i32 : i32, i32, i32
  }
  func.func @transform_2(%arg0: i32, %arg1: i32, %arg2: i32) -> (i32, i32, i32) {
    %c0_i32 = arith.constant 0 : i32
    %c0_i32_0 = arith.constant 0 : i32
    return %arg0, %arg2, %c0_i32 : i32, i32, i32
  }
  func.func @transform_3(%arg0: i32, %arg1: i32, %arg2: i32) -> (i32, i32, i32) {
    %c1_i32 = arith.constant 1 : i32
    %c0_i32 = arith.constant 0 : i32
    return %arg0, %arg2, %c1_i32 : i32, i32, i32
  }
  func.func @transform_4(%arg0: i32, %arg1: i32, %arg2: i32) -> (i32, i32, i32) {
    %c0_i32 = arith.constant 0 : i32
    %c0_i32_0 = arith.constant 0 : i32
    return %arg0, %c0_i32, %arg2 : i32, i32, i32
  }
  func.func @transform_5(%arg0: i32, %arg1: i32, %arg2: i32) -> (i32, i32) {
    %c0_i32 = arith.constant 0 : i32
    %c0_i32_0 = arith.constant 0 : i32
    %c0_i32_1 = arith.constant 0 : i32
    return %c0_i32, %c0_i32_0 : i32, i32
  }
  func.func @transform_6(%arg0: i32, %arg1: i32, %arg2: i32) -> (i32, i32) {
    %c0_i32 = arith.constant 0 : i32
    %c0_i32_0 = arith.constant 0 : i32
    %c0_i32_1 = arith.constant 0 : i32
    return %c0_i32, %c0_i32_0 : i32, i32
  }
  func.func @transform_7(%arg0: i32, %arg1: i32, %arg2: i32) -> (i32, i32) {
    %c0_i32 = arith.constant 0 : i32
    %c0_i32_0 = arith.constant 0 : i32
    %c0_i32_1 = arith.constant 0 : i32
    return %c0_i32, %c0_i32_0 : i32, i32
  }
  func.func @transform_8(%arg0: i32, %arg1: i32, %arg2: i32) -> (i32, i32) {
    %c0_i32 = arith.constant 0 : i32
    %c0_i32_0 = arith.constant 0 : i32
    %c0_i32_1 = arith.constant 0 : i32
    return %c0_i32, %c0_i32_0 : i32, i32
  }
  func.func @transform_9(%arg0: i32, %arg1: i32, %arg2: i32) -> (i32, i32, i32) {
    %c0_i32 = arith.constant 0 : i32
    %c0_i32_0 = arith.constant 0 : i32
    return %arg0, %arg1, %c0_i32 : i32, i32, i32
  }
}

</mosaic_0001>

<bundles_post_ra>
// kernel: transformer_forward.31
= control target key start
LH: loop header
LB: loop body
LE: loop exit
PB: predicated region body
PF: predicated region fallthrough
CT: control target
= control target key end

     0   :  { %s824_s12 = smov 0   ;;  %s826_s13 = smov 0   ;;  %s926_s0 = inlined_call_operand.vmem [shape: bf16[16,128], index: 0, kind: input, shape index: {}]   ;;  %s927_s1 = inlined_call_operand.vmem [shape: bf16[128,384], index: 1, kind: input, shape index: {}]   ;;  %s928_s2 = inlined_call_operand.vmem [shape: f32[1,384], index: 2, kind: input, shape index: {}]   ;;  %s929_s3 = inlined_call_operand.vmem [shape: bf16[16,384], index: 3, kind: output, shape index: {}]  }
   0x1   :  { %s828_s14 = smov 0   ;;  %s830_s15 = smov 0  }
   0x2   :  { %s832_s16 = smov 0  }
   0x3 LB: > { %s28_s17 = sadd.s32 1, %s796_s15  ;;  %s649_s18 = sadd.s32 4294967295, %s800_s16   ;;  %s800_s16 = sphi %s832_s16, %s13_s16   ;;  %s796_s15 = sphi %s830_s15, %s934_s15   ;;  %s792_s14 = sphi %s828_s14, %s933_s14   ;;  %s788_s13 = sphi %s826_s13, %s932_s13   ;;  %s784_s12 = sphi %s824_s12, %s931_s12  }
   0x4   : > { %p30_p0 = scmp.ge.s32.totalorder %s28_s17, 3  ;;  %p76_p1 = scmp.ne.s32.totalorder %s788_s13, %s784_s12 }
   0x5   : > { %p77_p2 = scmp.eq.s32.totalorder %s800_s16, 0  ;;  %p134_p4 = scmp.eq.s32.totalorder %s649_s18, 2 }
   0x6   : > { %s936_s17 = smov (%p30_p0, %s28_s17), 0  ;;  %s69_s20 = sadd.s32 1, %s788_s13 }
   0x7   : > { %p78_p3 = por %p77_p2, %p76_p1  ;;  %s65_s19 = ssub.s32 %s796_s15, %s936_s17 }
   0x8   : > { %p67_p5 = scmp.eq.s32.totalorder %s65_s19, 0  ;;  %p859_p6 = por %p134_p4, %p76_p1 }
   0x9   : > { %p653_p7 = scmp.ge.s32.totalorder %s800_s16, 3 }
   0xa   : > { %s864_s22 = scalar_select %p67_p5, %s788_s13, %s69_s20  }
   0xb   : > { %168 = sbr.rel (%p653_p7) target bundleno = 30 (0x1e), region = 20 }
  0x10   : > { %171 = sbr.rel (!%p78_p3) target bundleno = 30 (0x1e), region = 24  ;;  %s173_s23 = sand.u32 (%p78_p3), 1, %s788_s13  }
  0x11   : > { %s655_s24 = sshll.u32 (%p78_p3), %s796_s15, 2  ;;  %s654_s25 = sshll.u32 (%p78_p3), %s173_s23, 6 }
  0x12   : > { %s872_s28 = scalar_lea.vmem (%p78_p3), %s927_s1, %s655_s24  ;;  %s175_s29 = scalar_lea.vmem (%p78_p3), [#allocation3], %s654_s25 }
  0x13   : > { %v197_v0 = vld [vmem:[%s872_s28] sm:$0xf] (%p78_p3)  ;;  %v199_v1 = vld [vmem:[%s872_s28 + $0xc] sm:$0xf] (%p78_p3)  ;;  %v201_v2 = vld [vmem:[%s872_s28 + $0x18] sm:$0xf] (%p78_p3) }
  0x14   : > { %198 = vst [vmem:[%s175_s29] sm:$0xf] (%p78_p3), %v197_v0  ;;  %200 = vst [vmem:[%s175_s29 + $0x4] sm:$0xf] (%p78_p3), %v199_v1  ;;  %v203_v3 = vld [vmem:[%s872_s28 + $0x24] sm:$0xf] (%p78_p3) }
  0x15   : > { %v205_v4 = vld [vmem:[%s872_s28 + $0x30] sm:$0xf]  ;;  %202 = vst [vmem:[%s175_s29 + $0x8] sm:$0xf] %v201_v2  ;;  %204 = vst [vmem:[%s175_s29 + $0xc] sm:$0xf] %v203_v3 }
  0x16   : > { %206 = vst [vmem:[%s175_s29 + $0x10] sm:$0xf] %v205_v4  ;;  %v207_v5 = vld [vmem:[%s872_s28 + $0x3c] sm:$0xf]  ;;  %v209_v6 = vld [vmem:[%s872_s28 + $0x48] sm:$0xf] }
  0x17   : > { %v211_v7 = vld [vmem:[%s872_s28 + $0x54] sm:$0xf]  ;;  %208 = vst [vmem:[%s175_s29 + $0x14] sm:$0xf] %v207_v5  ;;  %210 = vst [vmem:[%s175_s29 + $0x18] sm:$0xf] %v209_v6 }
  0x18   : > { %212 = vst [vmem:[%s175_s29 + $0x1c] sm:$0xf] %v211_v7  ;;  %v213_v8 = vld [vmem:[%s872_s28 + $0x60] sm:$0xf]  ;;  %v215_v9 = vld [vmem:[%s872_s28 + $0x6c] sm:$0xf] }
  0x19   : > { %v217_v10 = vld [vmem:[%s872_s28 + $0x78] sm:$0xf]  ;;  %214 = vst [vmem:[%s175_s29 + $0x20] sm:$0xf] %v213_v8  ;;  %216 = vst [vmem:[%s175_s29 + $0x24] sm:$0xf] %v215_v9 }
  0x1a   : > { %218 = vst [vmem:[%s175_s29 + $0x28] sm:$0xf] %v217_v10  ;;  %v219_v11 = vld [vmem:[%s872_s28 + $0x84] sm:$0xf]  ;;  %v221_v12 = vld [vmem:[%s872_s28 + $0x90] sm:$0xf] }
  0x1b   : > { %v223_v13 = vld [vmem:[%s872_s28 + $0x9c] sm:$0xf]  ;;  %220 = vst [vmem:[%s175_s29 + $0x2c] sm:$0xf] %v219_v11  ;;  %222 = vst [vmem:[%s175_s29 + $0x30] sm:$0xf] %v221_v12 }
  0x1c   : > { %224 = vst [vmem:[%s175_s29 + $0x34] sm:$0xf] %v223_v13  ;;  %v225_v14 = vld [vmem:[%s872_s28 + $0xa8] sm:$0xf]  ;;  %v227_v15 = vld [vmem:[%s872_s28 + $0xb4] sm:$0xf] }
  0x1d   : > { %226 = vst [vmem:[%s175_s29 + $0x38] sm:$0xf] %v225_v14  ;;  %228 = vst [vmem:[%s175_s29 + $0x3c] sm:$0xf] %v227_v15 }
  0x1e PF: > { %p656_p8 = scmp.ge.s32.totalorder %s800_s16, 1  ;;  %p289_p9 = scmp.lt.s32.totalorder %s800_s16, 4 }
  0x20   : > { %p290_p10 = pnand %p656_p8, %p289_p9 }
  0x21   : > { %s296_s30 = sand.u32 (!%p290_p10), 1, %s784_s12   ;;  %p339_p11 = scmp.lt.s32.totalorder (!%p290_p10), %s792_s14, 2 }
  0x22   : > { %293 = sbr.rel (%p290_p10) target bundleno = 282 (0x11a), region = 69  ;;  %s657_s4 = sshll.u32 (!%p290_p10), %s296_s30, 6 }
  0x23   : > { %s298_s5 = scalar_lea.vmem (!%p290_p10), [#allocation3], %s657_s4  ;;  %s658_s18 = sshll.u32 (!%p290_p10), %s296_s30, 3 }
  0x24   : > { %s328_s19 = scalar_lea.vmem (!%p290_p10), [#allocation4], %s658_s18 }
  0x27   : > { %v802_v16 = vmov 0.0   ;;  %vm803_vm0 = vmmov 0   ;;  %v753_v17 = vld [vmem:[%s298_s5 + $0x38] sm:$0xff]   ;;  %v754_v18 = vld [vmem:[%s298_s5 + $0x30] sm:$0xff]   ;;  %v755_v19 = vld [vmem:[%s298_s5 + $0x28] sm:$0xff]   ;;  %s340_s8 = scalar_select %p339_p11, %s792_s14, 2 }
  0x28   : > { %691 = vmatprep.subr.bf16.mxu0 %v802_v16  ;;  %707 = vmatprep.mubr.msk.bf16.mxu0 %vm803_vm0, %v802_v16  ;;  %v756_v20 = vld [vmem:[%s298_s5 + $0x20] sm:$0xff]   ;;  %v757_v21 = vld [vmem:[%s298_s5 + $0x18] sm:$0xff]   ;;  %v758_v22 = vld [vmem:[%s298_s5 + $0x10] sm:$0xff]   ;;  %s672_s20 = sshll.u32 (%p859_p6), %s792_s14, 2 }
  0x29   : > { %692 = vmatpush3.bf16.msra.mxu0 %v753_v17  ;;  %v759_v23 = vld [vmem:[%s298_s5 + $0x8] sm:$0xff]   ;;  %v760_v24 = vld [vmem:[%s298_s5] sm:$0xff]   ;;  %s341_s11 = scalar_lea.vmem %s928_s2, %s340_s8  ;;  %s504_s25 = scalar_lea.vmem (%p859_p6), %s929_s3, %s672_s20 }
  0x2a   : > { %693 = vmatprep.subr.bf16.mxu0 %v802_v16  ;;  %v761_v25 = vld [vmem:[%s926_s0] sm:$0xff]  }
  0x2b   : > { %v668_v27 = vld [vmem:[%s341_s11] ss:$0 sm:$0xff] }
  0x2d   : > { %694 = vmatpush3.bf16.msra.mxu0 %v754_v18 }
  0x2e   : > { %695 = vmatprep.subr.bf16.mxu0 %v802_v16 }
  0x31   : > { %696 = vmatpush3.bf16.msra.mxu0 %v755_v19 }
  0x32   : > { %697 = vmatprep.subr.bf16.mxu0 %v802_v16 }
  0x35   : > { %698 = vmatpush3.bf16.msra.mxu0 %v756_v20 }
  0x36   : > { %699 = vmatprep.subr.bf16.mxu0 %v802_v16 }
  0x39   : > { %700 = vmatpush3.bf16.msra.mxu0 %v757_v21 }
  0x3a   : > { %701 = vmatprep.subr.bf16.mxu0 %v802_v16 }
  0x3d   : > { %702 = vmatpush3.bf16.msra.mxu0 %v758_v22 }
  0x3e   : > { %703 = vmatprep.subr.bf16.mxu0 %v802_v16 }
  0x41   : > { %704 = vmatpush3.bf16.msra.mxu0 %v759_v23 }
  0x42   : > { %705 = vmatprep.subr.bf16.mxu0 %v802_v16 }
  0x45   : > { %706 = vmatpush3.bf16.msra.mxu0 %v760_v24 }
  0x48   : > { %708 = vmatmul.mubr.bf16.vlgmr.msra.gmra.mxu0 %v761_v25 }
 0x108   : > { %v458_v26 = vpop.f32.mrf.mxu0 }
 0x109   : > { %v481_v30 = vadd.f32 %v668_v27, %v458_v26 }
 0x10a   : > { %v709_v28 = vpop.f32.mrf.mxu0 }
 0x10c   : > { %v461_v29 = vpop.f32.mrf.mxu0 }
 0x10d   : > { %v482_v31 = vadd.f32 %v668_v27, %v461_v29  ;;  %499 = sbr.rel (!%p859_p6) target bundleno = 282 (0x11a), region = 85 }
 0x10e   : > { %v710_v32 = vpop.f32.mrf.mxu0 }
 0x10f   : > { %v680_v33 = vpack.c.bf16 %v482_v31, %v481_v30 }
 0x111   : > { %681 = vst [vmem:[%s328_s19] sm:$0xff] %v680_v33  }
 0x118   : > { %v521_v34 = vld [vmem:[%s328_s19] sm:$0xf]  ;;  %v523_v35 = vld [vmem:[%s328_s19 + $0x4] sm:$0xf] }
 0x119   : > { %522 = vst [vmem:[%s504_s25] sm:$0xf] %v521_v34  ;;  %524 = vst [vmem:[%s504_s25 + $0xc] sm:$0xf] %v523_v35 }
 0x11a PF: > { %s13_s16 = sadd.s32 1, %s800_s16   ;;  %s931_s12 = smov %s788_s13 }
 0x11b   : > { %p10_p12 = scmp.ge.s32.totalorder %s13_s16, 5   ;;  %s932_s13 = smov %s864_s22 }
 0x11c   : > { %s933_s14 = smov %s796_s15  ;;  %s934_s15 = smov %s936_s17 }
 0x11d   :  { %12 = sbr.rel (!%p10_p12) target bundleno = 3 (0x3), region = 163 }

// kernel: transformer_forward.33
= control target key start
LH: loop header
LB: loop body
LE: loop exit
PB: predicated region body
PF: predicated region fallthrough
CT: control target
= control target key end

     0   :  { %v227_v0 = vmov 0.0   ;;  %vm228_vm0 = vmmov 0   ;;  %s282_s1 = inlined_call_operand.vmem [shape: bf16[128,128], index: 1, kind: input, shape index: {}]   ;;  %s283_s0 = inlined_call_operand.vmem [shape: bf16[16,128], index: 0, kind: input, shape index: {}]   ;;  %s284_s2 = inlined_call_operand.vmem [shape: f32[1,128], index: 2, kind: input, shape index: {}]   ;;  %s285_s3 = inlined_call_operand.vmem [shape: bf16[16,128], index: 3, kind: output, shape index: {}]  }
   0x1   :  { %196 = vmatprep.subr.bf16.mxu0 %v227_v0  ;;  %v218_v1 = vld [vmem:[%s282_s1 + $0x38] sm:$0xff]   ;;  %212 = vmatprep.mubr.msk.bf16.mxu0 %vm228_vm0, %v227_v0  ;;  %v219_v2 = vld [vmem:[%s282_s1 + $0x30] sm:$0xff]   ;;  %v220_v3 = vld [vmem:[%s282_s1 + $0x28] sm:$0xff]  }
   0x2   :  { %197 = vmatpush3.bf16.msra.mxu0 %v218_v1  ;;  %v221_v4 = vld [vmem:[%s282_s1 + $0x20] sm:$0xff]   ;;  %v222_v5 = vld [vmem:[%s282_s1 + $0x18] sm:$0xff]   ;;  %v223_v6 = vld [vmem:[%s282_s1 + $0x10] sm:$0xff]  }
   0x3   :  { %198 = vmatprep.subr.bf16.mxu0 %v227_v0  ;;  %v224_v7 = vld [vmem:[%s282_s1 + $0x8] sm:$0xff]   ;;  %v225_v8 = vld [vmem:[%s282_s1] sm:$0xff]  }
   0x4   :  { %v226_v9 = vld [vmem:[%s283_s0] sm:$0xff]  }
   0x5   :  { %v177_v11 = vld [vmem:[%s284_s2] ss:$0 sm:$0xff] }
   0x6   :  { %199 = vmatpush3.bf16.msra.mxu0 %v219_v2 }
   0x7   :  { %200 = vmatprep.subr.bf16.mxu0 %v227_v0 }
   0xa   :  { %201 = vmatpush3.bf16.msra.mxu0 %v220_v3 }
   0xb   :  { %202 = vmatprep.subr.bf16.mxu0 %v227_v0 }
   0xe   :  { %203 = vmatpush3.bf16.msra.mxu0 %v221_v4 }
   0xf   :  { %204 = vmatprep.subr.bf16.mxu0 %v227_v0 }
  0x12   :  { %205 = vmatpush3.bf16.msra.mxu0 %v222_v5 }
  0x13   :  { %206 = vmatprep.subr.bf16.mxu0 %v227_v0 }
  0x16   :  { %207 = vmatpush3.bf16.msra.mxu0 %v223_v6 }
  0x17   :  { %208 = vmatprep.subr.bf16.mxu0 %v227_v0 }
  0x1a   :  { %209 = vmatpush3.bf16.msra.mxu0 %v224_v7 }
  0x1b   :  { %210 = vmatprep.subr.bf16.mxu0 %v227_v0 }
  0x1e   :  { %211 = vmatpush3.bf16.msra.mxu0 %v225_v8 }
  0x21   :  { %213 = vmatmul.mubr.bf16.vlgmr.msra.gmra.mxu0 %v226_v9 }
  0xe1   :  { %v129_v10 = vpop.f32.mrf.mxu0 }
  0xe2   :  { %v152_v14 = vadd.f32 %v177_v11, %v129_v10 }
  0xe3   :  { %v214_v12 = vpop.f32.mrf.mxu0 }
  0xe5   :  { %v132_v13 = vpop.f32.mrf.mxu0 }
  0xe6   :  { %v153_v15 = vadd.f32 %v177_v11, %v132_v13 }
  0xe7   :  { %v215_v16 = vpop.f32.mrf.mxu0 }
  0xe8   :  { %v185_v17 = vpack.c.bf16 %v153_v15, %v152_v14 }
  0xea   :  { %186 = vst [vmem:[%s285_s3] sm:$0xff] %v185_v17  }

// kernel: transformer_forward.24
= control target key start
LH: loop header
LB: loop body
LE: loop exit
PB: predicated region body
PF: predicated region fallthrough
CT: control target
= control target key end

     0   :  { %s1717_s30 = smov 0   ;;  %s1719_s10 = smov 0   ;;  %s1944_s0 = inlined_call_operand.vmem [shape: bf16[2,8,128], index: 0, kind: input, shape index: {}]   ;;  %s1945_s1 = inlined_call_operand.vmem [shape: bf16[2,8,384], index: 1, kind: input, shape index: {}, may-alias: {1,2,3}]   ;;  %s1946_s2 = inlined_call_operand.vmem [shape: bf16[2,8,384], index: 2, kind: input, shape index: {}, may-alias: {1,2,3}]   ;;  %s1947_s3 = inlined_call_operand.vmem [shape: bf16[2,8,384], index: 3, kind: input, shape index: {}, may-alias: {1,2,3}]   ;;  %s1948_s4 = inlined_call_operand.vmem [shape: f32[2,1,8], index: 4, kind: input, shape index: {}]   ;;  %s1949_s5 = inlined_call_operand.vmem [shape: bf16[128,128], index: 5, kind: input, shape index: {}]   ;;  %s1950_s6 = inlined_call_operand.vmem [shape: f32[1,128], index: 6, kind: input, shape index: {}]   ;;  %s1951_s7 = inlined_call_operand.vmem [shape: f32[1,128], index: 7, kind: input, shape index: {}]   ;;  %s1952_s8 = inlined_call_operand.vmem [shape: f32[1,128], index: 8, kind: input, shape index: {}]   ;;  %s1953_s9 = inlined_call_operand.vmem [shape: bf16[2,8,128], index: 9, kind: output, shape index: {}]  }
   0x1   :  { %s1721_s11 = smov 0  }
   0x2 LB: > { %s38_s12 = sadd.s32 1, %s1654_s10  ;;  %p1440_p0 = scmp.ge.s32.totalorder %s1658_s11, 1  ;;  %s1658_s11 = sphi %s1721_s11, %s19_s11   ;;  %s1654_s10 = sphi %s1719_s10, %s1955_s10   ;;  %s1650_s30 = sphi %s1717_s30, %s1954_s30  }
   0x3   : > { %p40_p1 = scmp.ge.s32.totalorder %s38_s12, 2  ;;  %p375_p2 = scmp.lt.s32.totalorder %s1658_s11, 3 }
   0x5   : > { %s1957_s12 = smov (%p40_p1, %s38_s12), 0  ;;  %p376_p3 = pnand %p1440_p0, %p375_p2 }
   0x6   : > { %p450_p4 = scmp.lt.s32.totalorder (!%p376_p3), %s1650_s30, 1  ;;  %s1662_s20 = smov (!%p376_p3), 96  }
   0x7   : > { %379 = sbr.rel (%p376_p3) target bundleno = 1887 (0x75f), region = 56  ;;  %s1663_s21 = smov (!%p376_p3), 64  }
   0x8   : > { %s1666_s25 = smov (!%p376_p3), 32  }
   0xc   : > { %v1660_v0 = vmov 0.0   ;;  %vm1661_vm0 = vmmov 0   ;;  %s1959_s30 = smov (!%p450_p4, %s1650_s30), 1  ;;  %vm518_vm1 = vcmask 261120   ;;  %vm504_vm2 = vcmask 7168  }
   0xd   : > { %1498 = vmatprep.subr.bf16.mxu0 %v1660_v0  ;;  %513 = vst [vmem:[#allocation4] sm:$0xff] %v1660_v0  ;;  %1500 = vmatprep.mubr.msk.bf16.mxu0 %vm1661_vm0, %v1660_v0  ;;  %s1745_s13 = smul.u32 12, %s1959_s30  ;;  %v1664_v6 = vmov -1e+30   ;;  %509 = vst.msk [vmem:[#allocation3] sm:$0xff] %vm504_vm2, %v1660_v0  ;;  %s491_s24 = scalar_lea.vmem %s1948_s4, %s1959_s30  ;;  %vm574_vm3 = vcmask 64512  }
   0xe   : > { %1522 = vmatprep.subr.bf16.mxu1 %v1660_v0  ;;  %1524 = vmatprep.mubr.msk.bf16.mxu1 %vm1661_vm0, %v1660_v0  ;;  %505 = vst.msk [vmem:[#allocation2] sm:$0xff] %vm504_vm2, %v1664_v6  ;;  %506 = vst.msk [vmem:[#allocation2 + $0x8] sm:$0xff] %vm504_vm2, %v1664_v6  ;;  %v1787_v13 = vld [vmem:[%s491_s24] ss:$0 sm:$0xff]  ;;  %v1665_v20 = vmov 0   ;;  %vm609_vm4 = vcmask 1043456  }
   0xf   : > { %s1362_s16 = scalar_lea.vmem %s1946_s2, %s1745_s13  ;;  %s465_s19 = scalar_lea.vmem %s1945_s1, %s1745_s13  ;;  %507 = vst.msk [vmem:[#allocation2 + $0x10] sm:$0xff] %vm504_vm2, %v1664_v6  ;;  %508 = vst.msk [vmem:[#allocation2 + $0x18] sm:$0xff] %vm504_vm2, %v1664_v6  ;;  %1598 = vset.pattern.permute.xlu0 %v1665_v20  ;;  %1599 = vset.pattern.permute.xlu1 %v1665_v20  ;;  %vm803_vm5 = vcmask 523520   ;;  %vm944_vm6 = vcmask 785920   ;;  %vm1085_vm7 = vcmask 1048320  }
  0x10   : > { %v1446_v1 = vld [vmem:[%s1362_s16 + $0x4] sm:$0xf]  ;;  %v514_v4 = vld [vmem:[%s465_s19] sm:$0xf]  ;;  %510 = vst.msk [vmem:[#allocation3 + $0x8] sm:$0xff] %vm504_vm2, %v1660_v0  ;;  %511 = vst.msk [vmem:[#allocation3 + $0x10] sm:$0xff] %vm504_vm2, %v1660_v0  ;;  %s1368_s28 = scalar_lea.vmem %s1947_s3, %s1745_s13 }
  0x11   : > { %v523_v2 = vsel %vm518_vm1, %v1446_v1, 0  ;;  %v1452_v3 = vcombine.low %v1446_v1, %v1446_v1  ;;  %v1451_v5 = vcombine.low %v514_v4, %v514_v4  ;;  %512 = vst.msk [vmem:[#allocation3 + $0x18] sm:$0xff] %vm504_vm2, %v1660_v0  ;;  %v1447_v29 = vld [vmem:[%s1368_s28 + $0x8] sm:$0xf]  ;;  %s1441_s28 = sshll.u32 %s1959_s30, 2 }
  0x12   : > { %1499 = vmatpush3.bf16.xpose.msra.mxu0 %v523_v2  ;;  %v611_v30 = vsel %vm609_vm4, %v1447_v29, 0  ;;  %s456_s14 = scalar_lea.vmem %s1944_s0, %s1441_s28  ;;  %s498_s22 = scalar_lea.vmem %s1953_s9, %s1441_s28 }
  0x13   : > { %664 = vrot.lane.b32.xlu1 %v1452_v3, %s1662_s20  ;;  %1504 = vmatprep.subr.bf16.mxu0 %v1660_v0 }
  0x15   : > { %v1793_v25 = vld [vmem:[#allocation2] sm:$0xff]  ;;  %v715_v2 = vld [vmem:[#allocation2 + $0x8] sm:$0xff] }
  0x16   : > { %v1828_v43 = vld [vmem:[#allocation2 + $0x10] sm:$0xff] }
  0x17   : > { %659 = vrot.lane.b32.xlu1 %v1451_v5, %s1662_s20 }
  0x19   : > { %1501 = vmatmul.mubr.msk.bf16.vlgmr.msra.gmra.mxu0 %vm518_vm1, %v514_v4 }
  0x1a   : > { %1506 = vmatprep.mubr.msk.bf16.mxu0 %vm1661_vm0, %v1660_v0  ;;  %1505 = vmatpush3.bf16.msra.mxu0 %v611_v30 }
  0x1b   : > { %808 = vrot.lane.b32.xlu1 %v1452_v3, %s1663_s21  ;;  %1510 = vmatprep.subr.bf16.mxu0 %v1660_v0 }
  0x1f   : > { %806 = vrot.lane.b32.xlu1 %v1451_v5, %s1663_s21 }
  0x23   : > { %949 = vrot.lane.b32.xlu1 %v1452_v3, %s1666_s25 }
  0x27   : > { %947 = vrot.lane.b32.xlu1 %v1451_v5, %s1666_s25  ;;  %v1000_v5 = vld [vmem:[#allocation2 + $0x18] sm:$0xff] }
  0x85   : > { %v665_v7 = vpop.permute.xlu1 %664 }
  0x86   : > { %v670_v41 = vsel %vm518_vm1, %v665_v7, 0  ;;  %v1454_v7 = vcombine.low %v1447_v29, %v1447_v29 }
  0x89   : > { %v1776_v8 = vpop.permute.xlu1 %659 }
  0x8d   : > { %v809_v9 = vpop.permute.xlu1 %808 }
  0x8e   : > { %v814_v10 = vsel %vm518_vm1, %v809_v9, 0 }
  0x8f   : > { %1523 = vmatpush3.bf16.xpose.msra.mxu1 %v814_v10 }
  0x90   : > { %1534 = vmatprep.subr.bf16.mxu1 %v1660_v0 }
  0x91   : > { %v807_v11 = vpop.permute.xlu1 %806 }
  0x95   : > { %v950_v31 = vpop.permute.xlu1 %949 }
  0x96   : > { %1525 = vmatmul.mubr.msk.bf16.vlgmr.msra.gmra.mxu1 %vm518_vm1, %v807_v11  ;;  %v955_v32 = vsel %vm518_vm1, %v950_v31, 0 }
  0x97   : > { %1536 = vmatprep.mubr.msk.bf16.mxu1 %vm1661_vm0, %v1660_v0  ;;  %1535 = vmatpush3.bf16.xpose.msra.mxu1 %v955_v32 }
  0x98   : > { %1546 = vmatprep.subr.bf16.mxu1 %v1660_v0 }
  0x99   : > { %v948_v35 = vpop.permute.xlu1 %947 }
  0x9e   : > { %1537 = vmatmul.mubr.msk.bf16.vlgmr.msra.gmra.mxu1 %vm518_vm1, %v948_v35 }
  0x9f   : > { %1562 = vmatprep.mubr.msk.bf16.mxu1 %vm1661_vm0, %v1660_v0 }
  0xd9   : > { %v559_v12 = vpop.f32.mrf.mxu0 }
  0xda   : > { %v565_v14 = vmul.f32 0.17677669, %v559_v12 }
  0xdb   : > { %v1502_v15 = vpop.f32.mrf.mxu0 }
  0xdc   : > { %v572_v16 = vadd.f32 %v1787_v13, %v565_v14 }
  0xdd   : > { %v562_v17 = vpop.f32.mrf.mxu0 }
  0xde   : > { %v575_v18 = vsel %vm574_vm3, %v572_v16, -inf }
  0xdf   : > { %576 = vmax.xlane.f32.xlu0 %v575_v18  ;;  %v1503_v19 = vpop.f32.mrf.mxu0 }
 0x156   : > { %v850_v21 = vpop.f32.mrf.mxu1 }
 0x157   : > { %v856_v33 = vmul.f32 0.17677669, %v850_v21 }
 0x158   : > { %v1526_v22 = vpop.f32.mrf.mxu1 }
 0x159   : > { %v1812_v34 = vadd.f32 %v1787_v13, %v856_v33 }
 0x15a   : > { %v853_v23 = vpop.f32.mrf.mxu1 }
 0x15b   : > { %v860_v36 = vsel %vm574_vm3, %v1812_v34, -inf }
 0x15c   : > { %v1527_v24 = vpop.f32.mrf.mxu1 }
 0x15e   : > { %v991_v47 = vpop.f32.mrf.mxu1 }
 0x15f   : > { %v997_v55 = vmul.f32 0.17677669, %v991_v47  ;;  %v590_v47 = vld [vmem:[#allocation3] sm:$0xff] }
 0x160   : > { %v1538_v48 = vpop.f32.mrf.mxu1 }
 0x161   : > { %v998_v60 = vadd.f32 %v1787_v13, %v997_v55 }
 0x162   : > { %v994_v49 = vpop.f32.mrf.mxu1 }
 0x163   : > { %v1001_v1 = vsel %vm574_vm3, %v998_v60, -inf }
 0x164   : > { %v1539_v50 = vpop.f32.mrf.mxu1 }
 0x168   : > { %v577_v26 = vpop.xlane.xlu0 %576 }
 0x169   : > { %v1796_v27 = vmax.f32 %v1793_v25, %v577_v26 }
 0x16b   : > { %v579_v28 = vsub.f32 %v1793_v25, %v1796_v27  ;;  %655 = vst.msk [vmem:[#allocation2] sm:$0xff] %vm504_vm2, %v1796_v27  ;;  %584 = vperm.xlu0 %1598, %v1796_v27  }
 0x18a   : > { %861 = vmax.xlane.f32.xlu0 %v860_v36 }
 0x1e6   : > { %v585_v37 = vpop.permute.xlu0 %584 }
 0x1e7   : > { %v587_v38 = vsub.f32 %v572_v16, %v585_v37 }
 0x1e9   : > { %v588_v39 = vmul.f32 1.442695, %v587_v38 }
 0x1eb   : > { %1610 = vpow2.f32 %v588_v39  ;;  %v580_v39 = vmul.f32 1.442695, %v579_v28 }
 0x1f8   : > { %v1611_v40 = vpop.eup %1610 }
 0x1f9   : > { %v605_v42 = vpack.c.bf16 %v1611_v40, %v1611_v40  ;;  %v592_v11 = vsel %vm574_vm3, %v1611_v40, 0.0 }
 0x1fb   : > { %1507 = vmatmul.mubr.msk.bf16.vlgmr.msra.gmra.mxu0 %vm574_vm3, %v605_v42 }
 0x1fc   : > { %1511 = vmatpush3.bf16.xpose.msra.mxu0 %v670_v41  ;;  %1512 = vmatprep.mubr.msk.bf16.mxu0 %vm1661_vm0, %v1660_v0 }
 0x1fd   : > { %1516 = vmatprep.subr.bf16.mxu0 %v1660_v0 }
 0x203   : > { %1513 = vmatmul.mubr.msk.bf16.vlgmr.msra.gmra.mxu0 %vm518_vm1, %v1776_v8 }
 0x204   : > { %1518 = vmatprep.mubr.msk.bf16.mxu0 %vm1661_vm0, %v1660_v0 }
 0x213   : > { %v862_v44 = vpop.xlane.xlu0 %861 }
 0x214   : > { %v1831_v45 = vmax.f32 %v1828_v43, %v862_v44 }
 0x216   : > { %v864_v46 = vsub.f32 %v1828_v43, %v1831_v45  ;;  %946 = vst.msk [vmem:[#allocation2 + $0x10] sm:$0xff] %vm504_vm2, %v1831_v45  ;;  %869 = vperm.xlu0 %1598, %v1831_v45  }
 0x218   : > { %v865_v40 = vmul.f32 1.442695, %v864_v46  ;;  %v732_v46 = vld [vmem:[#allocation3 + $0x8] sm:$0xff] }
 0x291   : > { %v870_v12 = vpop.permute.xlu0 %869 }
 0x2bb   : > { %v1838_v51 = vpop.f32.mrf.mxu0 }
 0x2bd   : > { %v1508_v52 = vpop.f32.mrf.mxu0 }
 0x2bf   : > { %v650_v53 = vpop.f32.mrf.mxu0 }
 0x2c1   : > { %v1509_v54 = vpop.f32.mrf.mxu0 }
 0x2c2   : > { %v876_v54 = vld [vmem:[#allocation3 + $0x10] sm:$0xff] }
 0x2c3   : > { %v706_v56 = vpop.f32.mrf.mxu0 }
 0x2c4   : > { %v712_v57 = vmul.f32 0.17677669, %v706_v56 }
 0x2c5   : > { %v1514_v58 = vpop.f32.mrf.mxu0 }
 0x2c6   : > { %v713_v59 = vadd.f32 %v1787_v13, %v712_v57  ;;  %v872_v13 = vsub.f32 %v1812_v34, %v870_v12  ;;  %v1017_v58 = vld [vmem:[#allocation3 + $0x18] sm:$0xff] }
 0x2c7   : > { %v709_v61 = vpop.f32.mrf.mxu0 }
 0x2c8   : > { %v716_v62 = vsel %vm574_vm3, %v713_v59, -inf  ;;  %v873_v16 = vmul.f32 1.442695, %v872_v13 }
 0x2c9   : > { %717 = vmax.xlane.f32.xlu1 %v716_v62  ;;  %v1515_v63 = vpop.f32.mrf.mxu0 }
 0x2cd   : > { %1002 = vmax.xlane.f32.xlu1 %v1001_v1 }
 0x352   : > { %v718_v3 = vpop.xlane.xlu1 %717 }
 0x353   : > { %v719_v4 = vmax.f32 %v715_v2, %v718_v3 }
 0x355   : > { %v720_v6 = vsub.f32 %v715_v2, %v719_v4  ;;  %805 = vst.msk [vmem:[#allocation2 + $0x8] sm:$0xff] %vm504_vm2, %v719_v4  ;;  %725 = vperm.xlu1 %1599, %v719_v4  }
 0x356   : > { %v1003_v8 = vpop.xlane.xlu1 %1002 }
 0x357   : > { %v1004_v9 = vmax.f32 %v1000_v5, %v1003_v8  ;;  %v721_v35 = vmul.f32 1.442695, %v720_v6 }
 0x359   : > { %750 = vrot.lane.b32.xlu1 %v1454_v7, %s1662_s20  ;;  %v1005_v10 = vsub.f32 %v1000_v5, %v1004_v9  ;;  %1087 = vst.msk [vmem:[#allocation2 + $0x18] sm:$0xff] %vm504_vm2, %v1004_v9 }
 0x35b   : > { %v1006_v42 = vmul.f32 1.442695, %v1005_v10 }
 0x35d   : > { %1010 = vperm.xlu1 %1599, %v1004_v9  }
 0x361   : > { %891 = vrot.lane.b32.xlu1 %v1454_v7, %s1663_s21 }
 0x365   : > { %1032 = vrot.lane.b32.xlu1 %v1454_v7, %s1666_s25 }
 0x389   : > { %593 = vadd.xlane.f32.xlu1 %v592_v11 }
 0x3d0   : > { %v726_v14 = vpop.permute.xlu1 %725 }
 0x3d1   : > { %v728_v15 = vsub.f32 %v713_v59, %v726_v14 }
 0x3d3   : > { %v729_v17 = vmul.f32 1.442695, %v728_v15 }
 0x3d4   : > { %v751_v18 = vpop.permute.xlu1 %750 }
 0x3d5   : > { %1612 = vpow2.f32 %v729_v17  ;;  %v756_v19 = vsel %vm609_vm4, %v751_v18, 0 }
 0x3d6   : > { %1517 = vmatpush3.bf16.msra.mxu0 %v756_v19  ;;  %1614 = vpow2.f32 %v873_v16 }
 0x3d7   : > { %1528 = vmatprep.subr.bf16.mxu0 %v1660_v0 }
 0x3d8   : > { %v1011_v20 = vpop.permute.xlu1 %1010 }
 0x3d9   : > { %v1013_v21 = vsub.f32 %v998_v60, %v1011_v20  ;;  %v1602_v20 = vld [vmem:[%s1949_s5 + $0x38] sm:$0xff]  }
 0x3da   : > { %1547 = vmatpush3.bf16.msra.mxu1 %v1602_v20 }
 0x3db   : > { %v1014_v22 = vmul.f32 1.442695, %v1013_v21  ;;  %1548 = vmatprep.subr.bf16.mxu1 %v1660_v0  ;;  %v1603_v21 = vld [vmem:[%s1949_s5 + $0x30] sm:$0xff]  }
 0x3dc   : > { %v892_v23 = vpop.permute.xlu1 %891 }
 0x3dd   : > { %1616 = vpow2.f32 %v1014_v22  ;;  %v897_v30 = vsel %vm609_vm4, %v892_v23, 0  ;;  %v1604_v22 = vld [vmem:[%s1949_s5 + $0x28] sm:$0xff]   ;;  %v1605_v23 = vld [vmem:[%s1949_s5 + $0x20] sm:$0xff]  }
 0x3de   : > { %1618 = vpow2.f32 %v721_v35  ;;  %1549 = vmatpush3.bf16.msra.mxu1 %v1603_v21 }
 0x3df   : > { %1620 = vpow2.f32 %v580_v39  ;;  %1550 = vmatprep.subr.bf16.mxu1 %v1660_v0 }
 0x3e0   : > { %v1033_v33 = vpop.permute.xlu1 %1032  ;;  %1622 = vpow2.f32 %v865_v40 }
 0x3e1   : > { %v1038_v38 = vsel %vm609_vm4, %v1033_v33, 0  ;;  %1624 = vpow2.f32 %v1006_v42 }
 0x3e2   : > { %v1613_v24 = vpop.eup %1612  ;;  %1551 = vmatpush3.bf16.msra.mxu1 %v1604_v22 }
 0x3e3   : > { %v734_v26 = vsel %vm574_vm3, %v1613_v24, 0.0  ;;  %v746_v29 = vpack.c.bf16 %v1613_v24, %v1613_v24  ;;  %v1615_v31 = vpop.eup %1614  ;;  %1552 = vmatprep.subr.bf16.mxu1 %v1660_v0  ;;  %v1606_v24 = vld [vmem:[%s1949_s5 + $0x18] sm:$0xff]  }
 0x3e4   : > { %735 = vadd.xlane.f32.xlu0 %v734_v26  ;;  %v878_v32 = vsel %vm574_vm3, %v1615_v31, 0.0  ;;  %v890_v37 = vpack.c.bf16 %v1615_v31, %v1615_v31  ;;  %v1607_v26 = vld [vmem:[%s1949_s5 + $0x10] sm:$0xff]  }
 0x3e5   : > { %1519 = vmatmul.mubr.msk.bf16.vlgmr.msra.gmra.mxu0 %vm574_vm3, %v746_v29  ;;  %v1608_v29 = vld [vmem:[%s1949_s5 + $0x8] sm:$0xff]  }
 0x3e6   : > { %1529 = vmatpush3.bf16.msra.mxu0 %v897_v30  ;;  %1530 = vmatprep.mubr.msk.bf16.mxu0 %vm1661_vm0, %v1660_v0  ;;  %v1609_v30 = vld [vmem:[%s1949_s5] sm:$0xff]  }
 0x3e7   : > { %1540 = vmatprep.subr.bf16.mxu0 %v1660_v0  ;;  %1553 = vmatpush3.bf16.msra.mxu1 %v1605_v23 }
 0x3e8   : > { %879 = vadd.xlane.f32.xlu0 %v878_v32  ;;  %1554 = vmatprep.subr.bf16.mxu1 %v1660_v0 }
 0x3ea   : > { %v1617_v34 = vpop.eup %1616 }
 0x3eb   : > { %v1019_v36 = vsel %vm574_vm3, %v1617_v34, 0.0  ;;  %v1031_v41 = vpack.c.bf16 %v1617_v34, %v1617_v34  ;;  %v1619_v25 = vpop.eup %1618  ;;  %1555 = vmatpush3.bf16.msra.mxu1 %v1606_v24 }
 0x3ec   : > { %1020 = vadd.xlane.f32.xlu1 %v1019_v36  ;;  %v1621_v27 = vpop.eup %1620  ;;  %v733_v52 = vmul.f32 %v1619_v25, %v732_v46  ;;  %1556 = vmatprep.subr.bf16.mxu1 %v1660_v0 }
 0x3ed   : > { %1531 = vmatmul.mubr.msk.bf16.vlgmr.msra.gmra.mxu0 %vm574_vm3, %v890_v37  ;;  %v1623_v28 = vpop.eup %1622  ;;  %v591_v48 = vmul.f32 %v1621_v27, %v590_v47 }
 0x3ee   : > { %1541 = vmatpush3.bf16.msra.mxu0 %v1038_v38  ;;  %1542 = vmatprep.mubr.msk.bf16.mxu0 %vm1661_vm0, %v1660_v0  ;;  %v1625_v44 = vpop.eup %1624  ;;  %v877_v56 = vmul.f32 %v1623_v28, %v876_v54 }
 0x3ef   : > { %v1018_v60 = vmul.f32 %v1625_v44, %v1017_v58  ;;  %1557 = vmatpush3.bf16.msra.mxu1 %v1607_v26 }
 0x3f0   : > { %1558 = vmatprep.subr.bf16.mxu1 %v1660_v0 }
 0x3f3   : > { %1559 = vmatpush3.bf16.msra.mxu1 %v1608_v29 }
 0x3f4   : > { %1560 = vmatprep.subr.bf16.mxu1 %v1660_v0 }
 0x3f5   : > { %1543 = vmatmul.mubr.msk.bf16.vlgmr.msra.gmra.mxu0 %vm574_vm3, %v1031_v41 }
 0x3f7   : > { %1561 = vmatpush3.bf16.msra.mxu1 %v1609_v30 }
 0x3fd   : > { %742 = vperm.xlu1 %1599, %v1619_v25  }
 0x3fe   : > { %601 = vperm.xlu0 %1598, %v1621_v27  }
 0x402   : > { %886 = vperm.xlu0 %1598, %v1623_v28  }
 0x406   : > { %1027 = vperm.xlu0 %1598, %v1625_v44  }
 0x412   : > { %v594_v49 = vpop.xlane.xlu1 %593 }
 0x413   : > { %v595_v50 = vadd.f32 %v594_v49, %v591_v48 }
 0x415   : > { %597 = vst.msk [vmem:[#allocation3] sm:$0xff] %vm504_vm2, %v595_v50 }
 0x41c   : > { %v1091_v43 = vld [vmem:[#allocation3] sm:$0xff] }
 0x41d   : > { %1626 = vrcp.f32 %v1091_v43 }
 0x42a   : > { %v1627_v45 = vpop.eup %1626 }
 0x42b   : > { %1096 = vperm.xlu0 %1598, %v1627_v45  }
 0x46d   : > { %v736_v53 = vpop.xlane.xlu0 %735 }
 0x46e   : > { %v737_v55 = vadd.f32 %v736_v53, %v733_v52 }
 0x470   : > { %738 = vst.msk [vmem:[#allocation3 + $0x8] sm:$0xff] %vm504_vm2, %v737_v55 }
 0x471   : > { %v880_v57 = vpop.xlane.xlu0 %879 }
 0x472   : > { %v881_v59 = vadd.f32 %v880_v57, %v877_v56  ;;  %v1237_v57 = vld [vmem:[%s456_s14] sm:$0xf] }
 0x473   : > { %v1238_v58 = vunpack.c.l.bf16 %v1237_v57 }
 0x474   : > { %882 = vst.msk [vmem:[#allocation3 + $0x10] sm:$0xff] %vm504_vm2, %v881_v59 }
 0x475   : > { %v1021_v61 = vpop.xlane.xlu1 %1020 }
 0x476   : > { %v1022_v62 = vadd.f32 %v1021_v61, %v1018_v60  ;;  %v1468_v60 = vld [vmem:[%s1950_s6] ss:$0 sm:$0xff] }
 0x477   : > { %v1101_v8 = vld [vmem:[#allocation3 + $0x8] sm:$0xff] }
 0x478   : > { %1023 = vst.msk [vmem:[#allocation3 + $0x18] sm:$0xff] %vm504_vm2, %v1022_v62 }
 0x479   : > { %v602_v63 = vpop.permute.xlu0 %601  ;;  %v743_v32 = vpop.permute.xlu1 %742 }
 0x47a   : > { %v604_v1 = vmul.f32 0.0, %v602_v63 }
 0x47b   : > { %v1111_v2 = vld [vmem:[#allocation3 + $0x10] sm:$0xff] }
 0x47c   : > { %v653_v3 = vadd.f32 %v1838_v51, %v604_v1  ;;  %1628 = vrcp.f32 %v1111_v2 }
 0x47d   : > { %1630 = vrcp.f32 %v1101_v8  ;;  %v887_v36 = vpop.permute.xlu0 %886 }
 0x47e   : > { %654 = vst.msk [vmem:[#allocation4] sm:$0xff] %vm518_vm1, %v653_v3 }
 0x47f   : > { %v1121_v11 = vld [vmem:[#allocation3 + $0x18] sm:$0xff] }
 0x480   : > { %1632 = vrcp.f32 %v1121_v11  ;;  %v1469_v11 = vld [vmem:[%s1951_s7] ss:$0 sm:$0xff] }
 0x481   : > { %v1028_v41 = vpop.permute.xlu0 %1027 }
 0x485   : > { %v739_v31 = vld [vmem:[#allocation4] sm:$0xff] }
 0x486   : > { %v745_v33 = vmul.f32 %v743_v32, %v739_v31 }
 0x489   : > { %v1629_v4 = vpop.eup %1628 }
 0x48a   : > { %1116 = vperm.xlu0 %1598, %v1629_v4   ;;  %v1631_v16 = vpop.eup %1630 }
 0x48d   : > { %v1633_v19 = vpop.eup %1632 }
 0x4a5   : > { %v792_v5 = vpop.f32.mrf.mxu0 }
 0x4a6   : > { %799 = vrot.lane.b32.xlu1 %v792_v5, %s1666_s25  ;;  %v1097_v28 = vpop.permute.xlu0 %1096 }
 0x4a7   : > { %v1520_v6 = vpop.f32.mrf.mxu0 }
 0x4a9   : > { %v795_v7 = vpop.f32.mrf.mxu0 }
 0x4ab   : > { %v1521_v9 = vpop.f32.mrf.mxu0 }
 0x4ad   : > { %v933_v10 = vpop.f32.mrf.mxu0 }
 0x4ae   : > { %940 = vrot.lane.b32.xlu1 %v933_v10, %s1663_s21 }
 0x4af   : > { %v1532_v12 = vpop.f32.mrf.mxu0 }
 0x4b1   : > { %v936_v51 = vpop.f32.mrf.mxu0 }
 0x4b2   : > { %v1470_v51 = vld [vmem:[%s1952_s8] ss:$0 sm:$0xff] }
 0x4b3   : > { %v1533_v13 = vpop.f32.mrf.mxu0 }
 0x4b5   : > { %v1074_v14 = vpop.f32.mrf.mxu0 }
 0x4b6   : > { %1081 = vrot.lane.b32.xlu1 %v1074_v14, %s1662_s20 }
 0x4b7   : > { %v1544_v15 = vpop.f32.mrf.mxu0 }
 0x4b9   : > { %v1077_v17 = vpop.f32.mrf.mxu0 }
 0x4ba   : > { %1106 = vperm.xlu1 %1599, %v1631_v16  }
 0x4bb   : > { %v1545_v18 = vpop.f32.mrf.mxu0 }
 0x4be   : > { %1126 = vperm.xlu1 %1599, %v1633_v19  }
 0x505   : > { %v1117_v43 = vpop.permute.xlu0 %1116 }
 0x518   : > { %v800_v34 = vpop.permute.xlu1 %799 }
 0x519   : > { %v802_v35 = vadd.f32 %v800_v34, %v745_v33 }
 0x51b   : > { %804 = vst.msk [vmem:[#allocation4] sm:$0xff] %vm803_vm5, %v802_v35 }
 0x520   : > { %v941_v39 = vpop.permute.xlu1 %940 }
 0x522   : > { %v883_v37 = vld [vmem:[#allocation4] sm:$0xff] }
 0x523   : > { %v889_v38 = vmul.f32 %v887_v36, %v883_v37 }
 0x525   : > { %v943_v40 = vadd.f32 %v941_v39, %v889_v38 }
 0x527   : > { %945 = vst.msk [vmem:[#allocation4] sm:$0xff] %vm944_vm6, %v943_v40 }
 0x528   : > { %v1082_v25 = vpop.permute.xlu1 %1081 }
 0x52e   : > { %v1024_v42 = vld [vmem:[#allocation4] sm:$0xff] }
 0x52f   : > { %v1030_v0 = vmul.f32 %v1028_v41, %v1024_v42 }
 0x531   : > { %v1084_v27 = vadd.f32 %v1082_v25, %v1030_v0 }
 0x533   : > { %1086 = vst.msk [vmem:[#allocation4] sm:$0xff] %vm1085_vm7, %v1084_v27 }
 0x535   : > { %v1107_v49 = vpop.permute.xlu1 %1106 }
 0x539   : > { %v1127_v53 = vpop.permute.xlu1 %1126 }
 0x53a   : > { %v1093_v44 = vld [vmem:[#allocation4] sm:$0xff] }
 0x53b   : > { %v1099_v47 = vmul.f32 %v1097_v28, %v1093_v44 }
 0x53d   : > { %1100 = vst.msk [vmem:[#allocation4] sm:$0xff] %vm518_vm1, %v1099_v47 }
 0x544   : > { %v1103_v48 = vld [vmem:[#allocation4] sm:$0xff] }
 0x545   : > { %v1109_v50 = vmul.f32 %v1107_v49, %v1103_v48 }
 0x547   : > { %1110 = vst.msk [vmem:[#allocation4] sm:$0xff] %vm803_vm5, %v1109_v50 }
 0x54e   : > { %v1113_v45 = vld [vmem:[#allocation4] sm:$0xff] }
 0x54f   : > { %v1119_v46 = vmul.f32 %v1117_v43, %v1113_v45 }
 0x551   : > { %1120 = vst.msk [vmem:[#allocation4] sm:$0xff] %vm944_vm6, %v1119_v46 }
 0x558   : > { %v1123_v52 = vld [vmem:[#allocation4] sm:$0xff] }
 0x559   : > { %v1129_v54 = vmul.f32 %v1127_v53, %v1123_v52 }
 0x55b   : > { %1130 = vst.msk [vmem:[#allocation4] sm:$0xff] %vm1085_vm7, %v1129_v54 }
 0x562   : > { %v1131_v55 = vld [vmem:[#allocation4] sm:$0xff] }
 0x563   : > { %v1132_v56 = vpack.c.bf16 %v1131_v55, %v1131_v55 }
 0x565   : > { %1563 = vmatmul.mubr.bf16.vlgmr.msra.gmra.mxu1 %v1132_v56 }
 0x625   : > { %v1231_v59 = vpop.f32.mrf.mxu1 }
 0x626   : > { %v1239_v61 = vadd.f32 %v1238_v58, %v1231_v59 }
 0x627   : > { %v1564_v62 = vpop.f32.mrf.mxu1 }
 0x628   : > { %v1247_v63 = vadd.f32 %v1468_v60, %v1239_v61 }
 0x629   : > { %v1234_v1 = vpop.f32.mrf.mxu1 }
 0x62a   : > { %1248 = vadd.xlane.f32.xlu0 %v1247_v63 }
 0x62b   : > { %v1565_v2 = vpop.f32.mrf.mxu1 }
 0x6b3   : > { %v1249_v3 = vpop.xlane.xlu0 %1248 }
 0x6b4   : > { %v1251_v4 = vmul.f32 0.0078125, %v1249_v3 }
 0x6b6   : > { %v1252_v5 = vsub.f32 %v1247_v63, %v1251_v4 }
 0x6b8   : > { %v1253_v6 = vmul.f32 %v1252_v5, %v1252_v5 }
 0x6ba   : > { %1254 = vadd.xlane.f32.xlu1 %v1253_v6 }
 0x743   : > { %v1255_v7 = vpop.xlane.xlu1 %1254 }
 0x744   : > { %v1256_v8 = vmul.f32 0.0078125, %v1255_v7 }
 0x746   : > { %v1257_v9 = vadd.f32 1e-05, %v1256_v8 }
 0x748   : > { %1634 = vrsqrt.f32 %v1257_v9 }
 0x755   : > { %v1635_v10 = vpop.eup %1634 }
 0x756   : > { %v1259_v12 = vmul.f32 %v1635_v10, %v1252_v5 }
 0x758   : > { %v1267_v13 = vmul.f32 %v1469_v11, %v1259_v12 }
 0x75a   : > { %v1275_v14 = vadd.f32 %v1470_v51, %v1267_v13 }
 0x75c   : > { %v1276_v15 = vpack.c.bf16 %v1275_v14, %v1275_v14 }
 0x75e   : > { %1277 = vst [vmem:[%s498_s22] sm:$0xf] %v1276_v15 }
 0x75f PF: > { %s19_s11 = sadd.s32 1, %s1658_s11   ;;  %s1954_s30 = smov %s1654_s10 }
 0x760   : > { %p16_p5 = scmp.ge.s32.totalorder %s19_s11, 4   ;;  %s1955_s10 = smov %s1957_s12 }
 0x762   :  { %18 = sbr.rel (!%p16_p5) target bundleno = 2 (0x2), region = 112 }

// kernel: transformer_forward.32
= control target key start
LH: loop header
LB: loop body
LE: loop exit
PB: predicated region body
PF: predicated region fallthrough
CT: control target
= control target key end

     0   :  { %s1732_s30 = smov 0   ;;  %s1734_s10 = smov 0   ;;  %s1962_s0 = inlined_call_operand.vmem [shape: bf16[2,8,128], index: 0, kind: input, shape index: {}]   ;;  %s1963_s1 = inlined_call_operand.vmem [shape: bf16[2,8,384], index: 1, kind: input, shape index: {}, may-alias: {1,2,3}]   ;;  %s1964_s2 = inlined_call_operand.vmem [shape: bf16[2,8,384], index: 2, kind: input, shape index: {}, may-alias: {1,2,3}]   ;;  %s1965_s3 = inlined_call_operand.vmem [shape: bf16[2,8,384], index: 3, kind: input, shape index: {}, may-alias: {1,2,3}]   ;;  %s1966_s4 = inlined_call_operand.vmem [shape: f32[2,1,8], index: 4, kind: input, shape index: {}]   ;;  %s1967_s5 = inlined_call_operand.vmem [shape: bf16[128,128], index: 5, kind: input, shape index: {}]   ;;  %s1968_s6 = inlined_call_operand.vmem [shape: f32[1,128], index: 6, kind: input, shape index: {}]   ;;  %s1969_s7 = inlined_call_operand.vmem [shape: f32[1,128], index: 7, kind: input, shape index: {}]   ;;  %s1970_s8 = inlined_call_operand.vmem [shape: f32[1,128], index: 8, kind: input, shape index: {}]   ;;  %s1971_s9 = inlined_call_operand.vmem [shape: bf16[2,8,128], index: 9, kind: output, shape index: {}]  }
   0x1   :  { %s1736_s11 = smov 0  }
   0x2 LB: > { %s38_s12 = sadd.s32 1, %s1668_s10  ;;  %p1453_p0 = scmp.ge.s32.totalorder %s1672_s11, 1  ;;  %s1672_s11 = sphi %s1736_s11, %s19_s11   ;;  %s1668_s10 = sphi %s1734_s10, %s1973_s10   ;;  %s1664_s30 = sphi %s1732_s30, %s1972_s30  }
   0x3   : > { %p40_p1 = scmp.ge.s32.totalorder %s38_s12, 2  ;;  %p375_p2 = scmp.lt.s32.totalorder %s1672_s11, 3 }
   0x5   : > { %s1975_s12 = smov (%p40_p1, %s38_s12), 0  ;;  %p376_p3 = pnand %p1453_p0, %p375_p2 }
   0x6   : > { %p450_p4 = scmp.lt.s32.totalorder (!%p376_p3), %s1664_s30, 1  ;;  %s1676_s20 = smov (!%p376_p3), 96  }
   0x7   : > { %379 = sbr.rel (%p376_p3) target bundleno = 1887 (0x75f), region = 56  ;;  %s1677_s21 = smov (!%p376_p3), 64  }
   0x8   : > { %s1681_s25 = smov (!%p376_p3), 32  }
   0xc   : > { %v1674_v0 = vmov 0.0   ;;  %vm1675_vm0 = vmmov 0   ;;  %s1977_s30 = smov (!%p450_p4, %s1664_s30), 1  ;;  %vm537_vm1 = vcmask 261120   ;;  %vm504_vm2 = vcmask 7168  }
   0xd   : > { %1511 = vmatprep.subr.bf16.mxu0 %v1674_v0  ;;  %513 = vst [vmem:[#allocation4] sm:$0xff] %v1674_v0  ;;  %1513 = vmatprep.mubr.msk.bf16.mxu0 %vm1675_vm0, %v1674_v0  ;;  %s1760_s13 = smul.u32 12, %s1977_s30  ;;  %v1678_v6 = vmov -1e+30   ;;  %509 = vst.msk [vmem:[#allocation3] sm:$0xff] %vm504_vm2, %v1674_v0  ;;  %v519_v12 = vlaneseq  ;;  %s491_s24 = scalar_lea.vmem %s1966_s4, %s1977_s30  ;;  %vm587_vm4 = vcmask 64512  }
   0xe   : > { %1535 = vmatprep.subr.bf16.mxu1 %v1674_v0  ;;  %1537 = vmatprep.mubr.msk.bf16.mxu1 %vm1675_vm0, %v1674_v0  ;;  %505 = vst.msk [vmem:[#allocation2] sm:$0xff] %vm504_vm2, %v1678_v6  ;;  %506 = vst.msk [vmem:[#allocation2 + $0x8] sm:$0xff] %vm504_vm2, %v1678_v6  ;;  %v1461_v15 = vld [vmem:[%s491_s24] ss:$0 sm:$0xff]  ;;  %v1679_v16 = vmov -1e+09  }
   0xf   : > { %s1375_s16 = scalar_lea.vmem %s1964_s2, %s1760_s13  ;;  %s465_s19 = scalar_lea.vmem %s1963_s1, %s1760_s13  ;;  %507 = vst.msk [vmem:[#allocation2 + $0x10] sm:$0xff] %vm504_vm2, %v1678_v6  ;;  %508 = vst.msk [vmem:[#allocation2 + $0x18] sm:$0xff] %vm504_vm2, %v1678_v6  ;;  %v520_v13 = vshrl.u32 %v519_v12, 7  ;;  %v525_v14 = vand.u32 127, %v519_v12  ;;  %v1680_v26 = vmov 0   ;;  %vm622_vm5 = vcmask 1043456  }
  0x10   : > { %v1459_v1 = vld [vmem:[%s1375_s16 + $0x4] sm:$0xf]  ;;  %v514_v4 = vld [vmem:[%s465_s19] sm:$0xf]  ;;  %510 = vst.msk [vmem:[#allocation3 + $0x8] sm:$0xff] %vm504_vm2, %v1674_v0  ;;  %511 = vst.msk [vmem:[#allocation3 + $0x10] sm:$0xff] %vm504_vm2, %v1674_v0  ;;  %1612 = vset.pattern.permute.xlu0 %v1680_v26  ;;  %1613 = vset.pattern.permute.xlu1 %v1680_v26  ;;  %s1381_s28 = scalar_lea.vmem %s1965_s3, %s1760_s13 }
  0x11   : > { %v542_v2 = vsel %vm537_vm1, %v1459_v1, 0  ;;  %v1465_v3 = vcombine.low %v1459_v1, %v1459_v1  ;;  %v1464_v5 = vcombine.low %v514_v4, %v514_v4  ;;  %512 = vst.msk [vmem:[#allocation3 + $0x18] sm:$0xff] %vm504_vm2, %v1674_v0  ;;  %vm528_vm3 = vcmp.ge.s32.totalorder %v520_v13, %v525_v14  ;;  %v1460_v35 = vld [vmem:[%s1381_s28 + $0x8] sm:$0xf]  ;;  %s1454_s28 = sshll.u32 %s1977_s30, 2 }
  0x12   : > { %1512 = vmatpush3.bf16.xpose.msra.mxu0 %v542_v2  ;;  %v529_v17 = vsel %vm528_vm3, 0.0, %v1679_v16  ;;  %v624_v36 = vsel %vm622_vm5, %v1460_v35, 0  ;;  %v1467_v13 = vcombine.low %v1460_v35, %v1460_v35  ;;  %vm816_vm6 = vcmask 523520   ;;  %s456_s14 = scalar_lea.vmem %s1962_s0, %s1454_s28  ;;  %s498_s22 = scalar_lea.vmem %s1971_s9, %s1454_s28 }
  0x13   : > { %677 = vrot.lane.b32.xlu1 %v1465_v3, %s1676_s20  ;;  %1517 = vmatprep.subr.bf16.mxu0 %v1674_v0  ;;  %v1804_v18 = vadd.f32 %v1461_v15, %v529_v17  ;;  %vm957_vm7 = vcmask 785920   ;;  %vm1098_vm8 = vcmask 1048320  }
  0x15   : > { %v1810_v31 = vld [vmem:[#allocation2] sm:$0xff] }
  0x16   : > { %v1846_v49 = vld [vmem:[#allocation2 + $0x10] sm:$0xff] }
  0x17   : > { %672 = vrot.lane.b32.xlu1 %v1464_v5, %s1676_s20 }
  0x19   : > { %1514 = vmatmul.mubr.msk.bf16.vlgmr.msra.gmra.mxu0 %vm537_vm1, %v514_v4 }
  0x1a   : > { %1519 = vmatprep.mubr.msk.bf16.mxu0 %vm1675_vm0, %v1674_v0  ;;  %1518 = vmatpush3.bf16.msra.mxu0 %v624_v36 }
  0x1b   : > { %821 = vrot.lane.b32.xlu1 %v1465_v3, %s1677_s21  ;;  %1523 = vmatprep.subr.bf16.mxu0 %v1674_v0 }
  0x1f   : > { %819 = vrot.lane.b32.xlu1 %v1464_v5, %s1677_s21 }
  0x23   : > { %962 = vrot.lane.b32.xlu1 %v1465_v3, %s1681_s25 }
  0x27   : > { %960 = vrot.lane.b32.xlu1 %v1464_v5, %s1681_s25 }
  0x85   : > { %v1791_v7 = vpop.permute.xlu1 %677 }
  0x86   : > { %v683_v47 = vsel %vm537_vm1, %v1791_v7, 0 }
  0x89   : > { %v1793_v8 = vpop.permute.xlu1 %672 }
  0x8d   : > { %v822_v9 = vpop.permute.xlu1 %821 }
  0x8e   : > { %v827_v10 = vsel %vm537_vm1, %v822_v9, 0 }
  0x8f   : > { %1536 = vmatpush3.bf16.xpose.msra.mxu1 %v827_v10 }
  0x90   : > { %1547 = vmatprep.subr.bf16.mxu1 %v1674_v0 }
  0x91   : > { %v820_v11 = vpop.permute.xlu1 %819 }
  0x95   : > { %v963_v37 = vpop.permute.xlu1 %962 }
  0x96   : > { %1538 = vmatmul.mubr.msk.bf16.vlgmr.msra.gmra.mxu1 %vm537_vm1, %v820_v11  ;;  %v968_v38 = vsel %vm537_vm1, %v963_v37, 0  ;;  %v1013_v11 = vld [vmem:[#allocation2 + $0x18] sm:$0xff] }
  0x97   : > { %1549 = vmatprep.mubr.msk.bf16.mxu1 %vm1675_vm0, %v1674_v0  ;;  %1548 = vmatpush3.bf16.xpose.msra.mxu1 %v968_v38 }
  0x98   : > { %1559 = vmatprep.subr.bf16.mxu1 %v1674_v0 }
  0x99   : > { %v961_v41 = vpop.permute.xlu1 %960 }
  0x9e   : > { %1550 = vmatmul.mubr.msk.bf16.vlgmr.msra.gmra.mxu1 %vm537_vm1, %v961_v41 }
  0x9f   : > { %1575 = vmatprep.mubr.msk.bf16.mxu1 %vm1675_vm0, %v1674_v0 }
  0xd9   : > { %v578_v19 = vpop.f32.mrf.mxu0 }
  0xda   : > { %v584_v20 = vmul.f32 0.17677669, %v578_v19 }
  0xdb   : > { %v1515_v21 = vpop.f32.mrf.mxu0 }
  0xdc   : > { %v585_v22 = vadd.f32 %v584_v20, %v1804_v18 }
  0xdd   : > { %v581_v23 = vpop.f32.mrf.mxu0 }
  0xde   : > { %v588_v24 = vsel %vm587_vm4, %v585_v22, -inf }
  0xdf   : > { %589 = vmax.xlane.f32.xlu0 %v588_v24  ;;  %v1516_v25 = vpop.f32.mrf.mxu0 }
 0x156   : > { %v863_v27 = vpop.f32.mrf.mxu1 }
 0x157   : > { %v869_v39 = vmul.f32 0.17677669, %v863_v27 }
 0x158   : > { %v1539_v28 = vpop.f32.mrf.mxu1 }
 0x159   : > { %v1829_v40 = vadd.f32 %v869_v39, %v1804_v18 }
 0x15a   : > { %v866_v29 = vpop.f32.mrf.mxu1 }
 0x15b   : > { %v873_v42 = vsel %vm587_vm4, %v1829_v40, -inf }
 0x15c   : > { %v1540_v30 = vpop.f32.mrf.mxu1 }
 0x15e   : > { %v1004_v53 = vpop.f32.mrf.mxu1 }
 0x15f   : > { %v1010_v61 = vmul.f32 0.17677669, %v1004_v53  ;;  %v603_v53 = vld [vmem:[#allocation3] sm:$0xff] }
 0x160   : > { %v1551_v54 = vpop.f32.mrf.mxu1 }
 0x161   : > { %v1011_v3 = vadd.f32 %v1010_v61, %v1804_v18 }
 0x162   : > { %v1007_v55 = vpop.f32.mrf.mxu1 }
 0x163   : > { %v1014_v7 = vsel %vm587_vm4, %v1011_v3, -inf }
 0x164   : > { %v1552_v56 = vpop.f32.mrf.mxu1 }
 0x168   : > { %v590_v32 = vpop.xlane.xlu0 %589 }
 0x169   : > { %v1813_v33 = vmax.f32 %v1810_v31, %v590_v32 }
 0x16b   : > { %v592_v34 = vsub.f32 %v1810_v31, %v1813_v33  ;;  %668 = vst.msk [vmem:[#allocation2] sm:$0xff] %vm504_vm2, %v1813_v33  ;;  %597 = vperm.xlu0 %1612, %v1813_v33  }
 0x18a   : > { %874 = vmax.xlane.f32.xlu0 %v873_v42 }
 0x1e6   : > { %v598_v43 = vpop.permute.xlu0 %597 }
 0x1e7   : > { %v600_v44 = vsub.f32 %v585_v22, %v598_v43 }
 0x1e9   : > { %v601_v45 = vmul.f32 1.442695, %v600_v44 }
 0x1eb   : > { %1624 = vpow2.f32 %v601_v45  ;;  %v593_v45 = vmul.f32 1.442695, %v592_v34 }
 0x1f8   : > { %v1625_v46 = vpop.eup %1624 }
 0x1f9   : > { %v618_v48 = vpack.c.bf16 %v1625_v46, %v1625_v46  ;;  %v605_v17 = vsel %vm587_vm4, %v1625_v46, 0.0 }
 0x1fb   : > { %1520 = vmatmul.mubr.msk.bf16.vlgmr.msra.gmra.mxu0 %vm587_vm4, %v618_v48 }
 0x1fc   : > { %1524 = vmatpush3.bf16.xpose.msra.mxu0 %v683_v47  ;;  %1525 = vmatprep.mubr.msk.bf16.mxu0 %vm1675_vm0, %v1674_v0 }
 0x1fd   : > { %1529 = vmatprep.subr.bf16.mxu0 %v1674_v0 }
 0x203   : > { %1526 = vmatmul.mubr.msk.bf16.vlgmr.msra.gmra.mxu0 %vm537_vm1, %v1793_v8  ;;  %v728_v8 = vld [vmem:[#allocation2 + $0x8] sm:$0xff] }
 0x204   : > { %1531 = vmatprep.mubr.msk.bf16.mxu0 %vm1675_vm0, %v1674_v0 }
 0x213   : > { %v875_v50 = vpop.xlane.xlu0 %874 }
 0x214   : > { %v1849_v51 = vmax.f32 %v1846_v49, %v875_v50 }
 0x216   : > { %v877_v52 = vsub.f32 %v1846_v49, %v1849_v51  ;;  %959 = vst.msk [vmem:[#allocation2 + $0x10] sm:$0xff] %vm504_vm2, %v1849_v51  ;;  %882 = vperm.xlu0 %1612, %v1849_v51  }
 0x218   : > { %v878_v46 = vmul.f32 1.442695, %v877_v52  ;;  %v745_v52 = vld [vmem:[#allocation3 + $0x8] sm:$0xff] }
 0x2bb   : > { %v1856_v57 = vpop.f32.mrf.mxu0 }
 0x2bd   : > { %v1521_v58 = vpop.f32.mrf.mxu0 }
 0x2bf   : > { %v663_v59 = vpop.f32.mrf.mxu0 }
 0x2c1   : > { %v1522_v60 = vpop.f32.mrf.mxu0 }
 0x2c2   : > { %v889_v60 = vld [vmem:[#allocation3 + $0x10] sm:$0xff] }
 0x2c3   : > { %v719_v62 = vpop.f32.mrf.mxu0 }
 0x2c4   : > { %v725_v63 = vmul.f32 0.17677669, %v719_v62 }
 0x2c5   : > { %v1527_v1 = vpop.f32.mrf.mxu0 }
 0x2c6   : > { %v726_v2 = vadd.f32 %v725_v63, %v1804_v18  ;;  %v883_v18 = vpop.permute.xlu0 %882  ;;  %v1030_v1 = vld [vmem:[#allocation3 + $0x18] sm:$0xff] }
 0x2c7   : > { %v722_v4 = vpop.f32.mrf.mxu0  ;;  %v885_v19 = vsub.f32 %v1829_v40, %v883_v18 }
 0x2c8   : > { %v729_v5 = vsel %vm587_vm4, %v726_v2, -inf }
 0x2c9   : > { %730 = vmax.xlane.f32.xlu1 %v729_v5  ;;  %v1528_v6 = vpop.f32.mrf.mxu0  ;;  %v886_v22 = vmul.f32 1.442695, %v885_v19 }
 0x2cd   : > { %1015 = vmax.xlane.f32.xlu1 %v1014_v7 }
 0x352   : > { %v731_v9 = vpop.xlane.xlu1 %730 }
 0x353   : > { %v732_v10 = vmax.f32 %v728_v8, %v731_v9 }
 0x355   : > { %v733_v12 = vsub.f32 %v728_v8, %v732_v10  ;;  %818 = vst.msk [vmem:[#allocation2 + $0x8] sm:$0xff] %vm504_vm2, %v732_v10  ;;  %738 = vperm.xlu1 %1613, %v732_v10  }
 0x356   : > { %v1016_v14 = vpop.xlane.xlu1 %1015 }
 0x357   : > { %v1017_v15 = vmax.f32 %v1013_v11, %v1016_v14  ;;  %v734_v41 = vmul.f32 1.442695, %v733_v12 }
 0x359   : > { %763 = vrot.lane.b32.xlu1 %v1467_v13, %s1676_s20  ;;  %v1018_v16 = vsub.f32 %v1013_v11, %v1017_v15  ;;  %1100 = vst.msk [vmem:[#allocation2 + $0x18] sm:$0xff] %vm504_vm2, %v1017_v15 }
 0x35b   : > { %v1019_v48 = vmul.f32 1.442695, %v1018_v16 }
 0x35d   : > { %1023 = vperm.xlu1 %1613, %v1017_v15  }
 0x361   : > { %904 = vrot.lane.b32.xlu1 %v1467_v13, %s1677_s21 }
 0x365   : > { %1045 = vrot.lane.b32.xlu1 %v1467_v13, %s1681_s25 }
 0x389   : > { %606 = vadd.xlane.f32.xlu1 %v605_v17 }
 0x3d0   : > { %v739_v20 = vpop.permute.xlu1 %738 }
 0x3d1   : > { %v741_v21 = vsub.f32 %v726_v2, %v739_v20 }
 0x3d3   : > { %v742_v23 = vmul.f32 1.442695, %v741_v21 }
 0x3d4   : > { %v764_v24 = vpop.permute.xlu1 %763 }
 0x3d5   : > { %1626 = vpow2.f32 %v742_v23  ;;  %v769_v25 = vsel %vm622_vm5, %v764_v24, 0 }
 0x3d6   : > { %1530 = vmatpush3.bf16.msra.mxu0 %v769_v25  ;;  %1628 = vpow2.f32 %v886_v22 }
 0x3d7   : > { %1541 = vmatprep.subr.bf16.mxu0 %v1674_v0 }
 0x3d8   : > { %v1024_v26 = vpop.permute.xlu1 %1023 }
 0x3d9   : > { %v1026_v27 = vsub.f32 %v1011_v3, %v1024_v26  ;;  %v1616_v26 = vld [vmem:[%s1967_s5 + $0x38] sm:$0xff]  }
 0x3da   : > { %1560 = vmatpush3.bf16.msra.mxu1 %v1616_v26 }
 0x3db   : > { %v1027_v28 = vmul.f32 1.442695, %v1026_v27  ;;  %1561 = vmatprep.subr.bf16.mxu1 %v1674_v0  ;;  %v1617_v27 = vld [vmem:[%s1967_s5 + $0x30] sm:$0xff]  }
 0x3dc   : > { %v905_v29 = vpop.permute.xlu1 %904 }
 0x3dd   : > { %1630 = vpow2.f32 %v1027_v28  ;;  %v910_v36 = vsel %vm622_vm5, %v905_v29, 0  ;;  %v1618_v28 = vld [vmem:[%s1967_s5 + $0x28] sm:$0xff]   ;;  %v1619_v29 = vld [vmem:[%s1967_s5 + $0x20] sm:$0xff]  }
 0x3de   : > { %1632 = vpow2.f32 %v734_v41  ;;  %1562 = vmatpush3.bf16.msra.mxu1 %v1617_v27 }
 0x3df   : > { %1634 = vpow2.f32 %v593_v45  ;;  %1563 = vmatprep.subr.bf16.mxu1 %v1674_v0 }
 0x3e0   : > { %v1046_v39 = vpop.permute.xlu1 %1045  ;;  %1636 = vpow2.f32 %v878_v46 }
 0x3e1   : > { %v1051_v44 = vsel %vm622_vm5, %v1046_v39, 0  ;;  %1638 = vpow2.f32 %v1019_v48 }
 0x3e2   : > { %v1627_v30 = vpop.eup %1626  ;;  %1564 = vmatpush3.bf16.msra.mxu1 %v1618_v28 }
 0x3e3   : > { %v747_v32 = vsel %vm587_vm4, %v1627_v30, 0.0  ;;  %v759_v35 = vpack.c.bf16 %v1627_v30, %v1627_v30  ;;  %v1629_v37 = vpop.eup %1628  ;;  %1565 = vmatprep.subr.bf16.mxu1 %v1674_v0  ;;  %v1620_v30 = vld [vmem:[%s1967_s5 + $0x18] sm:$0xff]  }
 0x3e4   : > { %748 = vadd.xlane.f32.xlu0 %v747_v32  ;;  %v891_v38 = vsel %vm587_vm4, %v1629_v37, 0.0  ;;  %v903_v43 = vpack.c.bf16 %v1629_v37, %v1629_v37  ;;  %v1621_v32 = vld [vmem:[%s1967_s5 + $0x10] sm:$0xff]  }
 0x3e5   : > { %1532 = vmatmul.mubr.msk.bf16.vlgmr.msra.gmra.mxu0 %vm587_vm4, %v759_v35  ;;  %v1622_v35 = vld [vmem:[%s1967_s5 + $0x8] sm:$0xff]  }
 0x3e6   : > { %1542 = vmatpush3.bf16.msra.mxu0 %v910_v36  ;;  %1543 = vmatprep.mubr.msk.bf16.mxu0 %vm1675_vm0, %v1674_v0  ;;  %v1623_v36 = vld [vmem:[%s1967_s5] sm:$0xff]  }
 0x3e7   : > { %1553 = vmatprep.subr.bf16.mxu0 %v1674_v0  ;;  %1566 = vmatpush3.bf16.msra.mxu1 %v1619_v29 }
 0x3e8   : > { %892 = vadd.xlane.f32.xlu0 %v891_v38  ;;  %1567 = vmatprep.subr.bf16.mxu1 %v1674_v0 }
 0x3ea   : > { %v1631_v40 = vpop.eup %1630 }
 0x3eb   : > { %v1032_v42 = vsel %vm587_vm4, %v1631_v40, 0.0  ;;  %v1044_v47 = vpack.c.bf16 %v1631_v40, %v1631_v40  ;;  %v1633_v31 = vpop.eup %1632  ;;  %1568 = vmatpush3.bf16.msra.mxu1 %v1620_v30 }
 0x3ec   : > { %1033 = vadd.xlane.f32.xlu1 %v1032_v42  ;;  %v1635_v33 = vpop.eup %1634  ;;  %v746_v58 = vmul.f32 %v1633_v31, %v745_v52  ;;  %1569 = vmatprep.subr.bf16.mxu1 %v1674_v0 }
 0x3ed   : > { %1544 = vmatmul.mubr.msk.bf16.vlgmr.msra.gmra.mxu0 %vm587_vm4, %v903_v43  ;;  %v1637_v34 = vpop.eup %1636  ;;  %v604_v54 = vmul.f32 %v1635_v33, %v603_v53 }
 0x3ee   : > { %1554 = vmatpush3.bf16.msra.mxu0 %v1051_v44  ;;  %1555 = vmatprep.mubr.msk.bf16.mxu0 %vm1675_vm0, %v1674_v0  ;;  %v1639_v50 = vpop.eup %1638  ;;  %v890_v62 = vmul.f32 %v1637_v34, %v889_v60 }
 0x3ef   : > { %v1031_v3 = vmul.f32 %v1639_v50, %v1030_v1  ;;  %1570 = vmatpush3.bf16.msra.mxu1 %v1621_v32 }
 0x3f0   : > { %1571 = vmatprep.subr.bf16.mxu1 %v1674_v0 }
 0x3f3   : > { %1572 = vmatpush3.bf16.msra.mxu1 %v1622_v35 }
 0x3f4   : > { %1573 = vmatprep.subr.bf16.mxu1 %v1674_v0 }
 0x3f5   : > { %1556 = vmatmul.mubr.msk.bf16.vlgmr.msra.gmra.mxu0 %vm587_vm4, %v1044_v47 }
 0x3f7   : > { %1574 = vmatpush3.bf16.msra.mxu1 %v1623_v36 }
 0x3fd   : > { %755 = vperm.xlu1 %1613, %v1633_v31  }
 0x3fe   : > { %614 = vperm.xlu0 %1612, %v1635_v33  }
 0x402   : > { %899 = vperm.xlu0 %1612, %v1637_v34  }
 0x406   : > { %1040 = vperm.xlu0 %1612, %v1639_v50  }
 0x412   : > { %v607_v55 = vpop.xlane.xlu1 %606 }
 0x413   : > { %v608_v56 = vadd.f32 %v607_v55, %v604_v54 }
 0x415   : > { %610 = vst.msk [vmem:[#allocation3] sm:$0xff] %vm504_vm2, %v608_v56 }
 0x41c   : > { %v1104_v49 = vld [vmem:[#allocation3] sm:$0xff] }
 0x41d   : > { %1640 = vrcp.f32 %v1104_v49 }
 0x42a   : > { %v1641_v51 = vpop.eup %1640 }
 0x42b   : > { %1109 = vperm.xlu0 %1612, %v1641_v51  }
 0x46d   : > { %v749_v59 = vpop.xlane.xlu0 %748 }
 0x46e   : > { %v750_v61 = vadd.f32 %v749_v59, %v746_v58 }
 0x470   : > { %751 = vst.msk [vmem:[#allocation3 + $0x8] sm:$0xff] %vm504_vm2, %v750_v61 }
 0x471   : > { %v893_v63 = vpop.xlane.xlu0 %892 }
 0x472   : > { %v894_v2 = vadd.f32 %v893_v63, %v890_v62  ;;  %v1250_v63 = vld [vmem:[%s456_s14] sm:$0xf] }
 0x473   : > { %v1251_v1 = vunpack.c.l.bf16 %v1250_v63 }
 0x474   : > { %895 = vst.msk [vmem:[#allocation3 + $0x10] sm:$0xff] %vm504_vm2, %v894_v2 }
 0x475   : > { %v1034_v4 = vpop.xlane.xlu1 %1033 }
 0x476   : > { %v1035_v5 = vadd.f32 %v1034_v4, %v1031_v3  ;;  %v1481_v3 = vld [vmem:[%s1968_s6] ss:$0 sm:$0xff] }
 0x477   : > { %v1114_v14 = vld [vmem:[#allocation3 + $0x8] sm:$0xff] }
 0x478   : > { %1036 = vst.msk [vmem:[#allocation3 + $0x18] sm:$0xff] %vm504_vm2, %v1035_v5 }
 0x479   : > { %v615_v6 = vpop.permute.xlu0 %614  ;;  %v756_v38 = vpop.permute.xlu1 %755 }
 0x47a   : > { %v617_v7 = vmul.f32 0.0, %v615_v6 }
 0x47b   : > { %v1124_v8 = vld [vmem:[#allocation3 + $0x10] sm:$0xff] }
 0x47c   : > { %v666_v9 = vadd.f32 %v1856_v57, %v617_v7  ;;  %1642 = vrcp.f32 %v1124_v8 }
 0x47d   : > { %1644 = vrcp.f32 %v1114_v14  ;;  %v900_v42 = vpop.permute.xlu0 %899 }
 0x47e   : > { %667 = vst.msk [vmem:[#allocation4] sm:$0xff] %vm537_vm1, %v666_v9 }
 0x47f   : > { %v1134_v17 = vld [vmem:[#allocation3 + $0x18] sm:$0xff] }
 0x480   : > { %1646 = vrcp.f32 %v1134_v17  ;;  %v1482_v17 = vld [vmem:[%s1969_s7] ss:$0 sm:$0xff] }
 0x481   : > { %v1041_v47 = vpop.permute.xlu0 %1040 }
 0x485   : > { %v752_v37 = vld [vmem:[#allocation4] sm:$0xff] }
 0x486   : > { %v758_v39 = vmul.f32 %v756_v38, %v752_v37 }
 0x489   : > { %v1643_v10 = vpop.eup %1642 }
 0x48a   : > { %1129 = vperm.xlu0 %1612, %v1643_v10   ;;  %v1645_v22 = vpop.eup %1644 }
 0x48d   : > { %v1647_v25 = vpop.eup %1646 }
 0x4a5   : > { %v805_v11 = vpop.f32.mrf.mxu0 }
 0x4a6   : > { %812 = vrot.lane.b32.xlu1 %v805_v11, %s1681_s25  ;;  %v1110_v34 = vpop.permute.xlu0 %1109 }
 0x4a7   : > { %v1533_v12 = vpop.f32.mrf.mxu0 }
 0x4a9   : > { %v808_v13 = vpop.f32.mrf.mxu0 }
 0x4ab   : > { %v1534_v15 = vpop.f32.mrf.mxu0 }
 0x4ad   : > { %v946_v16 = vpop.f32.mrf.mxu0 }
 0x4ae   : > { %953 = vrot.lane.b32.xlu1 %v946_v16, %s1677_s21 }
 0x4af   : > { %v1545_v18 = vpop.f32.mrf.mxu0 }
 0x4b1   : > { %v949_v57 = vpop.f32.mrf.mxu0 }
 0x4b2   : > { %v1483_v57 = vld [vmem:[%s1970_s8] ss:$0 sm:$0xff] }
 0x4b3   : > { %v1546_v19 = vpop.f32.mrf.mxu0 }
 0x4b5   : > { %v1087_v20 = vpop.f32.mrf.mxu0 }
 0x4b6   : > { %1094 = vrot.lane.b32.xlu1 %v1087_v20, %s1676_s20 }
 0x4b7   : > { %v1557_v21 = vpop.f32.mrf.mxu0 }
 0x4b9   : > { %v1090_v23 = vpop.f32.mrf.mxu0 }
 0x4ba   : > { %1119 = vperm.xlu1 %1613, %v1645_v22  }
 0x4bb   : > { %v1558_v24 = vpop.f32.mrf.mxu0 }
 0x4be   : > { %1139 = vperm.xlu1 %1613, %v1647_v25  }
 0x505   : > { %v1130_v49 = vpop.permute.xlu0 %1129 }
 0x518   : > { %v813_v40 = vpop.permute.xlu1 %812 }
 0x519   : > { %v815_v41 = vadd.f32 %v813_v40, %v758_v39 }
 0x51b   : > { %817 = vst.msk [vmem:[#allocation4] sm:$0xff] %vm816_vm6, %v815_v41 }
 0x520   : > { %v954_v45 = vpop.permute.xlu1 %953 }
 0x522   : > { %v896_v43 = vld [vmem:[#allocation4] sm:$0xff] }
 0x523   : > { %v902_v44 = vmul.f32 %v900_v42, %v896_v43 }
 0x525   : > { %v956_v46 = vadd.f32 %v954_v45, %v902_v44 }
 0x527   : > { %958 = vst.msk [vmem:[#allocation4] sm:$0xff] %vm957_vm7, %v956_v46 }
 0x528   : > { %v1095_v31 = vpop.permute.xlu1 %1094 }
 0x52e   : > { %v1037_v48 = vld [vmem:[#allocation4] sm:$0xff] }
 0x52f   : > { %v1043_v0 = vmul.f32 %v1041_v47, %v1037_v48 }
 0x531   : > { %v1097_v33 = vadd.f32 %v1095_v31, %v1043_v0 }
 0x533   : > { %1099 = vst.msk [vmem:[#allocation4] sm:$0xff] %vm1098_vm8, %v1097_v33 }
 0x535   : > { %v1120_v55 = vpop.permute.xlu1 %1119 }
 0x539   : > { %v1140_v59 = vpop.permute.xlu1 %1139 }
 0x53a   : > { %v1106_v50 = vld [vmem:[#allocation4] sm:$0xff] }
 0x53b   : > { %v1112_v53 = vmul.f32 %v1110_v34, %v1106_v50 }
 0x53d   : > { %1113 = vst.msk [vmem:[#allocation4] sm:$0xff] %vm537_vm1, %v1112_v53 }
 0x544   : > { %v1116_v54 = vld [vmem:[#allocation4] sm:$0xff] }
 0x545   : > { %v1122_v56 = vmul.f32 %v1120_v55, %v1116_v54 }
 0x547   : > { %1123 = vst.msk [vmem:[#allocation4] sm:$0xff] %vm816_vm6, %v1122_v56 }
 0x54e   : > { %v1126_v51 = vld [vmem:[#allocation4] sm:$0xff] }
 0x54f   : > { %v1132_v52 = vmul.f32 %v1130_v49, %v1126_v51 }
 0x551   : > { %1133 = vst.msk [vmem:[#allocation4] sm:$0xff] %vm957_vm7, %v1132_v52 }
 0x558   : > { %v1136_v58 = vld [vmem:[#allocation4] sm:$0xff] }
 0x559   : > { %v1142_v60 = vmul.f32 %v1140_v59, %v1136_v58 }
 0x55b   : > { %1143 = vst.msk [vmem:[#allocation4] sm:$0xff] %vm1098_vm8, %v1142_v60 }
 0x562   : > { %v1144_v61 = vld [vmem:[#allocation4] sm:$0xff] }
 0x563   : > { %v1145_v62 = vpack.c.bf16 %v1144_v61, %v1144_v61 }
 0x565   : > { %1576 = vmatmul.mubr.bf16.vlgmr.msra.gmra.mxu1 %v1145_v62 }
 0x625   : > { %v1244_v2 = vpop.f32.mrf.mxu1 }
 0x626   : > { %v1252_v4 = vadd.f32 %v1251_v1, %v1244_v2 }
 0x627   : > { %v1577_v5 = vpop.f32.mrf.mxu1 }
 0x628   : > { %v1260_v6 = vadd.f32 %v1481_v3, %v1252_v4 }
 0x629   : > { %v1247_v7 = vpop.f32.mrf.mxu1 }
 0x62a   : > { %1261 = vadd.xlane.f32.xlu0 %v1260_v6 }
 0x62b   : > { %v1578_v8 = vpop.f32.mrf.mxu1 }
 0x6b3   : > { %v1262_v9 = vpop.xlane.xlu0 %1261 }
 0x6b4   : > { %v1264_v10 = vmul.f32 0.0078125, %v1262_v9 }
 0x6b6   : > { %v1265_v11 = vsub.f32 %v1260_v6, %v1264_v10 }
 0x6b8   : > { %v1266_v12 = vmul.f32 %v1265_v11, %v1265_v11 }
 0x6ba   : > { %1267 = vadd.xlane.f32.xlu1 %v1266_v12 }
 0x743   : > { %v1268_v13 = vpop.xlane.xlu1 %1267 }
 0x744   : > { %v1269_v14 = vmul.f32 0.0078125, %v1268_v13 }
 0x746   : > { %v1270_v15 = vadd.f32 1e-05, %v1269_v14 }
 0x748   : > { %1648 = vrsqrt.f32 %v1270_v15 }
 0x755   : > { %v1649_v16 = vpop.eup %1648 }
 0x756   : > { %v1272_v18 = vmul.f32 %v1649_v16, %v1265_v11 }
 0x758   : > { %v1280_v19 = vmul.f32 %v1482_v17, %v1272_v18 }
 0x75a   : > { %v1288_v20 = vadd.f32 %v1483_v57, %v1280_v19 }
 0x75c   : > { %v1289_v21 = vpack.c.bf16 %v1288_v20, %v1288_v20 }
 0x75e   : > { %1290 = vst [vmem:[%s498_s22] sm:$0xf] %v1289_v21 }
 0x75f PF: > { %s19_s11 = sadd.s32 1, %s1672_s11   ;;  %s1972_s30 = smov %s1668_s10 }
 0x760   : > { %p16_p5 = scmp.ge.s32.totalorder %s19_s11, 4   ;;  %s1973_s10 = smov %s1975_s12 }
 0x762   :  { %18 = sbr.rel (!%p16_p5) target bundleno = 2 (0x2), region = 112 }

// kernel: transformer_forward.25
= control target key start
LH: loop header
LB: loop body
LE: loop exit
PB: predicated region body
PF: predicated region fallthrough
CT: control target
= control target key end

     0   :  { %v274_v1 = vmov 0   ;;  %v191_v18 = vlaneseq  ;;  %s355_s1 = inlined_call_operand.vmem [shape: bf16[128,256], index: 1, kind: input, shape index: {}]   ;;  %s356_s0 = inlined_call_operand.vmem [shape: bf16[16,128], index: 0, kind: input, shape index: {}]   ;;  %s357_s2 = inlined_call_operand.vmem [shape: f32[1,256], index: 2, kind: input, shape index: {}]   ;;  %s358_s3 = inlined_call_operand.vmem [shape: bf16[16,256], index: 3, kind: output, shape index: {}]  }
   0x1   :  { %v249_v0 = vld [vmem:[%s355_s1 + $0x74] ss:$8 sps:$4 sm:$0xff]   ;;  %163 = vmatprep.mubr.bf16.mxu0 %v274_v1  ;;  %v251_v2 = vld [vmem:[%s355_s1 + $0x70] ss:$8 sps:$4 sm:$0xff]   ;;  %v252_v3 = vld [vmem:[%s355_s1 + $0x64] ss:$8 sps:$4 sm:$0xff]  }
   0x2   :  { %131 = vmatprep.subr.bf16.mxu0 %v249_v0  ;;  %v254_v4 = vld [vmem:[%s355_s1 + $0x60] ss:$8 sps:$4 sm:$0xff]   ;;  %v255_v5 = vld [vmem:[%s355_s1 + $0x54] ss:$8 sps:$4 sm:$0xff]   ;;  %v257_v6 = vld [vmem:[%s355_s1 + $0x50] ss:$8 sps:$4 sm:$0xff]  }
   0x3   :  { %132 = vmatpush1.bf16.msra.mxu0 %v251_v2  ;;  %v258_v7 = vld [vmem:[%s355_s1 + $0x44] ss:$8 sps:$4 sm:$0xff]   ;;  %v260_v8 = vld [vmem:[%s355_s1 + $0x40] ss:$8 sps:$4 sm:$0xff]   ;;  %v261_v9 = vld [vmem:[%s355_s1 + $0x34] ss:$8 sps:$4 sm:$0xff]  }
   0x4   :  { %133 = vmatprep.subr.bf16.mxu0 %v252_v3  ;;  %v263_v10 = vld [vmem:[%s355_s1 + $0x30] ss:$8 sps:$4 sm:$0xff]   ;;  %v264_v11 = vld [vmem:[%s355_s1 + $0x24] ss:$8 sps:$4 sm:$0xff]   ;;  %v266_v12 = vld [vmem:[%s355_s1 + $0x20] ss:$8 sps:$4 sm:$0xff]  }
   0x5   :  { %v267_v13 = vld [vmem:[%s355_s1 + $0x14] ss:$8 sps:$4 sm:$0xff]   ;;  %v269_v14 = vld [vmem:[%s355_s1 + $0x10] ss:$8 sps:$4 sm:$0xff]   ;;  %v270_v15 = vld [vmem:[%s355_s1 + $0x4] ss:$8 sps:$4 sm:$0xff]  }
   0x6   :  { %v272_v16 = vld [vmem:[%s355_s1] ss:$8 sps:$4 sm:$0xff]   ;;  %v192_v19 = vshrl.u32 %v191_v18, 7 }
   0x7   :  { %134 = vmatpush1.bf16.msra.mxu0 %v254_v4  ;;  %v273_v17 = vld [vmem:[%s356_s0] sm:$0xff]  }
   0x8   :  { %135 = vmatprep.subr.bf16.mxu0 %v255_v5  ;;  %v193_v20 = vsub.s32 0, %v192_v19  ;;  %v189_v21 = vld [vmem:[%s357_s2] sm:$0x3]  ;;  %v197_v22 = vsub.s32 1, %v192_v19 }
   0xa   :  { %v194_v23 = vrot.slane %v189_v21, %v193_v20  ;;  %v198_v24 = vrot.slane %v189_v21, %v197_v22 }
   0xb   :  { %136 = vmatpush1.bf16.msra.mxu0 %v257_v6 }
   0xc   :  { %137 = vmatprep.subr.bf16.mxu0 %v258_v7 }
   0xf   :  { %138 = vmatpush1.bf16.msra.mxu0 %v260_v8 }
  0x10   :  { %139 = vmatprep.subr.bf16.mxu0 %v261_v9 }
  0x13   :  { %140 = vmatpush1.bf16.msra.mxu0 %v263_v10 }
  0x14   :  { %141 = vmatprep.subr.bf16.mxu0 %v264_v11 }
  0x17   :  { %142 = vmatpush1.bf16.msra.mxu0 %v266_v12 }
  0x18   :  { %143 = vmatprep.subr.bf16.mxu0 %v267_v13 }
  0x1b   :  { %144 = vmatpush1.bf16.msra.mxu0 %v269_v14 }
  0x1c   :  { %145 = vmatprep.subr.bf16.mxu0 %v270_v15 }
  0x1f   :  { %146 = vmatpush1.bf16.msra.mxu0 %v272_v16 }
  0x22   :  { %164 = vmatmul.mubr.bf16.vlgmr.msra.gmra.mxu0 %v273_v17 }
  0xe2   :  { %v165_v25 = vpop.f32.mrf.mxu0 }
  0xe3   :  { %v201_v26 = vadd.f32 %v194_v23, %v165_v25 }
  0xe4   :  { %v167_v27 = vpop.f32.mrf.mxu0 }
  0xe5   :  { %v202_v28 = vadd.f32 %v198_v24, %v167_v27  ;;  %v205_v30 = vmax.f32 %v201_v26, 0.0 }
  0xe6   :  { %v169_v29 = vpop.f32.mrf.mxu0 }
  0xe7   :  { %v206_v31 = vmax.f32 %v202_v28, 0.0  ;;  %v203_v32 = vadd.f32 %v194_v23, %v169_v29 }
  0xe8   :  { %v171_v33 = vpop.f32.mrf.mxu0 }
  0xe9   :  { %v246_v34 = vpack.c.bf16 %v206_v31, %v205_v30  ;;  %v204_v35 = vadd.f32 %v198_v24, %v171_v33  ;;  %v207_v36 = vmax.f32 %v203_v32, 0.0 }
  0xeb   :  { %221 = vst [vmem:[%s358_s3] sm:$0xff] %v246_v34  ;;  %v208_v37 = vmax.f32 %v204_v35, 0.0 }
  0xed   :  { %v247_v38 = vpack.c.bf16 %v208_v37, %v207_v36 }
  0xef   :  { %222 = vst [vmem:[%s358_s3 + $0x8] sm:$0xff] %v247_v38 }

// kernel: transformer_forward.26
= control target key start
LH: loop header
LB: loop body
LE: loop exit
PB: predicated region body
PF: predicated region fallthrough
CT: control target
= control target key end

     0   :  { %s475_s2 = inlined_call_operand.vmem [shape: bf16[256,128], index: 2, kind: input, shape index: {}]   ;;  %s476_s1 = inlined_call_operand.vmem [shape: bf16[16,256], index: 1, kind: input, shape index: {}]   ;;  %s477_s0 = inlined_call_operand.vmem [shape: bf16[16,128], index: 0, kind: input, shape index: {}]   ;;  %s478_s3 = inlined_call_operand.vmem [shape: f32[1,128], index: 3, kind: input, shape index: {}]   ;;  %s479_s4 = inlined_call_operand.vmem [shape: f32[1,128], index: 4, kind: input, shape index: {}]   ;;  %s480_s5 = inlined_call_operand.vmem [shape: f32[1,128], index: 5, kind: input, shape index: {}]   ;;  %s481_s6 = inlined_call_operand.vmem [shape: bf16[16,128], index: 6, kind: output, shape index: {}]  }
   0x1   :  { %v348_v0 = vld [vmem:[%s475_s2 + $0x78] sm:$0xff]   ;;  %v350_v2 = vld [vmem:[%s475_s2 + $0x70] sm:$0xff]   ;;  %v352_v4 = vld [vmem:[%s475_s2 + $0x68] sm:$0xff]  }
   0x2   :  { %v349_v1 = vld [vmem:[%s475_s2 + $0x38] sm:$0xff]   ;;  %326 = vmatprep.subr.bf16.mxu0 %v348_v0  ;;  %v351_v3 = vld [vmem:[%s475_s2 + $0x30] sm:$0xff]   ;;  %v353_v5 = vld [vmem:[%s475_s2 + $0x28] sm:$0xff]  }
   0x3   :  { %327 = vmatpush3.bf16.msra.mxu0 %v349_v1  ;;  %v354_v6 = vld [vmem:[%s475_s2 + $0x60] sm:$0xff]   ;;  %v356_v8 = vld [vmem:[%s475_s2 + $0x58] sm:$0xff]   ;;  %v358_v10 = vld [vmem:[%s475_s2 + $0x50] sm:$0xff]  }
   0x4   :  { %328 = vmatprep.subr.bf16.mxu0 %v350_v2  ;;  %v355_v7 = vld [vmem:[%s475_s2 + $0x20] sm:$0xff]   ;;  %v357_v9 = vld [vmem:[%s475_s2 + $0x18] sm:$0xff]   ;;  %v359_v12 = vld [vmem:[%s475_s2 + $0x10] sm:$0xff]  }
   0x5   :  { %v366_v11 = vld [vmem:[%s476_s1 + $0x4] ss:$8 sps:$4 sm:$0xff]   ;;  %v364_v17 = vld [vmem:[%s476_s1] ss:$8 sps:$4 sm:$0xff]  }
   0x6   :  { %204 = vmatprep.mubr.bf16.mxu0 %v366_v11  ;;  %v360_v13 = vld [vmem:[%s475_s2 + $0x48] sm:$0xff]   ;;  %v362_v15 = vld [vmem:[%s475_s2 + $0x40] sm:$0xff]  }
   0x7   :  { %329 = vmatpush3.bf16.msra.mxu0 %v351_v3  ;;  %v361_v14 = vld [vmem:[%s475_s2 + $0x8] sm:$0xff]   ;;  %v363_v16 = vld [vmem:[%s475_s2] sm:$0xff]  }
   0x8   :  { %330 = vmatprep.subr.bf16.mxu0 %v352_v4  ;;  %v318_v18 = vld [vmem:[%s477_s0] sm:$0xff]  }
   0x9   :  { %v319_v20 = vunpack.c.l.bf16 %v318_v18  ;;  %v310_v24 = vld [vmem:[%s478_s3] ss:$0 sm:$0xff]  ;;  %v320_v26 = vunpack.c.h.bf16 %v318_v18 }
   0xa   :  { %v311_v48 = vld [vmem:[%s479_s4] ss:$0 sm:$0xff] }
   0xb   :  { %331 = vmatpush3.bf16.msra.mxu0 %v353_v5  ;;  %v312_v52 = vld [vmem:[%s480_s5] ss:$0 sm:$0xff] }
   0xc   :  { %332 = vmatprep.subr.bf16.mxu0 %v354_v6 }
   0xf   :  { %333 = vmatpush3.bf16.msra.mxu0 %v355_v7 }
  0x10   :  { %334 = vmatprep.subr.bf16.mxu0 %v356_v8 }
  0x13   :  { %335 = vmatpush3.bf16.msra.mxu0 %v357_v9 }
  0x14   :  { %336 = vmatprep.subr.bf16.mxu0 %v358_v10 }
  0x17   :  { %337 = vmatpush3.bf16.msra.mxu0 %v359_v12 }
  0x18   :  { %338 = vmatprep.subr.bf16.mxu0 %v360_v13 }
  0x1b   :  { %339 = vmatpush3.bf16.msra.mxu0 %v361_v14 }
  0x1c   :  { %340 = vmatprep.subr.bf16.mxu0 %v362_v15 }
  0x1f   :  { %341 = vmatpush3.bf16.msra.mxu0 %v363_v16 }
  0x22   :  { %205 = vmatmul.mubr.bf16.vlgmr.msra.gmra.mxu0 %v364_v17 }
  0xe2   :  { %v342_v19 = vpop.f32.mrf.mxu0 }
  0xe4   :  { %v343_v21 = vpop.f32.mrf.mxu0 }
  0xe5   :  { %v344_v22 = vadd.f32 %v343_v21, %v342_v19 }
  0xe6   :  { %v345_v23 = vpop.f32.mrf.mxu0 }
  0xe7   :  { %v226_v25 = vadd.f32 %v344_v22, %v319_v20 }
  0xe8   :  { %v346_v27 = vpop.f32.mrf.mxu0 }
  0xe9   :  { %v347_v28 = vadd.f32 %v346_v27, %v345_v23  ;;  %v235_v29 = vadd.f32 %v310_v24, %v226_v25 }
  0xeb   :  { %v227_v30 = vadd.f32 %v347_v28, %v320_v26  ;;  %237 = vadd.xlane.f32.xlu0 %v235_v29 }
  0xed   :  { %v236_v31 = vadd.f32 %v310_v24, %v227_v30 }
  0xef   :  { %239 = vadd.xlane.f32.xlu0 %v236_v31 }
 0x174   :  { %v238_v32 = vpop.xlane.xlu0 %237 }
 0x175   :  { %v242_v33 = vmul.f32 0.0078125, %v238_v32 }
 0x177   :  { %v244_v34 = vsub.f32 %v235_v29, %v242_v33 }
 0x178   :  { %v240_v35 = vpop.xlane.xlu0 %239 }
 0x179   :  { %v243_v36 = vmul.f32 0.0078125, %v240_v35  ;;  %v246_v37 = vmul.f32 %v244_v34, %v244_v34 }
 0x17b   :  { %v245_v38 = vsub.f32 %v236_v31, %v243_v36  ;;  %248 = vadd.xlane.f32.xlu1 %v246_v37 }
 0x17d   :  { %v247_v39 = vmul.f32 %v245_v38, %v245_v38 }
 0x17f   :  { %250 = vadd.xlane.f32.xlu1 %v247_v39 }
 0x204   :  { %v249_v40 = vpop.xlane.xlu1 %248 }
 0x205   :  { %v252_v41 = vmul.f32 0.0078125, %v249_v40 }
 0x207   :  { %v254_v42 = vadd.f32 1e-05, %v252_v41 }
 0x208   :  { %v251_v43 = vpop.xlane.xlu1 %250 }
 0x209   :  { %367 = vrsqrt.f32 %v254_v42  ;;  %v253_v44 = vmul.f32 0.0078125, %v251_v43 }
 0x20b   :  { %v255_v45 = vadd.f32 1e-05, %v253_v44 }
 0x20d   :  { %369 = vrsqrt.f32 %v255_v45 }
 0x216   :  { %v368_v46 = vpop.eup %367 }
 0x217   :  { %v258_v47 = vmul.f32 %v368_v46, %v244_v34 }
 0x219   :  { %v267_v50 = vmul.f32 %v311_v48, %v258_v47 }
 0x21a   :  { %v370_v49 = vpop.eup %369 }
 0x21b   :  { %v259_v51 = vmul.f32 %v370_v49, %v245_v38  ;;  %v276_v54 = vadd.f32 %v312_v52, %v267_v50 }
 0x21d   :  { %v268_v53 = vmul.f32 %v311_v48, %v259_v51 }
 0x21f   :  { %v277_v55 = vadd.f32 %v312_v52, %v268_v53 }
 0x221   :  { %v324_v56 = vpack.c.bf16 %v277_v55, %v276_v54 }
 0x223   :  { %325 = vst [vmem:[%s481_s6] sm:$0xff] %v324_v56  }

// kernel: transformer_forward.34
= control target key start
LH: loop header
LB: loop body
LE: loop exit
PB: predicated region body
PF: predicated region fallthrough
CT: control target
= control target key end

     0   :  { %v270_v1 = vmov 0   ;;  %v191_v18 = vlaneseq  ;;  %s351_s1 = inlined_call_operand.vmem [shape: bf16[128,256], index: 1, kind: input, shape index: {}]   ;;  %s352_s0 = inlined_call_operand.vmem [shape: bf16[16,128], index: 0, kind: input, shape index: {}]   ;;  %s353_s2 = inlined_call_operand.vmem [shape: f32[1,256], index: 2, kind: input, shape index: {}]   ;;  %s354_s3 = inlined_call_operand.vmem [shape: bf16[16,256], index: 3, kind: output, shape index: {}]  }
   0x1   :  { %v245_v0 = vld [vmem:[%s351_s1 + $0x74] ss:$8 sps:$4 sm:$0xff]   ;;  %163 = vmatprep.mubr.bf16.mxu0 %v270_v1  ;;  %v247_v2 = vld [vmem:[%s351_s1 + $0x70] ss:$8 sps:$4 sm:$0xff]   ;;  %v248_v3 = vld [vmem:[%s351_s1 + $0x64] ss:$8 sps:$4 sm:$0xff]  }
   0x2   :  { %131 = vmatprep.subr.bf16.mxu0 %v245_v0  ;;  %v250_v4 = vld [vmem:[%s351_s1 + $0x60] ss:$8 sps:$4 sm:$0xff]   ;;  %v251_v5 = vld [vmem:[%s351_s1 + $0x54] ss:$8 sps:$4 sm:$0xff]   ;;  %v253_v6 = vld [vmem:[%s351_s1 + $0x50] ss:$8 sps:$4 sm:$0xff]  }
   0x3   :  { %132 = vmatpush1.bf16.msra.mxu0 %v247_v2  ;;  %v254_v7 = vld [vmem:[%s351_s1 + $0x44] ss:$8 sps:$4 sm:$0xff]   ;;  %v256_v8 = vld [vmem:[%s351_s1 + $0x40] ss:$8 sps:$4 sm:$0xff]   ;;  %v257_v9 = vld [vmem:[%s351_s1 + $0x34] ss:$8 sps:$4 sm:$0xff]  }
   0x4   :  { %133 = vmatprep.subr.bf16.mxu0 %v248_v3  ;;  %v259_v10 = vld [vmem:[%s351_s1 + $0x30] ss:$8 sps:$4 sm:$0xff]   ;;  %v260_v11 = vld [vmem:[%s351_s1 + $0x24] ss:$8 sps:$4 sm:$0xff]   ;;  %v262_v12 = vld [vmem:[%s351_s1 + $0x20] ss:$8 sps:$4 sm:$0xff]  }
   0x5   :  { %v263_v13 = vld [vmem:[%s351_s1 + $0x14] ss:$8 sps:$4 sm:$0xff]   ;;  %v265_v14 = vld [vmem:[%s351_s1 + $0x10] ss:$8 sps:$4 sm:$0xff]   ;;  %v266_v15 = vld [vmem:[%s351_s1 + $0x4] ss:$8 sps:$4 sm:$0xff]  }
   0x6   :  { %v268_v16 = vld [vmem:[%s351_s1] ss:$8 sps:$4 sm:$0xff]   ;;  %v192_v19 = vshrl.u32 %v191_v18, 7 }
   0x7   :  { %134 = vmatpush1.bf16.msra.mxu0 %v250_v4  ;;  %v269_v17 = vld [vmem:[%s352_s0] sm:$0xff]  }
   0x8   :  { %135 = vmatprep.subr.bf16.mxu0 %v251_v5  ;;  %v193_v20 = vsub.s32 0, %v192_v19  ;;  %v197_v21 = vsub.s32 1, %v192_v19  ;;  %v189_v22 = vld [vmem:[%s353_s2] sm:$0x3] }
   0xa   :  { %v194_v23 = vrot.slane %v189_v22, %v193_v20  ;;  %v198_v24 = vrot.slane %v189_v22, %v197_v21 }
   0xb   :  { %136 = vmatpush1.bf16.msra.mxu0 %v253_v6 }
   0xc   :  { %137 = vmatprep.subr.bf16.mxu0 %v254_v7 }
   0xf   :  { %138 = vmatpush1.bf16.msra.mxu0 %v256_v8 }
  0x10   :  { %139 = vmatprep.subr.bf16.mxu0 %v257_v9 }
  0x13   :  { %140 = vmatpush1.bf16.msra.mxu0 %v259_v10 }
  0x14   :  { %141 = vmatprep.subr.bf16.mxu0 %v260_v11 }
  0x17   :  { %142 = vmatpush1.bf16.msra.mxu0 %v262_v12 }
  0x18   :  { %143 = vmatprep.subr.bf16.mxu0 %v263_v13 }
  0x1b   :  { %144 = vmatpush1.bf16.msra.mxu0 %v265_v14 }
  0x1c   :  { %145 = vmatprep.subr.bf16.mxu0 %v266_v15 }
  0x1f   :  { %146 = vmatpush1.bf16.msra.mxu0 %v268_v16 }
  0x22   :  { %164 = vmatmul.mubr.bf16.vlgmr.msra.gmra.mxu0 %v269_v17 }
  0xe2   :  { %v165_v25 = vpop.f32.mrf.mxu0 }
  0xe3   :  { %v201_v27 = vadd.f32 %v194_v23, %v165_v25 }
  0xe4   :  { %v167_v26 = vpop.f32.mrf.mxu0 }
  0xe5   :  { %v202_v28 = vadd.f32 %v198_v24, %v167_v26 }
  0xe6   :  { %v169_v29 = vpop.f32.mrf.mxu0 }
  0xe7   :  { %v242_v30 = vpack.c.bf16 %v202_v28, %v201_v27  ;;  %v203_v32 = vadd.f32 %v194_v23, %v169_v29 }
  0xe8   :  { %v171_v31 = vpop.f32.mrf.mxu0 }
  0xe9   :  { %217 = vst [vmem:[%s354_s3] sm:$0xff] %v242_v30  ;;  %v204_v33 = vadd.f32 %v198_v24, %v171_v31 }
  0xeb   :  { %v243_v34 = vpack.c.bf16 %v204_v33, %v203_v32 }
  0xed   :  { %218 = vst [vmem:[%s354_s3 + $0x8] sm:$0xff] %v243_v34 }

// kernel: transformer_forward.45
= control target key start
LH: loop header
LB: loop body
LE: loop exit
PB: predicated region body
PF: predicated region fallthrough
CT: control target
= control target key end

     0   :  { %v294_v2 = vmov 0   ;;  %s375_s0 = inlined_call_operand.vmem [shape: bf16[16,128], index: 0, kind: input, shape index: {}]   ;;  %s376_s1 = inlined_call_operand.vmem [shape: bf16[128,256], index: 1, kind: input, shape index: {}]   ;;  %s377_s2 = inlined_call_operand.vmem [shape: f32[1,256], index: 2, kind: input, shape index: {}]   ;;  %s378_s3 = inlined_call_operand.hbm [shape: f32[16,256], index: 3, kind: output, shape index: {}]  }
   0x1   :  { %v247_v0 = vld [vmem:[%s376_s1 + $0x74] ss:$8 sps:$4 sm:$0xff]   ;;  %v249_v1 = vld [vmem:[%s376_s1 + $0x70] ss:$8 sps:$4 sm:$0xff]   ;;  %164 = vmatprep.mubr.bf16.mxu0 %v294_v2  ;;  %v250_v3 = vld [vmem:[%s376_s1 + $0x64] ss:$8 sps:$4 sm:$0xff]  }
   0x2   :  { %132 = vmatprep.subr.bf16.mxu0 %v247_v0  ;;  %v252_v4 = vld [vmem:[%s376_s1 + $0x60] ss:$8 sps:$4 sm:$0xff]   ;;  %v253_v5 = vld [vmem:[%s376_s1 + $0x54] ss:$8 sps:$4 sm:$0xff]   ;;  %v255_v6 = vld [vmem:[%s376_s1 + $0x50] ss:$8 sps:$4 sm:$0xff]  }
   0x3   :  { %133 = vmatpush1.bf16.msra.mxu0 %v249_v1  ;;  %v256_v7 = vld [vmem:[%s376_s1 + $0x44] ss:$8 sps:$4 sm:$0xff]   ;;  %v258_v8 = vld [vmem:[%s376_s1 + $0x40] ss:$8 sps:$4 sm:$0xff]  }
   0x4   :  { %134 = vmatprep.subr.bf16.mxu0 %v250_v3 }
   0x7   :  { %135 = vmatpush1.bf16.msra.mxu0 %v252_v4 }
   0x8   :  { %136 = vmatprep.subr.bf16.mxu0 %v253_v5 }
   0xb   :  { %137 = vmatpush1.bf16.msra.mxu0 %v255_v6 }
   0xc   :  { %8 = vsyncpa [#allocation4], 0  ;;  %138 = vmatprep.subr.bf16.mxu0 %v256_v7  ;;  %v259_v9 = vld [vmem:[%s376_s1 + $0x34] ss:$8 sps:$4 sm:$0xff]   ;;  %v261_v10 = vld [vmem:[%s376_s1 + $0x30] ss:$8 sps:$4 sm:$0xff]   ;;  %v192_v18 = vlaneseq }
   0xd   :  { %v262_v11 = vld [vmem:[%s376_s1 + $0x24] ss:$8 sps:$4 sm:$0xff]   ;;  %v264_v12 = vld [vmem:[%s376_s1 + $0x20] ss:$8 sps:$4 sm:$0xff]   ;;  %v265_v13 = vld [vmem:[%s376_s1 + $0x14] ss:$8 sps:$4 sm:$0xff]  }
   0xe   :  { %v267_v14 = vld [vmem:[%s376_s1 + $0x10] ss:$8 sps:$4 sm:$0xff]   ;;  %v268_v15 = vld [vmem:[%s376_s1 + $0x4] ss:$8 sps:$4 sm:$0xff]   ;;  %v270_v16 = vld [vmem:[%s376_s1] ss:$8 sps:$4 sm:$0xff]  }
   0xf   :  { %139 = vmatpush1.bf16.msra.mxu0 %v258_v8  ;;  %v271_v17 = vld [vmem:[%s375_s0] sm:$0xff]   ;;  %v193_v19 = vshrl.u32 %v192_v18, 7  ;;  %s295_s1 = smov [#allocation3]  }
  0x10   :  { %140 = vmatprep.subr.bf16.mxu0 %v259_v9  ;;  %v190_v21 = vld [vmem:[%s377_s2] sm:$0x3]  ;;  %s215_s21 = sshll.u32 %s295_s1, 4  ;;  %s216_s21 = int_to_ptr.vmem [resolvable:$true] %s215_s21 }
  0x11   :  { %v194_v20 = vsub.s32 0, %v193_v19  ;;  %v198_v22 = vsub.s32 1, %v193_v19  ;;  %s272_s0 = scalar_lea.vmem %s216_s21, 512  ;;  %p277_p1 = scmp.lt.s32.totalorder %s216_s21, %s216_s21 }
  0x12   :  { %p273_p0 = scmp.ne.s32.totalorder %s216_s21, %s272_s0  ;;  %p278_p2 = scmp.lt.s32.totalorder %s272_s0, %s272_s0 }
  0x13   :  { %141 = vmatpush1.bf16.msra.mxu0 %v261_v10  ;;  %v195_v23 = vrot.slane %v190_v21, %v194_v20  ;;  %v199_v24 = vrot.slane %v190_v21, %v198_v22 }
  0x14   :  { %142 = vmatprep.subr.bf16.mxu0 %v262_v11  ;;  %p279_p3 = por %p278_p2, %p277_p1 }
  0x16   :  { %p280_p4 = pnand %p279_p3, %p273_p0 }
  0x17   :  { %143 = vmatpush1.bf16.msra.mxu0 %v264_v12 }
  0x18   :  { %144 = vmatprep.subr.bf16.mxu0 %v265_v13 }
  0x1b   :  { %145 = vmatpush1.bf16.msra.mxu0 %v267_v14 }
  0x1c   :  { %146 = vmatprep.subr.bf16.mxu0 %v268_v15 }
  0x1f   :  { %147 = vmatpush1.bf16.msra.mxu0 %v270_v16 }
  0x22   :  { %165 = vmatmul.mubr.bf16.vlgmr.msra.gmra.mxu0 %v271_v17 }
  0xe2   :  { %v166_v25 = vpop.f32.mrf.mxu0 }
  0xe3   :  { %v202_v26 = vadd.f32 %v195_v23, %v166_v25 }
  0xe4   :  { %v168_v27 = vpop.f32.mrf.mxu0 }
  0xe5   :  { %206 = vst [vmem:[#allocation3] sm:$0xff] %v202_v26  ;;  %v203_v28 = vadd.f32 %v199_v24, %v168_v27 }
  0xe6   :  { %v170_v29 = vpop.f32.mrf.mxu0 }
  0xe7   :  { %207 = vst [vmem:[#allocation3 + $0x8] sm:$0xff] %v203_v28  ;;  %v204_v30 = vadd.f32 %v195_v23, %v170_v29 }
  0xe8   :  { %v172_v31 = vpop.f32.mrf.mxu0 }
  0xe9   :  { %208 = vst [vmem:[#allocation3 + $0x10] sm:$0xff] %v204_v30  ;;  %v205_v32 = vadd.f32 %v199_v24, %v172_v31 }
  0xeb   :  { %209 = vst [vmem:[#allocation3 + $0x18] sm:$0xff] %v205_v32 }
  0xec   :  { %283 = shalt.err (!%p280_p4)
}
  0xed   :  { %s296_s2 = smov 256   ;;  %s297_s22 = smov 16  }
  0xee   :  { %221 = dma.vmem_to_hbm [thread:$0]  %s216_s21, 512, %s378_s3, [#allocation4], %s296_s2, %s296_s2, %s297_s22  }
  0xef   :  { %292 = dma.done.wait [#allocation4], 512  }
  0xf0   :  { %293 = vsyncadd [#allocation4], 4294966784 }
  0xf1   :  { %225 = vsyncpa [#allocation4], 1 }

// kernel: transformer_forward.35
= control target key start
LH: loop header
LB: loop body
LE: loop exit
PB: predicated region body
PF: predicated region fallthrough
CT: control target
= control target key end

     0   :  { %s1701_s30 = smov 0   ;;  %s1703_s10 = smov 0   ;;  %s1937_s0 = inlined_call_operand.vmem [shape: bf16[2,8,128], index: 0, kind: input, shape index: {}]   ;;  %s1938_s1 = inlined_call_operand.vmem [shape: bf16[2,8,128], index: 1, kind: input, shape index: {}]   ;;  %s1939_s2 = inlined_call_operand.vmem [shape: bf16[2,8,256], index: 2, kind: input, shape index: {}, may-alias: {2,3}]   ;;  %s1940_s3 = inlined_call_operand.vmem [shape: bf16[2,8,256], index: 3, kind: input, shape index: {}, may-alias: {2,3}]   ;;  %s1941_s4 = inlined_call_operand.vmem [shape: f32[2,1,8], index: 4, kind: input, shape index: {}]   ;;  %s1942_s5 = inlined_call_operand.vmem [shape: bf16[128,128], index: 5, kind: input, shape index: {}]   ;;  %s1943_s6 = inlined_call_operand.vmem [shape: f32[1,128], index: 6, kind: input, shape index: {}]   ;;  %s1944_s7 = inlined_call_operand.vmem [shape: f32[1,128], index: 7, kind: input, shape index: {}]   ;;  %s1945_s8 = inlined_call_operand.vmem [shape: f32[1,128], index: 8, kind: input, shape index: {}]   ;;  %s1946_s9 = inlined_call_operand.vmem [shape: bf16[2,8,128], index: 9, kind: output, shape index: {}]  }
   0x1   :  { %s1705_s11 = smov 0  }
   0x2 LB: > { %s38_s12 = sadd.s32 1, %s1638_s10  ;;  %p1422_p0 = scmp.ge.s32.totalorder %s1642_s11, 1  ;;  %s1642_s11 = sphi %s1705_s11, %s19_s11   ;;  %s1638_s10 = sphi %s1703_s10, %s1948_s10   ;;  %s1634_s30 = sphi %s1701_s30, %s1947_s30  }
   0x3   : > { %p40_p1 = scmp.ge.s32.totalorder %s38_s12, 2  ;;  %p372_p2 = scmp.lt.s32.totalorder %s1642_s11, 3 }
   0x5   : > { %s1950_s12 = smov (%p40_p1, %s38_s12), 0  ;;  %p373_p3 = pnand %p1422_p0, %p372_p2 }
   0x6   : > { %p444_p4 = scmp.lt.s32.totalorder (!%p373_p3), %s1634_s30, 1  ;;  %s1646_s21 = smov (!%p373_p3), 96  }
   0x7   : > { %376 = sbr.rel (%p373_p3) target bundleno = 1886 (0x75e), region = 56  ;;  %s1647_s22 = smov (!%p373_p3), 64  }
   0x8   : > { %s1650_s26 = smov (!%p373_p3), 32  }
   0xc   : > { %v1644_v0 = vmov 0.0   ;;  %vm1645_vm0 = vmmov 0   ;;  %s1952_s30 = smov (!%p444_p4, %s1634_s30), 1  ;;  %vm509_vm1 = vcmask 261120   ;;  %vm495_vm2 = vcmask 7168  }
   0xd   : > { %1483 = vmatprep.subr.bf16.mxu0 %v1644_v0  ;;  %504 = vst [vmem:[#allocation4] sm:$0xff] %v1644_v0  ;;  %1485 = vmatprep.mubr.msk.bf16.mxu0 %vm1645_vm0, %v1644_v0  ;;  %s1456_s13 = sshll.u32 %s1952_s30, 3  ;;  %s1730_s14 = sshll.u32 %s1952_s30, 2  ;;  %v1648_v6 = vmov -1e+30   ;;  %500 = vst.msk [vmem:[#allocation3] sm:$0xff] %vm495_vm2, %v1644_v0 }
   0xe   : > { %1507 = vmatprep.subr.bf16.mxu1 %v1644_v0  ;;  %1509 = vmatprep.mubr.msk.bf16.mxu1 %vm1645_vm0, %v1644_v0  ;;  %s466_s17 = scalar_lea.vmem %s1939_s2, %s1456_s13  ;;  %s457_s20 = scalar_lea.vmem %s1938_s1, %s1730_s14  ;;  %496 = vst.msk [vmem:[#allocation2] sm:$0xff] %vm495_vm2, %v1648_v6  ;;  %497 = vst.msk [vmem:[#allocation2 + $0x8] sm:$0xff] %vm495_vm2, %v1648_v6  ;;  %vm565_vm3 = vcmask 64512   ;;  %v1649_v20 = vmov 0   ;;  %vm600_vm4 = vcmask 1043456   ;;  %vm794_vm5 = vcmask 523520  }
   0xf   : > { %v506_v1 = vld [vmem:[%s466_s17] sm:$0xf]  ;;  %498 = vst.msk [vmem:[#allocation2 + $0x10] sm:$0xff] %vm495_vm2, %v1648_v6  ;;  %499 = vst.msk [vmem:[#allocation2 + $0x18] sm:$0xff] %vm495_vm2, %v1648_v6  ;;  %s482_s25 = scalar_lea.vmem %s1941_s4, %s1952_s30  ;;  %1582 = vset.pattern.permute.xlu0 %v1649_v20  ;;  %1583 = vset.pattern.permute.xlu1 %v1649_v20  ;;  %s1350_s29 = scalar_lea.vmem %s1940_s3, %s1456_s13  ;;  %vm935_vm6 = vcmask 785920   ;;  %vm1076_vm7 = vcmask 1048320  }
  0x10   : > { %v514_v2 = vsel %vm509_vm1, %v506_v1, 0  ;;  %v1435_v3 = vcombine.low %v506_v1, %v506_v1  ;;  %v505_v4 = vld [vmem:[%s457_s20] sm:$0xf]  ;;  %501 = vst.msk [vmem:[#allocation3 + $0x8] sm:$0xff] %vm495_vm2, %v1644_v0  ;;  %502 = vst.msk [vmem:[#allocation3 + $0x10] sm:$0xff] %vm495_vm2, %v1644_v0  ;;  %s450_s13 = scalar_lea.vmem %s1937_s0, %s1730_s14  ;;  %s489_s23 = scalar_lea.vmem %s1946_s9, %s1730_s14 }
  0x11   : > { %1484 = vmatpush3.bf16.xpose.msra.mxu0 %v514_v2  ;;  %v1434_v5 = vcombine.low %v505_v4, %v505_v4  ;;  %503 = vst.msk [vmem:[#allocation3 + $0x18] sm:$0xff] %vm495_vm2, %v1644_v0  ;;  %v1773_v13 = vld [vmem:[%s482_s25] ss:$0 sm:$0xff]  ;;  %v1786_v27 = vld [vmem:[%s1350_s29 + $0x4] sm:$0xf] }
  0x12   : > { %655 = vrot.lane.b32.xlu1 %v1435_v3, %s1646_s21  ;;  %1489 = vmatprep.subr.bf16.mxu0 %v1644_v0  ;;  %v602_v30 = vsel %vm600_vm4, %v1786_v27, 0 }
  0x15   : > { %v1784_v25 = vld [vmem:[#allocation2] sm:$0xff]  ;;  %v706_v2 = vld [vmem:[#allocation2 + $0x8] sm:$0xff] }
  0x16   : > { %650 = vrot.lane.b32.xlu1 %v1434_v5, %s1646_s21  ;;  %v1818_v43 = vld [vmem:[#allocation2 + $0x10] sm:$0xff] }
  0x18   : > { %1486 = vmatmul.mubr.msk.bf16.vlgmr.msra.gmra.mxu0 %vm509_vm1, %v505_v4 }
  0x19   : > { %1491 = vmatprep.mubr.msk.bf16.mxu0 %vm1645_vm0, %v1644_v0  ;;  %1490 = vmatpush3.bf16.msra.mxu0 %v602_v30 }
  0x1a   : > { %799 = vrot.lane.b32.xlu1 %v1435_v3, %s1647_s22  ;;  %1495 = vmatprep.subr.bf16.mxu0 %v1644_v0 }
  0x1e   : > { %797 = vrot.lane.b32.xlu1 %v1434_v5, %s1647_s22 }
  0x22   : > { %940 = vrot.lane.b32.xlu1 %v1435_v3, %s1650_s26 }
  0x26   : > { %938 = vrot.lane.b32.xlu1 %v1434_v5, %s1650_s26  ;;  %v991_v5 = vld [vmem:[#allocation2 + $0x18] sm:$0xff] }
  0x84   : > { %v656_v7 = vpop.permute.xlu1 %655 }
  0x85   : > { %v661_v41 = vsel %vm509_vm1, %v656_v7, 0  ;;  %v1437_v7 = vcombine.low %v1786_v27, %v1786_v27 }
  0x88   : > { %v1762_v8 = vpop.permute.xlu1 %650 }
  0x8c   : > { %v800_v9 = vpop.permute.xlu1 %799 }
  0x8d   : > { %v805_v10 = vsel %vm509_vm1, %v800_v9, 0 }
  0x8e   : > { %1508 = vmatpush3.bf16.xpose.msra.mxu1 %v805_v10 }
  0x8f   : > { %1519 = vmatprep.subr.bf16.mxu1 %v1644_v0 }
  0x90   : > { %v798_v11 = vpop.permute.xlu1 %797 }
  0x94   : > { %v941_v31 = vpop.permute.xlu1 %940 }
  0x95   : > { %1510 = vmatmul.mubr.msk.bf16.vlgmr.msra.gmra.mxu1 %vm509_vm1, %v798_v11  ;;  %v946_v32 = vsel %vm509_vm1, %v941_v31, 0 }
  0x96   : > { %1521 = vmatprep.mubr.msk.bf16.mxu1 %vm1645_vm0, %v1644_v0  ;;  %1520 = vmatpush3.bf16.xpose.msra.mxu1 %v946_v32 }
  0x97   : > { %1531 = vmatprep.subr.bf16.mxu1 %v1644_v0 }
  0x98   : > { %v939_v35 = vpop.permute.xlu1 %938 }
  0x9d   : > { %1522 = vmatmul.mubr.msk.bf16.vlgmr.msra.gmra.mxu1 %vm509_vm1, %v939_v35 }
  0x9e   : > { %1547 = vmatprep.mubr.msk.bf16.mxu1 %vm1645_vm0, %v1644_v0 }
  0xd8   : > { %v550_v12 = vpop.f32.mrf.mxu0 }
  0xd9   : > { %v556_v14 = vmul.f32 0.17677669, %v550_v12 }
  0xda   : > { %v1487_v15 = vpop.f32.mrf.mxu0 }
  0xdb   : > { %v563_v16 = vadd.f32 %v1773_v13, %v556_v14 }
  0xdc   : > { %v553_v17 = vpop.f32.mrf.mxu0 }
  0xdd   : > { %v566_v18 = vsel %vm565_vm3, %v563_v16, -inf }
  0xde   : > { %567 = vmax.xlane.f32.xlu0 %v566_v18  ;;  %v1488_v19 = vpop.f32.mrf.mxu0 }
 0x155   : > { %v841_v21 = vpop.f32.mrf.mxu1 }
 0x156   : > { %v847_v33 = vmul.f32 0.17677669, %v841_v21 }
 0x157   : > { %v1511_v22 = vpop.f32.mrf.mxu1 }
 0x158   : > { %v1802_v34 = vadd.f32 %v1773_v13, %v847_v33 }
 0x159   : > { %v844_v23 = vpop.f32.mrf.mxu1 }
 0x15a   : > { %v851_v36 = vsel %vm565_vm3, %v1802_v34, -inf }
 0x15b   : > { %v1512_v24 = vpop.f32.mrf.mxu1 }
 0x15d   : > { %v982_v47 = vpop.f32.mrf.mxu1 }
 0x15e   : > { %v988_v55 = vmul.f32 0.17677669, %v982_v47  ;;  %v581_v47 = vld [vmem:[#allocation3] sm:$0xff] }
 0x15f   : > { %v1523_v48 = vpop.f32.mrf.mxu1 }
 0x160   : > { %v989_v60 = vadd.f32 %v1773_v13, %v988_v55 }
 0x161   : > { %v985_v49 = vpop.f32.mrf.mxu1 }
 0x162   : > { %v992_v1 = vsel %vm565_vm3, %v989_v60, -inf }
 0x163   : > { %v1524_v50 = vpop.f32.mrf.mxu1 }
 0x167   : > { %v568_v26 = vpop.xlane.xlu0 %567 }
 0x168   : > { %v1789_v28 = vmax.f32 %v1784_v25, %v568_v26 }
 0x16a   : > { %v570_v29 = vsub.f32 %v1784_v25, %v1789_v28  ;;  %646 = vst.msk [vmem:[#allocation2] sm:$0xff] %vm495_vm2, %v1789_v28  ;;  %575 = vperm.xlu0 %1582, %v1789_v28  }
 0x189   : > { %852 = vmax.xlane.f32.xlu0 %v851_v36 }
 0x1e5   : > { %v576_v37 = vpop.permute.xlu0 %575 }
 0x1e6   : > { %v578_v38 = vsub.f32 %v563_v16, %v576_v37 }
 0x1e8   : > { %v579_v39 = vmul.f32 1.442695, %v578_v38 }
 0x1ea   : > { %1594 = vpow2.f32 %v579_v39  ;;  %v571_v39 = vmul.f32 1.442695, %v570_v29 }
 0x1f7   : > { %v1595_v40 = vpop.eup %1594 }
 0x1f8   : > { %v596_v42 = vpack.c.bf16 %v1595_v40, %v1595_v40  ;;  %v583_v11 = vsel %vm565_vm3, %v1595_v40, 0.0 }
 0x1fa   : > { %1492 = vmatmul.mubr.msk.bf16.vlgmr.msra.gmra.mxu0 %vm565_vm3, %v596_v42 }
 0x1fb   : > { %1496 = vmatpush3.bf16.xpose.msra.mxu0 %v661_v41  ;;  %1497 = vmatprep.mubr.msk.bf16.mxu0 %vm1645_vm0, %v1644_v0 }
 0x1fc   : > { %1501 = vmatprep.subr.bf16.mxu0 %v1644_v0 }
 0x202   : > { %1498 = vmatmul.mubr.msk.bf16.vlgmr.msra.gmra.mxu0 %vm509_vm1, %v1762_v8 }
 0x203   : > { %1503 = vmatprep.mubr.msk.bf16.mxu0 %vm1645_vm0, %v1644_v0 }
 0x212   : > { %v853_v44 = vpop.xlane.xlu0 %852 }
 0x213   : > { %v1821_v45 = vmax.f32 %v1818_v43, %v853_v44 }
 0x215   : > { %v855_v46 = vsub.f32 %v1818_v43, %v1821_v45  ;;  %937 = vst.msk [vmem:[#allocation2 + $0x10] sm:$0xff] %vm495_vm2, %v1821_v45  ;;  %860 = vperm.xlu0 %1582, %v1821_v45  }
 0x217   : > { %v856_v40 = vmul.f32 1.442695, %v855_v46  ;;  %v723_v46 = vld [vmem:[#allocation3 + $0x8] sm:$0xff] }
 0x290   : > { %v861_v12 = vpop.permute.xlu0 %860 }
 0x2ba   : > { %v1828_v51 = vpop.f32.mrf.mxu0 }
 0x2bc   : > { %v1493_v52 = vpop.f32.mrf.mxu0 }
 0x2be   : > { %v641_v53 = vpop.f32.mrf.mxu0 }
 0x2c0   : > { %v1494_v54 = vpop.f32.mrf.mxu0 }
 0x2c1   : > { %v867_v54 = vld [vmem:[#allocation3 + $0x10] sm:$0xff] }
 0x2c2   : > { %v697_v56 = vpop.f32.mrf.mxu0 }
 0x2c3   : > { %v703_v57 = vmul.f32 0.17677669, %v697_v56 }
 0x2c4   : > { %v1499_v58 = vpop.f32.mrf.mxu0 }
 0x2c5   : > { %v704_v59 = vadd.f32 %v1773_v13, %v703_v57  ;;  %v863_v13 = vsub.f32 %v1802_v34, %v861_v12  ;;  %v1008_v58 = vld [vmem:[#allocation3 + $0x18] sm:$0xff] }
 0x2c6   : > { %v700_v61 = vpop.f32.mrf.mxu0 }
 0x2c7   : > { %v707_v62 = vsel %vm565_vm3, %v704_v59, -inf  ;;  %v864_v16 = vmul.f32 1.442695, %v863_v13 }
 0x2c8   : > { %708 = vmax.xlane.f32.xlu1 %v707_v62  ;;  %v1500_v63 = vpop.f32.mrf.mxu0 }
 0x2cc   : > { %993 = vmax.xlane.f32.xlu1 %v992_v1 }
 0x351   : > { %v709_v3 = vpop.xlane.xlu1 %708 }
 0x352   : > { %v710_v4 = vmax.f32 %v706_v2, %v709_v3 }
 0x354   : > { %v711_v6 = vsub.f32 %v706_v2, %v710_v4  ;;  %796 = vst.msk [vmem:[#allocation2 + $0x8] sm:$0xff] %vm495_vm2, %v710_v4  ;;  %716 = vperm.xlu1 %1583, %v710_v4  }
 0x355   : > { %v994_v8 = vpop.xlane.xlu1 %993 }
 0x356   : > { %v995_v9 = vmax.f32 %v991_v5, %v994_v8  ;;  %v712_v35 = vmul.f32 1.442695, %v711_v6 }
 0x358   : > { %741 = vrot.lane.b32.xlu1 %v1437_v7, %s1646_s21  ;;  %v996_v10 = vsub.f32 %v991_v5, %v995_v9  ;;  %1078 = vst.msk [vmem:[#allocation2 + $0x18] sm:$0xff] %vm495_vm2, %v995_v9 }
 0x35a   : > { %v997_v42 = vmul.f32 1.442695, %v996_v10 }
 0x35c   : > { %1001 = vperm.xlu1 %1583, %v995_v9  }
 0x360   : > { %882 = vrot.lane.b32.xlu1 %v1437_v7, %s1647_s22 }
 0x364   : > { %1023 = vrot.lane.b32.xlu1 %v1437_v7, %s1650_s26 }
 0x388   : > { %584 = vadd.xlane.f32.xlu1 %v583_v11 }
 0x3cf   : > { %v717_v14 = vpop.permute.xlu1 %716 }
 0x3d0   : > { %v719_v15 = vsub.f32 %v704_v59, %v717_v14 }
 0x3d2   : > { %v720_v17 = vmul.f32 1.442695, %v719_v15 }
 0x3d3   : > { %v742_v18 = vpop.permute.xlu1 %741 }
 0x3d4   : > { %1596 = vpow2.f32 %v720_v17  ;;  %v747_v19 = vsel %vm600_vm4, %v742_v18, 0 }
 0x3d5   : > { %1502 = vmatpush3.bf16.msra.mxu0 %v747_v19  ;;  %1598 = vpow2.f32 %v864_v16 }
 0x3d6   : > { %1513 = vmatprep.subr.bf16.mxu0 %v1644_v0 }
 0x3d7   : > { %v1002_v20 = vpop.permute.xlu1 %1001 }
 0x3d8   : > { %v1004_v21 = vsub.f32 %v989_v60, %v1002_v20  ;;  %v1586_v20 = vld [vmem:[%s1942_s5 + $0x38] sm:$0xff]  }
 0x3d9   : > { %1532 = vmatpush3.bf16.msra.mxu1 %v1586_v20 }
 0x3da   : > { %v1005_v22 = vmul.f32 1.442695, %v1004_v21  ;;  %1533 = vmatprep.subr.bf16.mxu1 %v1644_v0  ;;  %v1587_v21 = vld [vmem:[%s1942_s5 + $0x30] sm:$0xff]  }
 0x3db   : > { %v883_v23 = vpop.permute.xlu1 %882 }
 0x3dc   : > { %1600 = vpow2.f32 %v1005_v22  ;;  %v888_v30 = vsel %vm600_vm4, %v883_v23, 0  ;;  %v1588_v22 = vld [vmem:[%s1942_s5 + $0x28] sm:$0xff]   ;;  %v1589_v23 = vld [vmem:[%s1942_s5 + $0x20] sm:$0xff]  }
 0x3dd   : > { %1602 = vpow2.f32 %v712_v35  ;;  %1534 = vmatpush3.bf16.msra.mxu1 %v1587_v21 }
 0x3de   : > { %1604 = vpow2.f32 %v571_v39  ;;  %1535 = vmatprep.subr.bf16.mxu1 %v1644_v0 }
 0x3df   : > { %v1024_v33 = vpop.permute.xlu1 %1023  ;;  %1606 = vpow2.f32 %v856_v40 }
 0x3e0   : > { %v1029_v38 = vsel %vm600_vm4, %v1024_v33, 0  ;;  %1608 = vpow2.f32 %v997_v42 }
 0x3e1   : > { %v1597_v24 = vpop.eup %1596  ;;  %1536 = vmatpush3.bf16.msra.mxu1 %v1588_v22 }
 0x3e2   : > { %v725_v26 = vsel %vm565_vm3, %v1597_v24, 0.0  ;;  %v737_v27 = vpack.c.bf16 %v1597_v24, %v1597_v24  ;;  %v1599_v31 = vpop.eup %1598  ;;  %1537 = vmatprep.subr.bf16.mxu1 %v1644_v0  ;;  %v1590_v24 = vld [vmem:[%s1942_s5 + $0x18] sm:$0xff]  }
 0x3e3   : > { %726 = vadd.xlane.f32.xlu0 %v725_v26  ;;  %v869_v32 = vsel %vm565_vm3, %v1599_v31, 0.0  ;;  %v881_v37 = vpack.c.bf16 %v1599_v31, %v1599_v31  ;;  %v1591_v26 = vld [vmem:[%s1942_s5 + $0x10] sm:$0xff]  }
 0x3e4   : > { %1504 = vmatmul.mubr.msk.bf16.vlgmr.msra.gmra.mxu0 %vm565_vm3, %v737_v27  ;;  %v1592_v27 = vld [vmem:[%s1942_s5 + $0x8] sm:$0xff]  }
 0x3e5   : > { %1514 = vmatpush3.bf16.msra.mxu0 %v888_v30  ;;  %1515 = vmatprep.mubr.msk.bf16.mxu0 %vm1645_vm0, %v1644_v0  ;;  %v1593_v30 = vld [vmem:[%s1942_s5] sm:$0xff]  }
 0x3e6   : > { %1525 = vmatprep.subr.bf16.mxu0 %v1644_v0  ;;  %1538 = vmatpush3.bf16.msra.mxu1 %v1589_v23 }
 0x3e7   : > { %870 = vadd.xlane.f32.xlu0 %v869_v32  ;;  %1539 = vmatprep.subr.bf16.mxu1 %v1644_v0 }
 0x3e9   : > { %v1601_v34 = vpop.eup %1600 }
 0x3ea   : > { %v1010_v36 = vsel %vm565_vm3, %v1601_v34, 0.0  ;;  %v1022_v41 = vpack.c.bf16 %v1601_v34, %v1601_v34  ;;  %v1603_v25 = vpop.eup %1602  ;;  %1540 = vmatpush3.bf16.msra.mxu1 %v1590_v24 }
 0x3eb   : > { %1011 = vadd.xlane.f32.xlu1 %v1010_v36  ;;  %v1605_v28 = vpop.eup %1604  ;;  %v724_v52 = vmul.f32 %v1603_v25, %v723_v46  ;;  %1541 = vmatprep.subr.bf16.mxu1 %v1644_v0 }
 0x3ec   : > { %1516 = vmatmul.mubr.msk.bf16.vlgmr.msra.gmra.mxu0 %vm565_vm3, %v881_v37  ;;  %v1607_v29 = vpop.eup %1606  ;;  %v582_v48 = vmul.f32 %v1605_v28, %v581_v47 }
 0x3ed   : > { %1526 = vmatpush3.bf16.msra.mxu0 %v1029_v38  ;;  %1527 = vmatprep.mubr.msk.bf16.mxu0 %vm1645_vm0, %v1644_v0  ;;  %v1609_v44 = vpop.eup %1608  ;;  %v868_v56 = vmul.f32 %v1607_v29, %v867_v54 }
 0x3ee   : > { %v1009_v60 = vmul.f32 %v1609_v44, %v1008_v58  ;;  %1542 = vmatpush3.bf16.msra.mxu1 %v1591_v26 }
 0x3ef   : > { %1543 = vmatprep.subr.bf16.mxu1 %v1644_v0 }
 0x3f2   : > { %1544 = vmatpush3.bf16.msra.mxu1 %v1592_v27 }
 0x3f3   : > { %1545 = vmatprep.subr.bf16.mxu1 %v1644_v0 }
 0x3f4   : > { %1528 = vmatmul.mubr.msk.bf16.vlgmr.msra.gmra.mxu0 %vm565_vm3, %v1022_v41 }
 0x3f6   : > { %1546 = vmatpush3.bf16.msra.mxu1 %v1593_v30 }
 0x3fc   : > { %733 = vperm.xlu1 %1583, %v1603_v25  }
 0x3fd   : > { %592 = vperm.xlu0 %1582, %v1605_v28  }
 0x401   : > { %877 = vperm.xlu0 %1582, %v1607_v29  }
 0x405   : > { %1018 = vperm.xlu0 %1582, %v1609_v44  }
 0x411   : > { %v585_v49 = vpop.xlane.xlu1 %584 }
 0x412   : > { %v586_v50 = vadd.f32 %v585_v49, %v582_v48 }
 0x414   : > { %588 = vst.msk [vmem:[#allocation3] sm:$0xff] %vm495_vm2, %v586_v50 }
 0x41b   : > { %v1082_v43 = vld [vmem:[#allocation3] sm:$0xff] }
 0x41c   : > { %1610 = vrcp.f32 %v1082_v43 }
 0x429   : > { %v1611_v45 = vpop.eup %1610 }
 0x42a   : > { %1087 = vperm.xlu0 %1582, %v1611_v45  }
 0x46c   : > { %v727_v53 = vpop.xlane.xlu0 %726 }
 0x46d   : > { %v728_v55 = vadd.f32 %v727_v53, %v724_v52 }
 0x46f   : > { %729 = vst.msk [vmem:[#allocation3 + $0x8] sm:$0xff] %vm495_vm2, %v728_v55 }
 0x470   : > { %v871_v57 = vpop.xlane.xlu0 %870 }
 0x471   : > { %v872_v59 = vadd.f32 %v871_v57, %v868_v56  ;;  %v1228_v57 = vld [vmem:[%s450_s13] sm:$0xf] }
 0x472   : > { %v1229_v58 = vunpack.c.l.bf16 %v1228_v57 }
 0x473   : > { %873 = vst.msk [vmem:[#allocation3 + $0x10] sm:$0xff] %vm495_vm2, %v872_v59 }
 0x474   : > { %v1012_v61 = vpop.xlane.xlu1 %1011 }
 0x475   : > { %v1013_v62 = vadd.f32 %v1012_v61, %v1009_v60  ;;  %v1451_v60 = vld [vmem:[%s1943_s6] ss:$0 sm:$0xff] }
 0x476   : > { %v1092_v8 = vld [vmem:[#allocation3 + $0x8] sm:$0xff] }
 0x477   : > { %1014 = vst.msk [vmem:[#allocation3 + $0x18] sm:$0xff] %vm495_vm2, %v1013_v62 }
 0x478   : > { %v593_v63 = vpop.permute.xlu0 %592  ;;  %v734_v32 = vpop.permute.xlu1 %733 }
 0x479   : > { %v595_v1 = vmul.f32 0.0, %v593_v63 }
 0x47a   : > { %v1102_v2 = vld [vmem:[#allocation3 + $0x10] sm:$0xff] }
 0x47b   : > { %v644_v3 = vadd.f32 %v1828_v51, %v595_v1  ;;  %1612 = vrcp.f32 %v1102_v2 }
 0x47c   : > { %1614 = vrcp.f32 %v1092_v8  ;;  %v878_v36 = vpop.permute.xlu0 %877 }
 0x47d   : > { %645 = vst.msk [vmem:[#allocation4] sm:$0xff] %vm509_vm1, %v644_v3 }
 0x47e   : > { %v1112_v11 = vld [vmem:[#allocation3 + $0x18] sm:$0xff] }
 0x47f   : > { %1616 = vrcp.f32 %v1112_v11  ;;  %v1452_v11 = vld [vmem:[%s1944_s7] ss:$0 sm:$0xff] }
 0x480   : > { %v1019_v41 = vpop.permute.xlu0 %1018 }
 0x484   : > { %v730_v31 = vld [vmem:[#allocation4] sm:$0xff] }
 0x485   : > { %v736_v33 = vmul.f32 %v734_v32, %v730_v31 }
 0x488   : > { %v1613_v4 = vpop.eup %1612 }
 0x489   : > { %1107 = vperm.xlu0 %1582, %v1613_v4   ;;  %v1615_v16 = vpop.eup %1614 }
 0x48c   : > { %v1617_v19 = vpop.eup %1616 }
 0x4a4   : > { %v783_v5 = vpop.f32.mrf.mxu0 }
 0x4a5   : > { %790 = vrot.lane.b32.xlu1 %v783_v5, %s1650_s26  ;;  %v1088_v29 = vpop.permute.xlu0 %1087 }
 0x4a6   : > { %v1505_v6 = vpop.f32.mrf.mxu0 }
 0x4a8   : > { %v786_v7 = vpop.f32.mrf.mxu0 }
 0x4aa   : > { %v1506_v9 = vpop.f32.mrf.mxu0 }
 0x4ac   : > { %v924_v10 = vpop.f32.mrf.mxu0 }
 0x4ad   : > { %931 = vrot.lane.b32.xlu1 %v924_v10, %s1647_s22 }
 0x4ae   : > { %v1517_v12 = vpop.f32.mrf.mxu0 }
 0x4b0   : > { %v927_v51 = vpop.f32.mrf.mxu0 }
 0x4b1   : > { %v1453_v51 = vld [vmem:[%s1945_s8] ss:$0 sm:$0xff] }
 0x4b2   : > { %v1518_v13 = vpop.f32.mrf.mxu0 }
 0x4b4   : > { %v1065_v14 = vpop.f32.mrf.mxu0 }
 0x4b5   : > { %1072 = vrot.lane.b32.xlu1 %v1065_v14, %s1646_s21 }
 0x4b6   : > { %v1529_v15 = vpop.f32.mrf.mxu0 }
 0x4b8   : > { %v1068_v17 = vpop.f32.mrf.mxu0 }
 0x4b9   : > { %1097 = vperm.xlu1 %1583, %v1615_v16  }
 0x4ba   : > { %v1530_v18 = vpop.f32.mrf.mxu0 }
 0x4bd   : > { %1117 = vperm.xlu1 %1583, %v1617_v19  }
 0x504   : > { %v1108_v43 = vpop.permute.xlu0 %1107 }
 0x517   : > { %v791_v34 = vpop.permute.xlu1 %790 }
 0x518   : > { %v793_v35 = vadd.f32 %v791_v34, %v736_v33 }
 0x51a   : > { %795 = vst.msk [vmem:[#allocation4] sm:$0xff] %vm794_vm5, %v793_v35 }
 0x51f   : > { %v932_v39 = vpop.permute.xlu1 %931 }
 0x521   : > { %v874_v37 = vld [vmem:[#allocation4] sm:$0xff] }
 0x522   : > { %v880_v38 = vmul.f32 %v878_v36, %v874_v37 }
 0x524   : > { %v934_v40 = vadd.f32 %v932_v39, %v880_v38 }
 0x526   : > { %936 = vst.msk [vmem:[#allocation4] sm:$0xff] %vm935_vm6, %v934_v40 }
 0x527   : > { %v1073_v25 = vpop.permute.xlu1 %1072 }
 0x52d   : > { %v1015_v42 = vld [vmem:[#allocation4] sm:$0xff] }
 0x52e   : > { %v1021_v0 = vmul.f32 %v1019_v41, %v1015_v42 }
 0x530   : > { %v1075_v28 = vadd.f32 %v1073_v25, %v1021_v0 }
 0x532   : > { %1077 = vst.msk [vmem:[#allocation4] sm:$0xff] %vm1076_vm7, %v1075_v28 }
 0x534   : > { %v1098_v49 = vpop.permute.xlu1 %1097 }
 0x538   : > { %v1118_v53 = vpop.permute.xlu1 %1117 }
 0x539   : > { %v1084_v44 = vld [vmem:[#allocation4] sm:$0xff] }
 0x53a   : > { %v1090_v47 = vmul.f32 %v1088_v29, %v1084_v44 }
 0x53c   : > { %1091 = vst.msk [vmem:[#allocation4] sm:$0xff] %vm509_vm1, %v1090_v47 }
 0x543   : > { %v1094_v48 = vld [vmem:[#allocation4] sm:$0xff] }
 0x544   : > { %v1100_v50 = vmul.f32 %v1098_v49, %v1094_v48 }
 0x546   : > { %1101 = vst.msk [vmem:[#allocation4] sm:$0xff] %vm794_vm5, %v1100_v50 }
 0x54d   : > { %v1104_v45 = vld [vmem:[#allocation4] sm:$0xff] }
 0x54e   : > { %v1110_v46 = vmul.f32 %v1108_v43, %v1104_v45 }
 0x550   : > { %1111 = vst.msk [vmem:[#allocation4] sm:$0xff] %vm935_vm6, %v1110_v46 }
 0x557   : > { %v1114_v52 = vld [vmem:[#allocation4] sm:$0xff] }
 0x558   : > { %v1120_v54 = vmul.f32 %v1118_v53, %v1114_v52 }
 0x55a   : > { %1121 = vst.msk [vmem:[#allocation4] sm:$0xff] %vm1076_vm7, %v1120_v54 }
 0x561   : > { %v1122_v55 = vld [vmem:[#allocation4] sm:$0xff] }
 0x562   : > { %v1123_v56 = vpack.c.bf16 %v1122_v55, %v1122_v55 }
 0x564   : > { %1548 = vmatmul.mubr.bf16.vlgmr.msra.gmra.mxu1 %v1123_v56 }
 0x624   : > { %v1222_v59 = vpop.f32.mrf.mxu1 }
 0x625   : > { %v1230_v61 = vadd.f32 %v1229_v58, %v1222_v59 }
 0x626   : > { %v1549_v62 = vpop.f32.mrf.mxu1 }
 0x627   : > { %v1238_v63 = vadd.f32 %v1451_v60, %v1230_v61 }
 0x628   : > { %v1225_v1 = vpop.f32.mrf.mxu1 }
 0x629   : > { %1239 = vadd.xlane.f32.xlu0 %v1238_v63 }
 0x62a   : > { %v1550_v2 = vpop.f32.mrf.mxu1 }
 0x6b2   : > { %v1240_v3 = vpop.xlane.xlu0 %1239 }
 0x6b3   : > { %v1242_v4 = vmul.f32 0.0078125, %v1240_v3 }
 0x6b5   : > { %v1243_v5 = vsub.f32 %v1238_v63, %v1242_v4 }
 0x6b7   : > { %v1244_v6 = vmul.f32 %v1243_v5, %v1243_v5 }
 0x6b9   : > { %1245 = vadd.xlane.f32.xlu1 %v1244_v6 }
 0x742   : > { %v1246_v7 = vpop.xlane.xlu1 %1245 }
 0x743   : > { %v1247_v8 = vmul.f32 0.0078125, %v1246_v7 }
 0x745   : > { %v1248_v9 = vadd.f32 1e-05, %v1247_v8 }
 0x747   : > { %1618 = vrsqrt.f32 %v1248_v9 }
 0x754   : > { %v1619_v10 = vpop.eup %1618 }
 0x755   : > { %v1250_v12 = vmul.f32 %v1619_v10, %v1243_v5 }
 0x757   : > { %v1258_v13 = vmul.f32 %v1452_v11, %v1250_v12 }
 0x759   : > { %v1266_v14 = vadd.f32 %v1453_v51, %v1258_v13 }
 0x75b   : > { %v1267_v15 = vpack.c.bf16 %v1266_v14, %v1266_v14 }
 0x75d   : > { %1268 = vst [vmem:[%s489_s23] sm:$0xf] %v1267_v15 }
 0x75e PF: > { %s19_s11 = sadd.s32 1, %s1642_s11   ;;  %s1947_s30 = smov %s1638_s10 }
 0x75f   : > { %p16_p5 = scmp.ge.s32.totalorder %s19_s11, 4   ;;  %s1948_s10 = smov %s1950_s12 }
 0x761   :  { %18 = sbr.rel (!%p16_p5) target bundleno = 2 (0x2), region = 112 }

</bundles_post_ra>
